<compile_context>
chip_gen: v6e
topology: v6e:2x2x1
jax: 0.10.0
libtpu: 0.0.40
codegen_flags: <defaults>
</compile_context>

<pallas_src>
import math

import jax
import jax.numpy as jnp
from jax.experimental import pallas as pl
from jax.experimental.pallas import tpu as pltpu

D_MODEL = 512
NHEAD = 8
D_K = D_MODEL // NHEAD


# ----------------------------- Pallas kernel --------------------------------

def fused_attention_kernel(x_ref, wqkv_ref, bqkv_ref, wo_ref, bo_ref, o_ref):
    # x block: (Bb, T, C); wqkv: (C, 3C); bqkv: (1, 3C); wo: (C, C); bo: (1, C).
    Bb, T, C = x_ref.shape
    H = NHEAD
    dk = C // H

    # --- fused QKV projection: one lane-dense (Bb*T, C) @ (C, 3C) matmul ------
    x2 = x_ref[...].reshape(Bb * T, C)                                   # (M, C)
    qkv = jnp.dot(x2, wqkv_ref[...],
                  preferred_element_type=jnp.float32) + bqkv_ref[...]    # (M, 3C)
    # The 1/sqrt(dk) scale is already folded into the Q columns / Q bias.
    qkv3 = qkv.reshape(Bb, T, 3 * C)                                     # (Bb, T, 3C)

    # --- per-head scaled-dot-product attention (static unroll over H) ---------
    # Heads live in the lane dimension; each head is a 64-lane static slice and
    # a 3-D batched einsum (the well-supported 'btd,bsd->bts' pattern).
    ctx_heads = []
    for h in range(H):
        qh = qkv3[:, :, h * dk:(h + 1) * dk]                 # (Bb, T, dk), pre-scaled
        kh = qkv3[:, :, C + h * dk:C + (h + 1) * dk]         # (Bb, T, dk)
        vh = qkv3[:, :, 2 * C + h * dk:2 * C + (h + 1) * dk]  # (Bb, T, dk)

        s = jnp.einsum("btd,bsd->bts", qh, kh,
                       preferred_element_type=jnp.float32)   # (Bb, T, T)
        s = s - jnp.max(s, axis=-1, keepdims=True)            # stable softmax
        p = jnp.exp(s)
        attn = p / jnp.sum(p, axis=-1, keepdims=True)          # exact divide

        ctx_heads.append(jnp.einsum("bts,bsd->btd", attn, vh,
                                    preferred_element_type=jnp.float32))

    # Merge heads back into lanes (head h -> columns [h*dk,(h+1)*dk)), matching
    # the PyTorch transpose(1,2).view(B,T,C) layout, then one (M, C) @ (C, C)
    # output projection so the MXU does the head-sum inside the K contraction.
    ctx = jnp.concatenate(ctx_heads, axis=-1).reshape(Bb * T, C)          # (M, C)
    out = jnp.dot(ctx, wo_ref[...],
                  preferred_element_type=jnp.float32) + bo_ref[...]      # (M, C)

    o_ref[...] = out.reshape(Bb, T, C).astype(o_ref.dtype)   # lane-dense (.., 512)


# ------------------------------ Host wrapper ---------------------------------

@jax.jit
def simple_self_attention(x, params):
    """Forward pass of SimpleSelfAttention (mask=None path). x: (B, T, C) f32."""
    B, T, C = x.shape
    dk = D_K
    scale = 1.0 / math.sqrt(dk)

    # One-time host-side parameter re-layout (weights only, not activations):
    #   wqkv = [wq * scale | wk | wv]  (C, 3C);  bqkv = [bq * scale | bk | bv]  (1, 3C)
    wqkv = jnp.concatenate(
        [params["wq"] * scale, params["wk"], params["wv"]], axis=1)
    bqkv = jnp.concatenate(
        [params["bq"] * scale, params["bk"], params["bv"]]).reshape(1, 3 * C)
    wo = params["wo"]
    bo = params["bo"].reshape(1, C)

    # Batch blocking: feed up to ~256 rows (block_b * T) to the MXU per grid step.
    block_b = max(1, min(B, max(1, 256 // T)))
    while B % block_b != 0:
        block_b -= 1
    num_blocks = B // block_b

    # With a tiny grid, "arbitrary" avoids duplicating the resident weights per
    # TensorCore on v7x; with enough batch blocks, "parallel" uses the megacore.
    semantics = ("parallel",) if num_blocks >= 4 else ("arbitrary",)

    return pl.pallas_call(
        fused_attention_kernel,
        out_shape=jax.ShapeDtypeStruct((B, T, C), jnp.float32),
        grid=(num_blocks,),
        in_specs=[
            pl.BlockSpec((block_b, T, C), lambda b: (b, 0, 0)),   # x (per batch block)
            pl.BlockSpec((C, 3 * C), lambda b: (0, 0)),           # wqkv (resident)
            pl.BlockSpec((1, 3 * C), lambda b: (0, 0)),           # bqkv (resident)
            pl.BlockSpec((C, C), lambda b: (0, 0)),               # wo   (resident)
            pl.BlockSpec((1, C), lambda b: (0, 0)),               # bo   (resident)
        ],
        out_specs=pl.BlockSpec((block_b, T, C), lambda b: (b, 0, 0)),
        compiler_params=pltpu.CompilerParams(
            dimension_semantics=semantics,
            vmem_limit_bytes=32 * 1024 * 1024,
        ),
    )(x, wqkv, bqkv, wo, bo)


# ------------------------- Params & pure-JAX reference -----------------------

def init_params(key):
    """Deterministic init. Weights stored as (in, out) = W^T of the PyTorch layer."""
    ks = jax.random.split(key, 8)
    bound = 1.0 / math.sqrt(D_MODEL)

    def w(k):
        return jax.random.uniform(k, (D_MODEL, D_MODEL), jnp.float32, -bound, bound)

    def b(k):
        return jax.random.uniform(k, (D_MODEL,), jnp.float32, -bound, bound)

    return {
        "wq": w(ks[0]), "bq": b(ks[1]),
        "wk": w(ks[2]), "bk": b(ks[3]),
        "wv": w(ks[4]), "bv": b(ks[5]),
        "wo": w(ks[6]), "bo": b(ks[7]),
    }


def reference(x, params):
    """Pure-JAX reference matching the PyTorch forward (mask=None)."""
    B, T, C = x.shape
    H, dk = NHEAD, D_K
    q = x @ params["wq"] + params["bq"]
    k = x @ params["wk"] + params["bk"]
    v = x @ params["wv"] + params["bv"]

    def heads(t):
        return t.reshape(B, T, H, dk).transpose(0, 2, 1, 3)

    q, k, v = heads(q), heads(k), heads(v)
    scores = jnp.einsum("bhqd,bhkd->bhqk", q, k) / math.sqrt(dk)
    attn = jax.nn.softmax(scores, axis=-1)
    ctx = jnp.einsum("bhqk,bhkd->bhqd", attn, v)
    ctx = ctx.transpose(0, 2, 1, 3).reshape(B, T, C)
    return ctx @ params["wo"] + params["bo"]


if __name__ == "__main__":
    key = jax.random.PRNGKey(0)
    k_x, k_p = jax.random.split(key)

    B, T = 2, 8
    x = jax.random.normal(k_x, (B, T, D_MODEL), jnp.float32)
    params = init_params(k_p)

    out = jax.block_until_ready(simple_self_attention(x, params))
    ref = reference(x, params)

    assert out.shape == (B, T, D_MODEL)
    assert jnp.allclose(out, ref, atol=1e-3, rtol=1e-3), "mismatch vs reference"

    print("KERNEL_OK")
</pallas_src>

<mosaic_0001>
module attributes {stable_mosaic.version = 11 : i64} {
  func.func @fused_attention_kernel(%arg0: i32, %arg1: memref<2x8x512xf32, #tpu.memory_space<vmem>>, %arg2: memref<512x1536xf32, #tpu.memory_space<vmem>>, %arg3: memref<1x1536xf32, #tpu.memory_space<vmem>>, %arg4: memref<512x512xf32, #tpu.memory_space<vmem>>, %arg5: memref<1x512xf32, #tpu.memory_space<vmem>>, %arg6: memref<2x8x512xf32, #tpu.memory_space<vmem>>) attributes {dimension_semantics = [#tpu.dimension_semantics<arbitrary>], iteration_bounds = array<i64: 1>, scalar_prefetch = 0 : i64, scratch_operands = 0 : i64, tpu.core_type = #tpu.core_type<tc>, window_params = [{transform_indices = @transform_0, window_bounds = array<i64: 2, 8, 512>}, {pipeline_mode = #tpu.pipeline_mode<synchronous>, transform_indices = @transform_1, window_bounds = array<i64: 512, 1536>}, {pipeline_mode = #tpu.pipeline_mode<synchronous>, transform_indices = @transform_2, window_bounds = array<i64: 1, 1536>}, {pipeline_mode = #tpu.pipeline_mode<synchronous>, transform_indices = @transform_3, window_bounds = array<i64: 512, 512>}, {pipeline_mode = #tpu.pipeline_mode<synchronous>, transform_indices = @transform_4, window_bounds = array<i64: 1, 512>}, {transform_indices = @transform_5, window_bounds = array<i64: 2, 8, 512>}]} {
    %c0 = arith.constant 0 : index
    %c0_0 = arith.constant 0 : index
    %c0_1 = arith.constant 0 : index
    %0 = vector.load %arg1[%c0, %c0_0, %c0_1] : memref<2x8x512xf32, #tpu.memory_space<vmem>>, vector<2x8x512xf32>
    %1 = vector.shape_cast %0 : vector<2x8x512xf32> to vector<16x512xf32>
    %c0_2 = arith.constant 0 : index
    %c0_3 = arith.constant 0 : index
    %2 = vector.load %arg2[%c0_2, %c0_3] : memref<512x1536xf32, #tpu.memory_space<vmem>>, vector<512x1536xf32>
    %cst = arith.constant dense<0.000000e+00> : vector<16x1536xf32>
    %3 = tpu.matmul %1, %2, %cst {dimension_numbers = #tpu.dot_dimension_numbers<[1], [0], [0], [1], [0, 0, 1, 1], [], []>} : vector<16x512xf32>, vector<512x1536xf32>, vector<16x1536xf32> -> vector<16x1536xf32>
    %c0_4 = arith.constant 0 : index
    %c0_5 = arith.constant 0 : index
    %4 = vector.load %arg3[%c0_4, %c0_5] : memref<1x1536xf32, #tpu.memory_space<vmem>>, vector<1x1536xf32>
    %5 = vector.broadcast %4 : vector<1x1536xf32> to vector<16x1536xf32>
    %6 = arith.addf %3, %5 : vector<16x1536xf32>
    %7 = vector.shape_cast %6 : vector<16x1536xf32> to vector<2x8x1536xf32>
    %8 = vector.extract_strided_slice %7 {offsets = [0, 0, 0], sizes = [2, 8, 64], strides = [1, 1, 1]} : vector<2x8x1536xf32> to vector<2x8x64xf32>
    %9 = vector.extract_strided_slice %7 {offsets = [0, 0, 512], sizes = [2, 8, 64], strides = [1, 1, 1]} : vector<2x8x1536xf32> to vector<2x8x64xf32>
    %10 = vector.extract_strided_slice %7 {offsets = [0, 0, 1024], sizes = [2, 8, 64], strides = [1, 1, 1]} : vector<2x8x1536xf32> to vector<2x8x64xf32>
    "tpu.trace_start"() <{level = 10 : i32, message = "btd,bsd->bts"}> : () -> ()
    %cst_6 = arith.constant dense<0.000000e+00> : vector<2x8x8xf32>
    %11 = tpu.matmul %8, %9, %cst_6 {dimension_numbers = #tpu.dot_dimension_numbers<[2], [2], [1], [1], [0, 0, 0, 1, 1, 1], [0], [0]>} : vector<2x8x64xf32>, vector<2x8x64xf32>, vector<2x8x8xf32> -> vector<2x8x8xf32>
    "tpu.trace_stop"() : () -> ()
    %cst_7 = arith.constant dense<0xFF800000> : vector<2x8xf32>
    %12 = vector.multi_reduction <maximumf>, %11, %cst_7 [2] : vector<2x8x8xf32> to vector<2x8xf32>
    %13 = vector.shape_cast %12 : vector<2x8xf32> to vector<2x8x1xf32>
    %14 = vector.broadcast %13 : vector<2x8x1xf32> to vector<2x8x8xf32>
    %15 = arith.subf %11, %14 : vector<2x8x8xf32>
    %16 = math.exp %15 : vector<2x8x8xf32>
    %cst_8 = arith.constant dense<0.000000e+00> : vector<2x8xf32>
    %17 = vector.multi_reduction <add>, %16, %cst_8 [2] : vector<2x8x8xf32> to vector<2x8xf32>
    %18 = vector.shape_cast %17 : vector<2x8xf32> to vector<2x8x1xf32>
    %19 = vector.broadcast %18 : vector<2x8x1xf32> to vector<2x8x8xf32>
    %20 = arith.divf %16, %19 : vector<2x8x8xf32>
    "tpu.trace_start"() <{level = 10 : i32, message = "bts,bsd->btd"}> : () -> ()
    %cst_9 = arith.constant dense<0.000000e+00> : vector<2x8x64xf32>
    %21 = tpu.matmul %20, %10, %cst_9 {dimension_numbers = #tpu.dot_dimension_numbers<[2], [1], [1], [2], [0, 0, 0, 1, 1, 2], [0], [0]>} : vector<2x8x8xf32>, vector<2x8x64xf32>, vector<2x8x64xf32> -> vector<2x8x64xf32>
    "tpu.trace_stop"() : () -> ()
    %22 = vector.extract_strided_slice %7 {offsets = [0, 0, 64], sizes = [2, 8, 64], strides = [1, 1, 1]} : vector<2x8x1536xf32> to vector<2x8x64xf32>
    %23 = vector.extract_strided_slice %7 {offsets = [0, 0, 576], sizes = [2, 8, 64], strides = [1, 1, 1]} : vector<2x8x1536xf32> to vector<2x8x64xf32>
    %24 = vector.extract_strided_slice %7 {offsets = [0, 0, 1088], sizes = [2, 8, 64], strides = [1, 1, 1]} : vector<2x8x1536xf32> to vector<2x8x64xf32>
    "tpu.trace_start"() <{level = 10 : i32, message = "btd,bsd->bts"}> : () -> ()
    %cst_10 = arith.constant dense<0.000000e+00> : vector<2x8x8xf32>
    %25 = tpu.matmul %22, %23, %cst_10 {dimension_numbers = #tpu.dot_dimension_numbers<[2], [2], [1], [1], [0, 0, 0, 1, 1, 1], [0], [0]>} : vector<2x8x64xf32>, vector<2x8x64xf32>, vector<2x8x8xf32> -> vector<2x8x8xf32>
    "tpu.trace_stop"() : () -> ()
    %cst_11 = arith.constant dense<0xFF800000> : vector<2x8xf32>
    %26 = vector.multi_reduction <maximumf>, %25, %cst_11 [2] : vector<2x8x8xf32> to vector<2x8xf32>
    %27 = vector.shape_cast %26 : vector<2x8xf32> to vector<2x8x1xf32>
    %28 = vector.broadcast %27 : vector<2x8x1xf32> to vector<2x8x8xf32>
    %29 = arith.subf %25, %28 : vector<2x8x8xf32>
    %30 = math.exp %29 : vector<2x8x8xf32>
    %cst_12 = arith.constant dense<0.000000e+00> : vector<2x8xf32>
    %31 = vector.multi_reduction <add>, %30, %cst_12 [2] : vector<2x8x8xf32> to vector<2x8xf32>
    %32 = vector.shape_cast %31 : vector<2x8xf32> to vector<2x8x1xf32>
    %33 = vector.broadcast %32 : vector<2x8x1xf32> to vector<2x8x8xf32>
    %34 = arith.divf %30, %33 : vector<2x8x8xf32>
    "tpu.trace_start"() <{level = 10 : i32, message = "bts,bsd->btd"}> : () -> ()
    %cst_13 = arith.constant dense<0.000000e+00> : vector<2x8x64xf32>
    %35 = tpu.matmul %34, %24, %cst_13 {dimension_numbers = #tpu.dot_dimension_numbers<[2], [1], [1], [2], [0, 0, 0, 1, 1, 2], [0], [0]>} : vector<2x8x8xf32>, vector<2x8x64xf32>, vector<2x8x64xf32> -> vector<2x8x64xf32>
    "tpu.trace_stop"() : () -> ()
    %36 = vector.extract_strided_slice %7 {offsets = [0, 0, 128], sizes = [2, 8, 64], strides = [1, 1, 1]} : vector<2x8x1536xf32> to vector<2x8x64xf32>
    %37 = vector.extract_strided_slice %7 {offsets = [0, 0, 640], sizes = [2, 8, 64], strides = [1, 1, 1]} : vector<2x8x1536xf32> to vector<2x8x64xf32>
    %38 = vector.extract_strided_slice %7 {offsets = [0, 0, 1152], sizes = [2, 8, 64], strides = [1, 1, 1]} : vector<2x8x1536xf32> to vector<2x8x64xf32>
    "tpu.trace_start"() <{level = 10 : i32, message = "btd,bsd->bts"}> : () -> ()
    %cst_14 = arith.constant dense<0.000000e+00> : vector<2x8x8xf32>
    %39 = tpu.matmul %36, %37, %cst_14 {dimension_numbers = #tpu.dot_dimension_numbers<[2], [2], [1], [1], [0, 0, 0, 1, 1, 1], [0], [0]>} : vector<2x8x64xf32>, vector<2x8x64xf32>, vector<2x8x8xf32> -> vector<2x8x8xf32>
    "tpu.trace_stop"() : () -> ()
    %cst_15 = arith.constant dense<0xFF800000> : vector<2x8xf32>
    %40 = vector.multi_reduction <maximumf>, %39, %cst_15 [2] : vector<2x8x8xf32> to vector<2x8xf32>
    %41 = vector.shape_cast %40 : vector<2x8xf32> to vector<2x8x1xf32>
    %42 = vector.broadcast %41 : vector<2x8x1xf32> to vector<2x8x8xf32>
    %43 = arith.subf %39, %42 : vector<2x8x8xf32>
    %44 = math.exp %43 : vector<2x8x8xf32>
    %cst_16 = arith.constant dense<0.000000e+00> : vector<2x8xf32>
    %45 = vector.multi_reduction <add>, %44, %cst_16 [2] : vector<2x8x8xf32> to vector<2x8xf32>
    %46 = vector.shape_cast %45 : vector<2x8xf32> to vector<2x8x1xf32>
    %47 = vector.broadcast %46 : vector<2x8x1xf32> to vector<2x8x8xf32>
    %48 = arith.divf %44, %47 : vector<2x8x8xf32>
    "tpu.trace_start"() <{level = 10 : i32, message = "bts,bsd->btd"}> : () -> ()
    %cst_17 = arith.constant dense<0.000000e+00> : vector<2x8x64xf32>
    %49 = tpu.matmul %48, %38, %cst_17 {dimension_numbers = #tpu.dot_dimension_numbers<[2], [1], [1], [2], [0, 0, 0, 1, 1, 2], [0], [0]>} : vector<2x8x8xf32>, vector<2x8x64xf32>, vector<2x8x64xf32> -> vector<2x8x64xf32>
    "tpu.trace_stop"() : () -> ()
    %50 = vector.extract_strided_slice %7 {offsets = [0, 0, 192], sizes = [2, 8, 64], strides = [1, 1, 1]} : vector<2x8x1536xf32> to vector<2x8x64xf32>
    %51 = vector.extract_strided_slice %7 {offsets = [0, 0, 704], sizes = [2, 8, 64], strides = [1, 1, 1]} : vector<2x8x1536xf32> to vector<2x8x64xf32>
    %52 = vector.extract_strided_slice %7 {offsets = [0, 0, 1216], sizes = [2, 8, 64], strides = [1, 1, 1]} : vector<2x8x1536xf32> to vector<2x8x64xf32>
    "tpu.trace_start"() <{level = 10 : i32, message = "btd,bsd->bts"}> : () -> ()
    %cst_18 = arith.constant dense<0.000000e+00> : vector<2x8x8xf32>
    %53 = tpu.matmul %50, %51, %cst_18 {dimension_numbers = #tpu.dot_dimension_numbers<[2], [2], [1], [1], [0, 0, 0, 1, 1, 1], [0], [0]>} : vector<2x8x64xf32>, vector<2x8x64xf32>, vector<2x8x8xf32> -> vector<2x8x8xf32>
    "tpu.trace_stop"() : () -> ()
    %cst_19 = arith.constant dense<0xFF800000> : vector<2x8xf32>
    %54 = vector.multi_reduction <maximumf>, %53, %cst_19 [2] : vector<2x8x8xf32> to vector<2x8xf32>
    %55 = vector.shape_cast %54 : vector<2x8xf32> to vector<2x8x1xf32>
    %56 = vector.broadcast %55 : vector<2x8x1xf32> to vector<2x8x8xf32>
    %57 = arith.subf %53, %56 : vector<2x8x8xf32>
    %58 = math.exp %57 : vector<2x8x8xf32>
    %cst_20 = arith.constant dense<0.000000e+00> : vector<2x8xf32>
    %59 = vector.multi_reduction <add>, %58, %cst_20 [2] : vector<2x8x8xf32> to vector<2x8xf32>
    %60 = vector.shape_cast %59 : vector<2x8xf32> to vector<2x8x1xf32>
    %61 = vector.broadcast %60 : vector<2x8x1xf32> to vector<2x8x8xf32>
    %62 = arith.divf %58, %61 : vector<2x8x8xf32>
    "tpu.trace_start"() <{level = 10 : i32, message = "bts,bsd->btd"}> : () -> ()
    %cst_21 = arith.constant dense<0.000000e+00> : vector<2x8x64xf32>
    %63 = tpu.matmul %62, %52, %cst_21 {dimension_numbers = #tpu.dot_dimension_numbers<[2], [1], [1], [2], [0, 0, 0, 1, 1, 2], [0], [0]>} : vector<2x8x8xf32>, vector<2x8x64xf32>, vector<2x8x64xf32> -> vector<2x8x64xf32>
    "tpu.trace_stop"() : () -> ()
    %64 = vector.extract_strided_slice %7 {offsets = [0, 0, 256], sizes = [2, 8, 64], strides = [1, 1, 1]} : vector<2x8x1536xf32> to vector<2x8x64xf32>
    %65 = vector.extract_strided_slice %7 {offsets = [0, 0, 768], sizes = [2, 8, 64], strides = [1, 1, 1]} : vector<2x8x1536xf32> to vector<2x8x64xf32>
    %66 = vector.extract_strided_slice %7 {offsets = [0, 0, 1280], sizes = [2, 8, 64], strides = [1, 1, 1]} : vector<2x8x1536xf32> to vector<2x8x64xf32>
    "tpu.trace_start"() <{level = 10 : i32, message = "btd,bsd->bts"}> : () -> ()
    %cst_22 = arith.constant dense<0.000000e+00> : vector<2x8x8xf32>
    %67 = tpu.matmul %64, %65, %cst_22 {dimension_numbers = #tpu.dot_dimension_numbers<[2], [2], [1], [1], [0, 0, 0, 1, 1, 1], [0], [0]>} : vector<2x8x64xf32>, vector<2x8x64xf32>, vector<2x8x8xf32> -> vector<2x8x8xf32>
    "tpu.trace_stop"() : () -> ()
    %cst_23 = arith.constant dense<0xFF800000> : vector<2x8xf32>
    %68 = vector.multi_reduction <maximumf>, %67, %cst_23 [2] : vector<2x8x8xf32> to vector<2x8xf32>
    %69 = vector.shape_cast %68 : vector<2x8xf32> to vector<2x8x1xf32>
    %70 = vector.broadcast %69 : vector<2x8x1xf32> to vector<2x8x8xf32>
    %71 = arith.subf %67, %70 : vector<2x8x8xf32>
    %72 = math.exp %71 : vector<2x8x8xf32>
    %cst_24 = arith.constant dense<0.000000e+00> : vector<2x8xf32>
    %73 = vector.multi_reduction <add>, %72, %cst_24 [2] : vector<2x8x8xf32> to vector<2x8xf32>
    %74 = vector.shape_cast %73 : vector<2x8xf32> to vector<2x8x1xf32>
    %75 = vector.broadcast %74 : vector<2x8x1xf32> to vector<2x8x8xf32>
    %76 = arith.divf %72, %75 : vector<2x8x8xf32>
    "tpu.trace_start"() <{level = 10 : i32, message = "bts,bsd->btd"}> : () -> ()
    %cst_25 = arith.constant dense<0.000000e+00> : vector<2x8x64xf32>
    %77 = tpu.matmul %76, %66, %cst_25 {dimension_numbers = #tpu.dot_dimension_numbers<[2], [1], [1], [2], [0, 0, 0, 1, 1, 2], [0], [0]>} : vector<2x8x8xf32>, vector<2x8x64xf32>, vector<2x8x64xf32> -> vector<2x8x64xf32>
    "tpu.trace_stop"() : () -> ()
    %78 = vector.extract_strided_slice %7 {offsets = [0, 0, 320], sizes = [2, 8, 64], strides = [1, 1, 1]} : vector<2x8x1536xf32> to vector<2x8x64xf32>
    %79 = vector.extract_strided_slice %7 {offsets = [0, 0, 832], sizes = [2, 8, 64], strides = [1, 1, 1]} : vector<2x8x1536xf32> to vector<2x8x64xf32>
    %80 = vector.extract_strided_slice %7 {offsets = [0, 0, 1344], sizes = [2, 8, 64], strides = [1, 1, 1]} : vector<2x8x1536xf32> to vector<2x8x64xf32>
    "tpu.trace_start"() <{level = 10 : i32, message = "btd,bsd->bts"}> : () -> ()
    %cst_26 = arith.constant dense<0.000000e+00> : vector<2x8x8xf32>
    %81 = tpu.matmul %78, %79, %cst_26 {dimension_numbers = #tpu.dot_dimension_numbers<[2], [2], [1], [1], [0, 0, 0, 1, 1, 1], [0], [0]>} : vector<2x8x64xf32>, vector<2x8x64xf32>, vector<2x8x8xf32> -> vector<2x8x8xf32>
    "tpu.trace_stop"() : () -> ()
    %cst_27 = arith.constant dense<0xFF800000> : vector<2x8xf32>
    %82 = vector.multi_reduction <maximumf>, %81, %cst_27 [2] : vector<2x8x8xf32> to vector<2x8xf32>
    %83 = vector.shape_cast %82 : vector<2x8xf32> to vector<2x8x1xf32>
    %84 = vector.broadcast %83 : vector<2x8x1xf32> to vector<2x8x8xf32>
    %85 = arith.subf %81, %84 : vector<2x8x8xf32>
    %86 = math.exp %85 : vector<2x8x8xf32>
    %cst_28 = arith.constant dense<0.000000e+00> : vector<2x8xf32>
    %87 = vector.multi_reduction <add>, %86, %cst_28 [2] : vector<2x8x8xf32> to vector<2x8xf32>
    %88 = vector.shape_cast %87 : vector<2x8xf32> to vector<2x8x1xf32>
    %89 = vector.broadcast %88 : vector<2x8x1xf32> to vector<2x8x8xf32>
    %90 = arith.divf %86, %89 : vector<2x8x8xf32>
    "tpu.trace_start"() <{level = 10 : i32, message = "bts,bsd->btd"}> : () -> ()
    %cst_29 = arith.constant dense<0.000000e+00> : vector<2x8x64xf32>
    %91 = tpu.matmul %90, %80, %cst_29 {dimension_numbers = #tpu.dot_dimension_numbers<[2], [1], [1], [2], [0, 0, 0, 1, 1, 2], [0], [0]>} : vector<2x8x8xf32>, vector<2x8x64xf32>, vector<2x8x64xf32> -> vector<2x8x64xf32>
    "tpu.trace_stop"() : () -> ()
    %92 = vector.extract_strided_slice %7 {offsets = [0, 0, 384], sizes = [2, 8, 64], strides = [1, 1, 1]} : vector<2x8x1536xf32> to vector<2x8x64xf32>
    %93 = vector.extract_strided_slice %7 {offsets = [0, 0, 896], sizes = [2, 8, 64], strides = [1, 1, 1]} : vector<2x8x1536xf32> to vector<2x8x64xf32>
    %94 = vector.extract_strided_slice %7 {offsets = [0, 0, 1408], sizes = [2, 8, 64], strides = [1, 1, 1]} : vector<2x8x1536xf32> to vector<2x8x64xf32>
    "tpu.trace_start"() <{level = 10 : i32, message = "btd,bsd->bts"}> : () -> ()
    %cst_30 = arith.constant dense<0.000000e+00> : vector<2x8x8xf32>
    %95 = tpu.matmul %92, %93, %cst_30 {dimension_numbers = #tpu.dot_dimension_numbers<[2], [2], [1], [1], [0, 0, 0, 1, 1, 1], [0], [0]>} : vector<2x8x64xf32>, vector<2x8x64xf32>, vector<2x8x8xf32> -> vector<2x8x8xf32>
    "tpu.trace_stop"() : () -> ()
    %cst_31 = arith.constant dense<0xFF800000> : vector<2x8xf32>
    %96 = vector.multi_reduction <maximumf>, %95, %cst_31 [2] : vector<2x8x8xf32> to vector<2x8xf32>
    %97 = vector.shape_cast %96 : vector<2x8xf32> to vector<2x8x1xf32>
    %98 = vector.broadcast %97 : vector<2x8x1xf32> to vector<2x8x8xf32>
    %99 = arith.subf %95, %98 : vector<2x8x8xf32>
    %100 = math.exp %99 : vector<2x8x8xf32>
    %cst_32 = arith.constant dense<0.000000e+00> : vector<2x8xf32>
    %101 = vector.multi_reduction <add>, %100, %cst_32 [2] : vector<2x8x8xf32> to vector<2x8xf32>
    %102 = vector.shape_cast %101 : vector<2x8xf32> to vector<2x8x1xf32>
    %103 = vector.broadcast %102 : vector<2x8x1xf32> to vector<2x8x8xf32>
    %104 = arith.divf %100, %103 : vector<2x8x8xf32>
    "tpu.trace_start"() <{level = 10 : i32, message = "bts,bsd->btd"}> : () -> ()
    %cst_33 = arith.constant dense<0.000000e+00> : vector<2x8x64xf32>
    %105 = tpu.matmul %104, %94, %cst_33 {dimension_numbers = #tpu.dot_dimension_numbers<[2], [1], [1], [2], [0, 0, 0, 1, 1, 2], [0], [0]>} : vector<2x8x8xf32>, vector<2x8x64xf32>, vector<2x8x64xf32> -> vector<2x8x64xf32>
    "tpu.trace_stop"() : () -> ()
    %106 = vector.extract_strided_slice %7 {offsets = [0, 0, 448], sizes = [2, 8, 64], strides = [1, 1, 1]} : vector<2x8x1536xf32> to vector<2x8x64xf32>
    %107 = vector.extract_strided_slice %7 {offsets = [0, 0, 960], sizes = [2, 8, 64], strides = [1, 1, 1]} : vector<2x8x1536xf32> to vector<2x8x64xf32>
    %108 = vector.extract_strided_slice %7 {offsets = [0, 0, 1472], sizes = [2, 8, 64], strides = [1, 1, 1]} : vector<2x8x1536xf32> to vector<2x8x64xf32>
    "tpu.trace_start"() <{level = 10 : i32, message = "btd,bsd->bts"}> : () -> ()
    %cst_34 = arith.constant dense<0.000000e+00> : vector<2x8x8xf32>
    %109 = tpu.matmul %106, %107, %cst_34 {dimension_numbers = #tpu.dot_dimension_numbers<[2], [2], [1], [1], [0, 0, 0, 1, 1, 1], [0], [0]>} : vector<2x8x64xf32>, vector<2x8x64xf32>, vector<2x8x8xf32> -> vector<2x8x8xf32>
    "tpu.trace_stop"() : () -> ()
    %cst_35 = arith.constant dense<0xFF800000> : vector<2x8xf32>
    %110 = vector.multi_reduction <maximumf>, %109, %cst_35 [2] : vector<2x8x8xf32> to vector<2x8xf32>
    %111 = vector.shape_cast %110 : vector<2x8xf32> to vector<2x8x1xf32>
    %112 = vector.broadcast %111 : vector<2x8x1xf32> to vector<2x8x8xf32>
    %113 = arith.subf %109, %112 : vector<2x8x8xf32>
    %114 = math.exp %113 : vector<2x8x8xf32>
    %cst_36 = arith.constant dense<0.000000e+00> : vector<2x8xf32>
    %115 = vector.multi_reduction <add>, %114, %cst_36 [2] : vector<2x8x8xf32> to vector<2x8xf32>
    %116 = vector.shape_cast %115 : vector<2x8xf32> to vector<2x8x1xf32>
    %117 = vector.broadcast %116 : vector<2x8x1xf32> to vector<2x8x8xf32>
    %118 = arith.divf %114, %117 : vector<2x8x8xf32>
    "tpu.trace_start"() <{level = 10 : i32, message = "bts,bsd->btd"}> : () -> ()
    %cst_37 = arith.constant dense<0.000000e+00> : vector<2x8x64xf32>
    %119 = tpu.matmul %118, %108, %cst_37 {dimension_numbers = #tpu.dot_dimension_numbers<[2], [1], [1], [2], [0, 0, 0, 1, 1, 2], [0], [0]>} : vector<2x8x8xf32>, vector<2x8x64xf32>, vector<2x8x64xf32> -> vector<2x8x64xf32>
    "tpu.trace_stop"() : () -> ()
    %120 = tpu.concatenate %21, %35, %49, %63, %77, %91, %105, %119 in 2 : vector<2x8x64xf32>, vector<2x8x64xf32>, vector<2x8x64xf32>, vector<2x8x64xf32>, vector<2x8x64xf32>, vector<2x8x64xf32>, vector<2x8x64xf32>, vector<2x8x64xf32> -> vector<2x8x512xf32>
    %121 = vector.shape_cast %120 : vector<2x8x512xf32> to vector<16x512xf32>
    %c0_38 = arith.constant 0 : index
    %c0_39 = arith.constant 0 : index
    %122 = vector.load %arg4[%c0_38, %c0_39] : memref<512x512xf32, #tpu.memory_space<vmem>>, vector<512x512xf32>
    %cst_40 = arith.constant dense<0.000000e+00> : vector<16x512xf32>
    %123 = tpu.matmul %121, %122, %cst_40 {dimension_numbers = #tpu.dot_dimension_numbers<[1], [0], [0], [1], [0, 0, 1, 1], [], []>} : vector<16x512xf32>, vector<512x512xf32>, vector<16x512xf32> -> vector<16x512xf32>
    %c0_41 = arith.constant 0 : index
    %c0_42 = arith.constant 0 : index
    %124 = vector.load %arg5[%c0_41, %c0_42] : memref<1x512xf32, #tpu.memory_space<vmem>>, vector<1x512xf32>
    %125 = vector.broadcast %124 : vector<1x512xf32> to vector<16x512xf32>
    %126 = arith.addf %123, %125 : vector<16x512xf32>
    %127 = vector.shape_cast %126 : vector<16x512xf32> to vector<2x8x512xf32>
    %c0_43 = arith.constant 0 : index
    %c0_44 = arith.constant 0 : index
    %c0_45 = arith.constant 0 : index
    %128 = vector.load %arg6[%c0_43, %c0_44, %c0_45] : memref<2x8x512xf32, #tpu.memory_space<vmem>>, vector<2x8x512xf32>
    tpu.vector_store %arg6[%c0_43, %c0_44, %c0_45], %127 {strides = array<i32>} : memref<2x8x512xf32, #tpu.memory_space<vmem>>, vector<2x8x512xf32>,
    return
  }
  func.func @transform_0(%arg0: i32) -> (i32, i32, i32) {
    %c0_i32 = arith.constant 0 : i32
    %c0_i32_0 = arith.constant 0 : i32
    %c0_i32_1 = arith.constant 0 : i32
    return %arg0, %c0_i32, %c0_i32_0 : i32, i32, i32
  }
  func.func @transform_1(%arg0: i32) -> (i32, i32) {
    %c0_i32 = arith.constant 0 : i32
    %c0_i32_0 = arith.constant 0 : i32
    %c0_i32_1 = arith.constant 0 : i32
    return %c0_i32, %c0_i32_0 : i32, i32
  }
  func.func @transform_2(%arg0: i32) -> (i32, i32) {
    %c0_i32 = arith.constant 0 : i32
    %c0_i32_0 = arith.constant 0 : i32
    %c0_i32_1 = arith.constant 0 : i32
    return %c0_i32, %c0_i32_0 : i32, i32
  }
  func.func @transform_3(%arg0: i32) -> (i32, i32) {
    %c0_i32 = arith.constant 0 : i32
    %c0_i32_0 = arith.constant 0 : i32
    %c0_i32_1 = arith.constant 0 : i32
    return %c0_i32, %c0_i32_0 : i32, i32
  }
  func.func @transform_4(%arg0: i32) -> (i32, i32) {
    %c0_i32 = arith.constant 0 : i32
    %c0_i32_0 = arith.constant 0 : i32
    %c0_i32_1 = arith.constant 0 : i32
    return %c0_i32, %c0_i32_0 : i32, i32
  }
  func.func @transform_5(%arg0: i32) -> (i32, i32, i32) {
    %c0_i32 = arith.constant 0 : i32
    %c0_i32_0 = arith.constant 0 : i32
    %c0_i32_1 = arith.constant 0 : i32
    return %arg0, %c0_i32, %c0_i32_0 : i32, i32, i32
  }
}

</mosaic_0001>

<bundles_post_ra>
// kernel: simple_self_attention.1
= control target key start
LH: loop header
LB: loop body
LE: loop exit
PB: predicated region body
PF: predicated region fallthrough
CT: control target
= control target key end

     0   :  { %s9153_s0 = inlined_call_operand.vmem [shape: f32[2,8,512], index: 0, kind: input, shape index: {}]   ;;  %s9154_s1 = inlined_call_operand.vmem [shape: f32[512,1536], index: 1, kind: input, shape index: {}]   ;;  %s9155_s2 = inlined_call_operand.vmem [shape: f32[1,1536], index: 2, kind: input, shape index: {}]   ;;  %s9156_s3 = inlined_call_operand.vmem [shape: f32[512,512], index: 3, kind: input, shape index: {}]   ;;  %s9157_s4 = inlined_call_operand.vmem [shape: f32[1,512], index: 4, kind: input, shape index: {}]   ;;  %s9158_s5 = inlined_call_operand.hbm [shape: f32[2,8,512], index: 5, kind: output, shape index: {}]  }
   0x1   :  { %v210_v0 = vld [vmem:[%s9154_s1 + $0x5a8] sm:$0xff]  ;;  %v209_v2 = vld [vmem:[%s9154_s1 + $0x5a0] sm:$0xff] }
   0x2   :  { %v594_v1 = vld [vmem:[%s9154_s1 + $0x11a8] sm:$0xff]  ;;  %861 = vmatprep.subr.mxu0 %v210_v0  ;;  %v593_v3 = vld [vmem:[%s9154_s1 + $0x11a0] sm:$0xff] }
   0x3   :  { %938 = vmatprep.subr.mxu1 %v594_v1  ;;  %v198_v4 = vld [vmem:[%s9154_s1 + $0x548] sm:$0xff]  ;;  %862 = vmatpush1.msra.mxu0 %v209_v2  ;;  %v197_v6 = vld [vmem:[%s9154_s1 + $0x540] sm:$0xff] }
   0x4   :  { %v582_v5 = vld [vmem:[%s9154_s1 + $0x1148] sm:$0xff]  ;;  %939 = vmatpush1.msra.mxu1 %v593_v3  ;;  %v581_v7 = vld [vmem:[%s9154_s1 + $0x1140] sm:$0xff]  ;;  %863 = vmatprep.subr.mxu0 %v198_v4 }
   0x5   :  { %v186_v8 = vld [vmem:[%s9154_s1 + $0x4e8] sm:$0xff]  ;;  %940 = vmatprep.subr.mxu1 %v582_v5  ;;  %v185_v10 = vld [vmem:[%s9154_s1 + $0x4e0] sm:$0xff]  ;;  %864 = vmatpush1.msra.mxu0 %v197_v6 }
   0x6   :  { %v570_v9 = vld [vmem:[%s9154_s1 + $0x10e8] sm:$0xff]  ;;  %v569_v11 = vld [vmem:[%s9154_s1 + $0x10e0] sm:$0xff]  ;;  %941 = vmatpush1.msra.mxu1 %v581_v7  ;;  %865 = vmatprep.subr.mxu0 %v186_v8 }
   0x7   :  { %v174_v12 = vld [vmem:[%s9154_s1 + $0x488] sm:$0xff]  ;;  %942 = vmatprep.subr.mxu1 %v570_v9  ;;  %v173_v14 = vld [vmem:[%s9154_s1 + $0x480] sm:$0xff]  ;;  %866 = vmatpush1.msra.mxu0 %v185_v10 }
   0x8   :  { %v558_v13 = vld [vmem:[%s9154_s1 + $0x1088] sm:$0xff]  ;;  %v557_v15 = vld [vmem:[%s9154_s1 + $0x1080] sm:$0xff]  ;;  %943 = vmatpush1.msra.mxu1 %v569_v11  ;;  %867 = vmatprep.subr.mxu0 %v174_v12 }
   0x9   :  { %v162_v16 = vld [vmem:[%s9154_s1 + $0x428] sm:$0xff]  ;;  %944 = vmatprep.subr.mxu1 %v558_v13  ;;  %v161_v18 = vld [vmem:[%s9154_s1 + $0x420] sm:$0xff]  ;;  %868 = vmatpush1.msra.mxu0 %v173_v14 }
   0xa   :  { %v546_v17 = vld [vmem:[%s9154_s1 + $0x1028] sm:$0xff]  ;;  %v545_v19 = vld [vmem:[%s9154_s1 + $0x1020] sm:$0xff]  ;;  %945 = vmatpush1.msra.mxu1 %v557_v15  ;;  %869 = vmatprep.subr.mxu0 %v162_v16 }
   0xb   :  { %v150_v20 = vld [vmem:[%s9154_s1 + $0x3c8] sm:$0xff]  ;;  %946 = vmatprep.subr.mxu1 %v546_v17  ;;  %v149_v22 = vld [vmem:[%s9154_s1 + $0x3c0] sm:$0xff]  ;;  %870 = vmatpush1.msra.mxu0 %v161_v18 }
   0xc   :  { %v534_v21 = vld [vmem:[%s9154_s1 + $0xfc8] sm:$0xff]  ;;  %v533_v23 = vld [vmem:[%s9154_s1 + $0xfc0] sm:$0xff]  ;;  %947 = vmatpush1.msra.mxu1 %v545_v19  ;;  %871 = vmatprep.subr.mxu0 %v150_v20 }
   0xd   :  { %v138_v24 = vld [vmem:[%s9154_s1 + $0x368] sm:$0xff]  ;;  %948 = vmatprep.subr.mxu1 %v534_v21  ;;  %v137_v26 = vld [vmem:[%s9154_s1 + $0x360] sm:$0xff]  ;;  %872 = vmatpush1.msra.mxu0 %v149_v22 }
   0xe   :  { %v522_v25 = vld [vmem:[%s9154_s1 + $0xf68] sm:$0xff]  ;;  %v521_v27 = vld [vmem:[%s9154_s1 + $0xf60] sm:$0xff]  ;;  %949 = vmatpush1.msra.mxu1 %v533_v23  ;;  %873 = vmatprep.subr.mxu0 %v138_v24 }
   0xf   :  { %v126_v28 = vld [vmem:[%s9154_s1 + $0x308] sm:$0xff]  ;;  %950 = vmatprep.subr.mxu1 %v522_v25  ;;  %v125_v30 = vld [vmem:[%s9154_s1 + $0x300] sm:$0xff]  ;;  %874 = vmatpush1.msra.mxu0 %v137_v26 }
  0x10   :  { %v510_v29 = vld [vmem:[%s9154_s1 + $0xf08] sm:$0xff]  ;;  %v509_v31 = vld [vmem:[%s9154_s1 + $0xf00] sm:$0xff]  ;;  %951 = vmatpush1.msra.mxu1 %v521_v27  ;;  %875 = vmatprep.subr.mxu0 %v126_v28 }
  0x11   :  { %v114_v32 = vld [vmem:[%s9154_s1 + $0x2a8] sm:$0xff]  ;;  %952 = vmatprep.subr.mxu1 %v510_v29  ;;  %v113_v34 = vld [vmem:[%s9154_s1 + $0x2a0] sm:$0xff]  ;;  %876 = vmatpush1.msra.mxu0 %v125_v30 }
  0x12   :  { %v498_v33 = vld [vmem:[%s9154_s1 + $0xea8] sm:$0xff]  ;;  %v497_v35 = vld [vmem:[%s9154_s1 + $0xea0] sm:$0xff]  ;;  %953 = vmatpush1.msra.mxu1 %v509_v31  ;;  %877 = vmatprep.subr.mxu0 %v114_v32 }
  0x13   :  { %v102_v36 = vld [vmem:[%s9154_s1 + $0x248] sm:$0xff]  ;;  %954 = vmatprep.subr.mxu1 %v498_v33  ;;  %v101_v38 = vld [vmem:[%s9154_s1 + $0x240] sm:$0xff]  ;;  %878 = vmatpush1.msra.mxu0 %v113_v34 }
  0x14   :  { %v486_v37 = vld [vmem:[%s9154_s1 + $0xe48] sm:$0xff]  ;;  %v485_v39 = vld [vmem:[%s9154_s1 + $0xe40] sm:$0xff]  ;;  %955 = vmatpush1.msra.mxu1 %v497_v35  ;;  %879 = vmatprep.subr.mxu0 %v102_v36 }
  0x15   :  { %v90_v40 = vld [vmem:[%s9154_s1 + $0x1e8] sm:$0xff]  ;;  %956 = vmatprep.subr.mxu1 %v486_v37  ;;  %v89_v42 = vld [vmem:[%s9154_s1 + $0x1e0] sm:$0xff]  ;;  %880 = vmatpush1.msra.mxu0 %v101_v38 }
  0x16   :  { %v474_v41 = vld [vmem:[%s9154_s1 + $0xde8] sm:$0xff]  ;;  %v473_v43 = vld [vmem:[%s9154_s1 + $0xde0] sm:$0xff]  ;;  %957 = vmatpush1.msra.mxu1 %v485_v39  ;;  %881 = vmatprep.subr.mxu0 %v90_v40 }
  0x17   :  { %v78_v44 = vld [vmem:[%s9154_s1 + $0x188] sm:$0xff]  ;;  %958 = vmatprep.subr.mxu1 %v474_v41  ;;  %v77_v46 = vld [vmem:[%s9154_s1 + $0x180] sm:$0xff]  ;;  %882 = vmatpush1.msra.mxu0 %v89_v42 }
  0x18   :  { %v462_v45 = vld [vmem:[%s9154_s1 + $0xd88] sm:$0xff]  ;;  %v461_v47 = vld [vmem:[%s9154_s1 + $0xd80] sm:$0xff]  ;;  %959 = vmatpush1.msra.mxu1 %v473_v43  ;;  %883 = vmatprep.subr.mxu0 %v78_v44 }
  0x19   :  { %v66_v48 = vld [vmem:[%s9154_s1 + $0x128] sm:$0xff]  ;;  %960 = vmatprep.subr.mxu1 %v462_v45  ;;  %v65_v50 = vld [vmem:[%s9154_s1 + $0x120] sm:$0xff]  ;;  %884 = vmatpush1.msra.mxu0 %v77_v46 }
  0x1a   :  { %v450_v49 = vld [vmem:[%s9154_s1 + $0xd28] sm:$0xff]  ;;  %v449_v51 = vld [vmem:[%s9154_s1 + $0xd20] sm:$0xff]  ;;  %961 = vmatpush1.msra.mxu1 %v461_v47  ;;  %885 = vmatprep.subr.mxu0 %v66_v48 }
  0x1b   :  { %v54_v52 = vld [vmem:[%s9154_s1 + $0xc8] sm:$0xff]  ;;  %962 = vmatprep.subr.mxu1 %v450_v49  ;;  %v53_v54 = vld [vmem:[%s9154_s1 + $0xc0] sm:$0xff]  ;;  %886 = vmatpush1.msra.mxu0 %v65_v50 }
  0x1c   :  { %v438_v53 = vld [vmem:[%s9154_s1 + $0xcc8] sm:$0xff]  ;;  %v437_v55 = vld [vmem:[%s9154_s1 + $0xcc0] sm:$0xff]  ;;  %963 = vmatpush1.msra.mxu1 %v449_v51  ;;  %887 = vmatprep.subr.mxu0 %v54_v52 }
  0x1d   :  { %v42_v56 = vld [vmem:[%s9154_s1 + $0x68] sm:$0xff]  ;;  %964 = vmatprep.subr.mxu1 %v438_v53  ;;  %v41_v58 = vld [vmem:[%s9154_s1 + $0x60] sm:$0xff]  ;;  %888 = vmatpush1.msra.mxu0 %v53_v54 }
  0x1e   :  { %v426_v57 = vld [vmem:[%s9154_s1 + $0xc68] sm:$0xff]  ;;  %v425_v59 = vld [vmem:[%s9154_s1 + $0xc60] sm:$0xff]  ;;  %965 = vmatpush1.msra.mxu1 %v437_v55  ;;  %889 = vmatprep.subr.mxu0 %v42_v56 }
  0x1f   :  { %v30_v60 = vld [vmem:[%s9154_s1 + $0x8] sm:$0xff]  ;;  %966 = vmatprep.subr.mxu1 %v426_v57  ;;  %v29_v62 = vld [vmem:[%s9154_s1] sm:$0xff]  ;;  %890 = vmatpush1.msra.mxu0 %v41_v58 }
  0x20   :  { %v414_v61 = vld [vmem:[%s9154_s1 + $0xc08] sm:$0xff]  ;;  %v413_v63 = vld [vmem:[%s9154_s1 + $0xc00] sm:$0xff]  ;;  %967 = vmatpush1.msra.mxu1 %v425_v59  ;;  %891 = vmatprep.subr.mxu0 %v30_v60 }
  0x21   :  { %v402_v0 = vld [vmem:[%s9154_s1 + $0xba8] sm:$0xff]  ;;  %968 = vmatprep.subr.mxu1 %v414_v61  ;;  %v401_v2 = vld [vmem:[%s9154_s1 + $0xba0] sm:$0xff]  ;;  %892 = vmatpush1.msra.mxu0 %v29_v62 }
  0x22   :  { %v786_v1 = vld [vmem:[%s9154_s1 + $0x17a8] sm:$0xff]  ;;  %v785_v3 = vld [vmem:[%s9154_s1 + $0x17a0] sm:$0xff]  ;;  %969 = vmatpush1.msra.mxu1 %v413_v63  ;;  %893 = vmatprep.subr.mxu0 %v402_v0 }
  0x23   :  { %v390_v4 = vld [vmem:[%s9154_s1 + $0xb48] sm:$0xff]  ;;  %970 = vmatprep.subr.mxu1 %v786_v1  ;;  %v389_v6 = vld [vmem:[%s9154_s1 + $0xb40] sm:$0xff]  ;;  %894 = vmatpush2.msra.mxu0 %v401_v2  ;;  %v5875_v2 = vld [vmem:[%s9153_s0 + $0x18] sm:$0xff] }
  0x24   :  { %v774_v5 = vld [vmem:[%s9154_s1 + $0x1748] sm:$0xff]  ;;  %v773_v7 = vld [vmem:[%s9154_s1 + $0x1740] sm:$0xff]  ;;  %971 = vmatpush2.msra.mxu1 %v785_v3  ;;  %895 = vmatprep.subr.mxu0 %v390_v4  ;;  %v212_v3 = vld [vmem:[%s9154_s1 + $0x5b8] sm:$0xff] }
  0x25   :  { %v378_v8 = vld [vmem:[%s9154_s1 + $0xae8] sm:$0xff]  ;;  %972 = vmatprep.subr.mxu1 %v774_v5  ;;  %v377_v10 = vld [vmem:[%s9154_s1 + $0xae0] sm:$0xff]  ;;  %896 = vmatpush2.msra.mxu0 %v389_v6  ;;  %v596_v4 = vld [vmem:[%s9154_s1 + $0x11b8] sm:$0xff] }
  0x26   :  { %v762_v9 = vld [vmem:[%s9154_s1 + $0x16e8] sm:$0xff]  ;;  %v761_v11 = vld [vmem:[%s9154_s1 + $0x16e0] sm:$0xff]  ;;  %973 = vmatpush2.msra.mxu1 %v773_v7  ;;  %897 = vmatprep.subr.mxu0 %v378_v8  ;;  %v5887_v5 = vld [vmem:[%s9153_s0 + $0x10] sm:$0xff] }
  0x27   :  { %v366_v12 = vld [vmem:[%s9154_s1 + $0xa88] sm:$0xff]  ;;  %974 = vmatprep.subr.mxu1 %v762_v9  ;;  %v365_v14 = vld [vmem:[%s9154_s1 + $0xa80] sm:$0xff]  ;;  %898 = vmatpush2.msra.mxu0 %v377_v10  ;;  %v211_v6 = vld [vmem:[%s9154_s1 + $0x5b0] sm:$0xff] }
  0x28   :  { %v750_v13 = vld [vmem:[%s9154_s1 + $0x1688] sm:$0xff]  ;;  %v749_v15 = vld [vmem:[%s9154_s1 + $0x1680] sm:$0xff]  ;;  %975 = vmatpush2.msra.mxu1 %v761_v11  ;;  %899 = vmatprep.subr.mxu0 %v366_v12  ;;  %v595_v7 = vld [vmem:[%s9154_s1 + $0x11b0] sm:$0xff] }
  0x29   :  { %v354_v16 = vld [vmem:[%s9154_s1 + $0xa28] sm:$0xff]  ;;  %976 = vmatprep.subr.mxu1 %v750_v13  ;;  %v353_v18 = vld [vmem:[%s9154_s1 + $0xa20] sm:$0xff]  ;;  %900 = vmatpush2.msra.mxu0 %v365_v14  ;;  %v200_v8 = vld [vmem:[%s9154_s1 + $0x558] sm:$0xff] }
  0x2a   :  { %v738_v17 = vld [vmem:[%s9154_s1 + $0x1628] sm:$0xff]  ;;  %v737_v19 = vld [vmem:[%s9154_s1 + $0x1620] sm:$0xff]  ;;  %977 = vmatpush2.msra.mxu1 %v749_v15  ;;  %901 = vmatprep.subr.mxu0 %v354_v16  ;;  %v584_v9 = vld [vmem:[%s9154_s1 + $0x1158] sm:$0xff] }
  0x2b   :  { %v342_v20 = vld [vmem:[%s9154_s1 + $0x9c8] sm:$0xff]  ;;  %978 = vmatprep.subr.mxu1 %v738_v17  ;;  %v341_v22 = vld [vmem:[%s9154_s1 + $0x9c0] sm:$0xff]  ;;  %902 = vmatpush2.msra.mxu0 %v353_v18  ;;  %v199_v10 = vld [vmem:[%s9154_s1 + $0x550] sm:$0xff] }
  0x2c   :  { %v726_v21 = vld [vmem:[%s9154_s1 + $0x15c8] sm:$0xff]  ;;  %v725_v23 = vld [vmem:[%s9154_s1 + $0x15c0] sm:$0xff]  ;;  %979 = vmatpush2.msra.mxu1 %v737_v19  ;;  %903 = vmatprep.subr.mxu0 %v342_v20  ;;  %v583_v11 = vld [vmem:[%s9154_s1 + $0x1150] sm:$0xff] }
  0x2d   :  { %v330_v24 = vld [vmem:[%s9154_s1 + $0x968] sm:$0xff]  ;;  %980 = vmatprep.subr.mxu1 %v726_v21  ;;  %v329_v26 = vld [vmem:[%s9154_s1 + $0x960] sm:$0xff]  ;;  %904 = vmatpush2.msra.mxu0 %v341_v22  ;;  %v188_v12 = vld [vmem:[%s9154_s1 + $0x4f8] sm:$0xff] }
  0x2e   :  { %v714_v25 = vld [vmem:[%s9154_s1 + $0x1568] sm:$0xff]  ;;  %v713_v27 = vld [vmem:[%s9154_s1 + $0x1560] sm:$0xff]  ;;  %981 = vmatpush2.msra.mxu1 %v725_v23  ;;  %905 = vmatprep.subr.mxu0 %v330_v24  ;;  %v572_v13 = vld [vmem:[%s9154_s1 + $0x10f8] sm:$0xff] }
  0x2f   :  { %v318_v28 = vld [vmem:[%s9154_s1 + $0x908] sm:$0xff]  ;;  %982 = vmatprep.subr.mxu1 %v714_v25  ;;  %v317_v30 = vld [vmem:[%s9154_s1 + $0x900] sm:$0xff]  ;;  %906 = vmatpush2.msra.mxu0 %v329_v26  ;;  %v187_v14 = vld [vmem:[%s9154_s1 + $0x4f0] sm:$0xff] }
  0x30   :  { %v702_v29 = vld [vmem:[%s9154_s1 + $0x1508] sm:$0xff]  ;;  %v701_v31 = vld [vmem:[%s9154_s1 + $0x1500] sm:$0xff]  ;;  %983 = vmatpush2.msra.mxu1 %v713_v27  ;;  %907 = vmatprep.subr.mxu0 %v318_v28  ;;  %v571_v15 = vld [vmem:[%s9154_s1 + $0x10f0] sm:$0xff] }
  0x31   :  { %v306_v32 = vld [vmem:[%s9154_s1 + $0x8a8] sm:$0xff]  ;;  %984 = vmatprep.subr.mxu1 %v702_v29  ;;  %v305_v34 = vld [vmem:[%s9154_s1 + $0x8a0] sm:$0xff]  ;;  %908 = vmatpush2.msra.mxu0 %v317_v30  ;;  %v176_v16 = vld [vmem:[%s9154_s1 + $0x498] sm:$0xff] }
  0x32   :  { %v690_v33 = vld [vmem:[%s9154_s1 + $0x14a8] sm:$0xff]  ;;  %v689_v35 = vld [vmem:[%s9154_s1 + $0x14a0] sm:$0xff]  ;;  %985 = vmatpush2.msra.mxu1 %v701_v31  ;;  %909 = vmatprep.subr.mxu0 %v306_v32  ;;  %v560_v17 = vld [vmem:[%s9154_s1 + $0x1098] sm:$0xff] }
  0x33   :  { %v294_v36 = vld [vmem:[%s9154_s1 + $0x848] sm:$0xff]  ;;  %986 = vmatprep.subr.mxu1 %v690_v33  ;;  %v293_v38 = vld [vmem:[%s9154_s1 + $0x840] sm:$0xff]  ;;  %910 = vmatpush2.msra.mxu0 %v305_v34  ;;  %v175_v18 = vld [vmem:[%s9154_s1 + $0x490] sm:$0xff] }
  0x34   :  { %v678_v37 = vld [vmem:[%s9154_s1 + $0x1448] sm:$0xff]  ;;  %v677_v39 = vld [vmem:[%s9154_s1 + $0x1440] sm:$0xff]  ;;  %987 = vmatpush2.msra.mxu1 %v689_v35  ;;  %911 = vmatprep.subr.mxu0 %v294_v36  ;;  %v559_v19 = vld [vmem:[%s9154_s1 + $0x1090] sm:$0xff] }
  0x35   :  { %v282_v40 = vld [vmem:[%s9154_s1 + $0x7e8] sm:$0xff]  ;;  %988 = vmatprep.subr.mxu1 %v678_v37  ;;  %v281_v42 = vld [vmem:[%s9154_s1 + $0x7e0] sm:$0xff]  ;;  %912 = vmatpush2.msra.mxu0 %v293_v38  ;;  %v164_v20 = vld [vmem:[%s9154_s1 + $0x438] sm:$0xff] }
  0x36   :  { %v666_v41 = vld [vmem:[%s9154_s1 + $0x13e8] sm:$0xff]  ;;  %v665_v43 = vld [vmem:[%s9154_s1 + $0x13e0] sm:$0xff]  ;;  %989 = vmatpush2.msra.mxu1 %v677_v39  ;;  %913 = vmatprep.subr.mxu0 %v282_v40  ;;  %v548_v21 = vld [vmem:[%s9154_s1 + $0x1038] sm:$0xff] }
  0x37   :  { %v270_v44 = vld [vmem:[%s9154_s1 + $0x788] sm:$0xff]  ;;  %990 = vmatprep.subr.mxu1 %v666_v41  ;;  %v269_v46 = vld [vmem:[%s9154_s1 + $0x780] sm:$0xff]  ;;  %914 = vmatpush2.msra.mxu0 %v281_v42  ;;  %v163_v22 = vld [vmem:[%s9154_s1 + $0x430] sm:$0xff] }
  0x38   :  { %v654_v45 = vld [vmem:[%s9154_s1 + $0x1388] sm:$0xff]  ;;  %v653_v47 = vld [vmem:[%s9154_s1 + $0x1380] sm:$0xff]  ;;  %991 = vmatpush2.msra.mxu1 %v665_v43  ;;  %915 = vmatprep.subr.mxu0 %v270_v44  ;;  %v547_v23 = vld [vmem:[%s9154_s1 + $0x1030] sm:$0xff] }
  0x39   :  { %v258_v48 = vld [vmem:[%s9154_s1 + $0x728] sm:$0xff]  ;;  %992 = vmatprep.subr.mxu1 %v654_v45  ;;  %v257_v50 = vld [vmem:[%s9154_s1 + $0x720] sm:$0xff]  ;;  %916 = vmatpush2.msra.mxu0 %v269_v46  ;;  %v152_v24 = vld [vmem:[%s9154_s1 + $0x3d8] sm:$0xff] }
  0x3a   :  { %v642_v49 = vld [vmem:[%s9154_s1 + $0x1328] sm:$0xff]  ;;  %v641_v51 = vld [vmem:[%s9154_s1 + $0x1320] sm:$0xff]  ;;  %993 = vmatpush2.msra.mxu1 %v653_v47  ;;  %917 = vmatprep.subr.mxu0 %v258_v48  ;;  %v536_v25 = vld [vmem:[%s9154_s1 + $0xfd8] sm:$0xff] }
  0x3b   :  { %v246_v52 = vld [vmem:[%s9154_s1 + $0x6c8] sm:$0xff]  ;;  %994 = vmatprep.subr.mxu1 %v642_v49  ;;  %v245_v54 = vld [vmem:[%s9154_s1 + $0x6c0] sm:$0xff]  ;;  %918 = vmatpush2.msra.mxu0 %v257_v50  ;;  %v151_v26 = vld [vmem:[%s9154_s1 + $0x3d0] sm:$0xff] }
  0x3c   :  { %v630_v53 = vld [vmem:[%s9154_s1 + $0x12c8] sm:$0xff]  ;;  %v629_v55 = vld [vmem:[%s9154_s1 + $0x12c0] sm:$0xff]  ;;  %995 = vmatpush2.msra.mxu1 %v641_v51  ;;  %919 = vmatprep.subr.mxu0 %v246_v52  ;;  %v535_v27 = vld [vmem:[%s9154_s1 + $0xfd0] sm:$0xff] }
  0x3d   :  { %v234_v56 = vld [vmem:[%s9154_s1 + $0x668] sm:$0xff]  ;;  %996 = vmatprep.subr.mxu1 %v630_v53  ;;  %v233_v58 = vld [vmem:[%s9154_s1 + $0x660] sm:$0xff]  ;;  %920 = vmatpush2.msra.mxu0 %v245_v54  ;;  %v140_v28 = vld [vmem:[%s9154_s1 + $0x378] sm:$0xff] }
  0x3e   :  { %v618_v57 = vld [vmem:[%s9154_s1 + $0x1268] sm:$0xff]  ;;  %v617_v59 = vld [vmem:[%s9154_s1 + $0x1260] sm:$0xff]  ;;  %997 = vmatpush2.msra.mxu1 %v629_v55  ;;  %921 = vmatprep.subr.mxu0 %v234_v56  ;;  %v524_v29 = vld [vmem:[%s9154_s1 + $0xf78] sm:$0xff] }
  0x3f   :  { %v222_v60 = vld [vmem:[%s9154_s1 + $0x608] sm:$0xff]  ;;  %998 = vmatprep.subr.mxu1 %v618_v57  ;;  %v221_v62 = vld [vmem:[%s9154_s1 + $0x600] sm:$0xff]  ;;  %922 = vmatpush2.msra.mxu0 %v233_v58  ;;  %v139_v30 = vld [vmem:[%s9154_s1 + $0x370] sm:$0xff] }
  0x40   :  { %v606_v61 = vld [vmem:[%s9154_s1 + $0x1208] sm:$0xff]  ;;  %999 = vmatpush2.msra.mxu1 %v617_v59  ;;  %v605_v0 = vld [vmem:[%s9154_s1 + $0x1200] sm:$0xff]  ;;  %923 = vmatprep.subr.mxu0 %v222_v60  ;;  %v523_v31 = vld [vmem:[%s9154_s1 + $0xf70] sm:$0xff] }
  0x41   :  { %v5862_v63 = vld [vmem:[%s9153_s0 + $0x8] sm:$0xff]  ;;  %v5870_v1 = vld [vmem:[%s9153_s0] sm:$0xff]  ;;  %1000 = vmatprep.subr.mxu1 %v606_v61  ;;  %924 = vmatpush2.msra.mxu0 %v221_v62  ;;  %v128_v32 = vld [vmem:[%s9154_s1 + $0x318] sm:$0xff] }
  0x42   :  { %925 = vmatprep.mubr.f32.mxu0 %v5862_v63  ;;  %1001 = vmatpush2.msra.mxu1 %v605_v0  ;;  %v512_v33 = vld [vmem:[%s9154_s1 + $0xf18] sm:$0xff]  ;;  %v127_v34 = vld [vmem:[%s9154_s1 + $0x310] sm:$0xff] }
  0x43   :  { %926 = vmatmul.mubr.f32.vlgmr.msra.gmra.mxu0 %v5870_v1  ;;  %1002 = vmatprep.mubr.f32.mxu1 %v5875_v2  ;;  %v511_v35 = vld [vmem:[%s9154_s1 + $0xf10] sm:$0xff]  ;;  %v116_v36 = vld [vmem:[%s9154_s1 + $0x2b8] sm:$0xff] }
  0x44   :  { %1015 = vmatprep.subr.mxu0 %v212_v3  ;;  %1092 = vmatprep.subr.mxu1 %v596_v4  ;;  %v500_v37 = vld [vmem:[%s9154_s1 + $0xeb8] sm:$0xff]  ;;  %v115_v38 = vld [vmem:[%s9154_s1 + $0x2b0] sm:$0xff] }
  0x45   :  { %1003 = vmatmul.mubr.f32.vlgmr.msra.gmra.mxu1 %v5887_v5  ;;  %1016 = vmatpush1.msra.mxu0 %v211_v6  ;;  %v499_v39 = vld [vmem:[%s9154_s1 + $0xeb0] sm:$0xff]  ;;  %v104_v40 = vld [vmem:[%s9154_s1 + $0x258] sm:$0xff] }
  0x46   :  { %1093 = vmatpush1.msra.mxu1 %v595_v7  ;;  %1017 = vmatprep.subr.mxu0 %v200_v8  ;;  %v488_v41 = vld [vmem:[%s9154_s1 + $0xe58] sm:$0xff]  ;;  %v103_v42 = vld [vmem:[%s9154_s1 + $0x250] sm:$0xff] }
  0x47   :  { %1094 = vmatprep.subr.mxu1 %v584_v9  ;;  %1018 = vmatpush1.msra.mxu0 %v199_v10  ;;  %v487_v43 = vld [vmem:[%s9154_s1 + $0xe50] sm:$0xff]  ;;  %v92_v44 = vld [vmem:[%s9154_s1 + $0x1f8] sm:$0xff] }
  0x48   :  { %1095 = vmatpush1.msra.mxu1 %v583_v11  ;;  %1019 = vmatprep.subr.mxu0 %v188_v12  ;;  %v476_v45 = vld [vmem:[%s9154_s1 + $0xdf8] sm:$0xff]  ;;  %v91_v46 = vld [vmem:[%s9154_s1 + $0x1f0] sm:$0xff] }
  0x49   :  { %1096 = vmatprep.subr.mxu1 %v572_v13  ;;  %1020 = vmatpush1.msra.mxu0 %v187_v14  ;;  %v475_v47 = vld [vmem:[%s9154_s1 + $0xdf0] sm:$0xff]  ;;  %v80_v48 = vld [vmem:[%s9154_s1 + $0x198] sm:$0xff] }
  0x4a   :  { %1097 = vmatpush1.msra.mxu1 %v571_v15  ;;  %1021 = vmatprep.subr.mxu0 %v176_v16  ;;  %v464_v49 = vld [vmem:[%s9154_s1 + $0xd98] sm:$0xff]  ;;  %v79_v50 = vld [vmem:[%s9154_s1 + $0x190] sm:$0xff] }
  0x4b   :  { %1098 = vmatprep.subr.mxu1 %v560_v17  ;;  %1022 = vmatpush1.msra.mxu0 %v175_v18  ;;  %v463_v51 = vld [vmem:[%s9154_s1 + $0xd90] sm:$0xff]  ;;  %v68_v52 = vld [vmem:[%s9154_s1 + $0x138] sm:$0xff] }
  0x4c   :  { %1099 = vmatpush1.msra.mxu1 %v559_v19  ;;  %1023 = vmatprep.subr.mxu0 %v164_v20  ;;  %v452_v53 = vld [vmem:[%s9154_s1 + $0xd38] sm:$0xff]  ;;  %v67_v54 = vld [vmem:[%s9154_s1 + $0x130] sm:$0xff] }
  0x4d   :  { %1100 = vmatprep.subr.mxu1 %v548_v21  ;;  %1024 = vmatpush1.msra.mxu0 %v163_v22  ;;  %v451_v55 = vld [vmem:[%s9154_s1 + $0xd30] sm:$0xff]  ;;  %v56_v56 = vld [vmem:[%s9154_s1 + $0xd8] sm:$0xff] }
  0x4e   :  { %1101 = vmatpush1.msra.mxu1 %v547_v23  ;;  %1025 = vmatprep.subr.mxu0 %v152_v24  ;;  %v440_v57 = vld [vmem:[%s9154_s1 + $0xcd8] sm:$0xff]  ;;  %v55_v58 = vld [vmem:[%s9154_s1 + $0xd0] sm:$0xff] }
  0x4f   :  { %1102 = vmatprep.subr.mxu1 %v536_v25  ;;  %1026 = vmatpush1.msra.mxu0 %v151_v26  ;;  %v439_v59 = vld [vmem:[%s9154_s1 + $0xcd0] sm:$0xff]  ;;  %v44_v60 = vld [vmem:[%s9154_s1 + $0x78] sm:$0xff] }
  0x50   :  { %1103 = vmatpush1.msra.mxu1 %v535_v27  ;;  %1027 = vmatprep.subr.mxu0 %v140_v28  ;;  %v428_v61 = vld [vmem:[%s9154_s1 + $0xc78] sm:$0xff]  ;;  %v43_v62 = vld [vmem:[%s9154_s1 + $0x70] sm:$0xff] }
  0x51   :  { %1104 = vmatprep.subr.mxu1 %v524_v29  ;;  %1028 = vmatpush1.msra.mxu0 %v139_v30  ;;  %v427_v0 = vld [vmem:[%s9154_s1 + $0xc70] sm:$0xff]  ;;  %v32_v3 = vld [vmem:[%s9154_s1 + $0x18] sm:$0xff] }
  0x52   :  { %1105 = vmatpush1.msra.mxu1 %v523_v31  ;;  %1029 = vmatprep.subr.mxu0 %v128_v32  ;;  %v416_v4 = vld [vmem:[%s9154_s1 + $0xc18] sm:$0xff]  ;;  %v31_v6 = vld [vmem:[%s9154_s1 + $0x10] sm:$0xff] }
  0x53   :  { %1106 = vmatprep.subr.mxu1 %v512_v33  ;;  %1030 = vmatpush1.msra.mxu0 %v127_v34  ;;  %v415_v7 = vld [vmem:[%s9154_s1 + $0xc10] sm:$0xff]  ;;  %v404_v8 = vld [vmem:[%s9154_s1 + $0xbb8] sm:$0xff] }
  0x54   :  { %1107 = vmatpush1.msra.mxu1 %v511_v35  ;;  %1031 = vmatprep.subr.mxu0 %v116_v36  ;;  %v788_v9 = vld [vmem:[%s9154_s1 + $0x17b8] sm:$0xff]  ;;  %v403_v10 = vld [vmem:[%s9154_s1 + $0xbb0] sm:$0xff] }
  0x55   :  { %1108 = vmatprep.subr.mxu1 %v500_v37  ;;  %1032 = vmatpush1.msra.mxu0 %v115_v38  ;;  %v787_v11 = vld [vmem:[%s9154_s1 + $0x17b0] sm:$0xff]  ;;  %v392_v12 = vld [vmem:[%s9154_s1 + $0xb58] sm:$0xff] }
  0x56   :  { %1109 = vmatpush1.msra.mxu1 %v499_v39  ;;  %1033 = vmatprep.subr.mxu0 %v104_v40  ;;  %v776_v13 = vld [vmem:[%s9154_s1 + $0x1758] sm:$0xff]  ;;  %v391_v14 = vld [vmem:[%s9154_s1 + $0xb50] sm:$0xff] }
  0x57   :  { %1110 = vmatprep.subr.mxu1 %v488_v41  ;;  %1034 = vmatpush1.msra.mxu0 %v103_v42  ;;  %v775_v15 = vld [vmem:[%s9154_s1 + $0x1750] sm:$0xff]  ;;  %v380_v16 = vld [vmem:[%s9154_s1 + $0xaf8] sm:$0xff] }
  0x58   :  { %1111 = vmatpush1.msra.mxu1 %v487_v43  ;;  %1035 = vmatprep.subr.mxu0 %v92_v44  ;;  %v764_v17 = vld [vmem:[%s9154_s1 + $0x16f8] sm:$0xff]  ;;  %v379_v18 = vld [vmem:[%s9154_s1 + $0xaf0] sm:$0xff] }
  0x59   :  { %1112 = vmatprep.subr.mxu1 %v476_v45  ;;  %1036 = vmatpush1.msra.mxu0 %v91_v46  ;;  %v763_v19 = vld [vmem:[%s9154_s1 + $0x16f0] sm:$0xff]  ;;  %v368_v20 = vld [vmem:[%s9154_s1 + $0xa98] sm:$0xff] }
  0x5a   :  { %1113 = vmatpush1.msra.mxu1 %v475_v47  ;;  %1037 = vmatprep.subr.mxu0 %v80_v48  ;;  %v752_v21 = vld [vmem:[%s9154_s1 + $0x1698] sm:$0xff]  ;;  %v367_v22 = vld [vmem:[%s9154_s1 + $0xa90] sm:$0xff] }
  0x5b   :  { %1114 = vmatprep.subr.mxu1 %v464_v49  ;;  %1038 = vmatpush1.msra.mxu0 %v79_v50  ;;  %v751_v23 = vld [vmem:[%s9154_s1 + $0x1690] sm:$0xff]  ;;  %v356_v24 = vld [vmem:[%s9154_s1 + $0xa38] sm:$0xff] }
  0x5c   :  { %1115 = vmatpush1.msra.mxu1 %v463_v51  ;;  %1039 = vmatprep.subr.mxu0 %v68_v52  ;;  %v740_v25 = vld [vmem:[%s9154_s1 + $0x1638] sm:$0xff]  ;;  %v355_v26 = vld [vmem:[%s9154_s1 + $0xa30] sm:$0xff] }
  0x5d   :  { %1116 = vmatprep.subr.mxu1 %v452_v53  ;;  %1040 = vmatpush1.msra.mxu0 %v67_v54  ;;  %v739_v27 = vld [vmem:[%s9154_s1 + $0x1630] sm:$0xff]  ;;  %v344_v28 = vld [vmem:[%s9154_s1 + $0x9d8] sm:$0xff] }
  0x5e   :  { %1117 = vmatpush1.msra.mxu1 %v451_v55  ;;  %1041 = vmatprep.subr.mxu0 %v56_v56  ;;  %v728_v29 = vld [vmem:[%s9154_s1 + $0x15d8] sm:$0xff]  ;;  %v343_v30 = vld [vmem:[%s9154_s1 + $0x9d0] sm:$0xff] }
  0x5f   :  { %1118 = vmatprep.subr.mxu1 %v440_v57  ;;  %1042 = vmatpush1.msra.mxu0 %v55_v58  ;;  %v727_v31 = vld [vmem:[%s9154_s1 + $0x15d0] sm:$0xff]  ;;  %v332_v32 = vld [vmem:[%s9154_s1 + $0x978] sm:$0xff] }
  0x60   :  { %1119 = vmatpush1.msra.mxu1 %v439_v59  ;;  %1043 = vmatprep.subr.mxu0 %v44_v60  ;;  %v716_v33 = vld [vmem:[%s9154_s1 + $0x1578] sm:$0xff]  ;;  %v331_v34 = vld [vmem:[%s9154_s1 + $0x970] sm:$0xff]  ;;  %v6237_v60 = vld [vmem:[%s9153_s0 + $0x28] sm:$0xff] }
  0x61   :  { %1120 = vmatprep.subr.mxu1 %v428_v61  ;;  %1044 = vmatpush1.msra.mxu0 %v43_v62  ;;  %v715_v35 = vld [vmem:[%s9154_s1 + $0x1570] sm:$0xff]  ;;  %v320_v36 = vld [vmem:[%s9154_s1 + $0x918] sm:$0xff] }
  0x62   :  { %1121 = vmatpush1.msra.mxu1 %v427_v0  ;;  %1045 = vmatprep.subr.mxu0 %v32_v3  ;;  %v704_v37 = vld [vmem:[%s9154_s1 + $0x1518] sm:$0xff]  ;;  %v319_v38 = vld [vmem:[%s9154_s1 + $0x910] sm:$0xff]  ;;  %v6248_v0 = vld [vmem:[%s9153_s0 + $0x20] sm:$0xff] }
  0x63   :  { %1122 = vmatprep.subr.mxu1 %v416_v4  ;;  %1046 = vmatpush1.msra.mxu0 %v31_v6  ;;  %v703_v39 = vld [vmem:[%s9154_s1 + $0x1510] sm:$0xff]  ;;  %v308_v40 = vld [vmem:[%s9154_s1 + $0x8b8] sm:$0xff] }
  0x64   :  { %1123 = vmatpush1.msra.mxu1 %v415_v7  ;;  %1047 = vmatprep.subr.mxu0 %v404_v8  ;;  %v692_v41 = vld [vmem:[%s9154_s1 + $0x14b8] sm:$0xff]  ;;  %v307_v42 = vld [vmem:[%s9154_s1 + $0x8b0] sm:$0xff] }
  0x65   :  { %1124 = vmatprep.subr.mxu1 %v788_v9  ;;  %1048 = vmatpush2.msra.mxu0 %v403_v10  ;;  %v691_v43 = vld [vmem:[%s9154_s1 + $0x14b0] sm:$0xff]  ;;  %v296_v44 = vld [vmem:[%s9154_s1 + $0x858] sm:$0xff] }
  0x66   :  { %1125 = vmatpush2.msra.mxu1 %v787_v11  ;;  %1049 = vmatprep.subr.mxu0 %v392_v12  ;;  %v680_v45 = vld [vmem:[%s9154_s1 + $0x1458] sm:$0xff]  ;;  %v295_v46 = vld [vmem:[%s9154_s1 + $0x850] sm:$0xff] }
  0x67   :  { %1126 = vmatprep.subr.mxu1 %v776_v13  ;;  %1050 = vmatpush2.msra.mxu0 %v391_v14  ;;  %v679_v47 = vld [vmem:[%s9154_s1 + $0x1450] sm:$0xff]  ;;  %v284_v48 = vld [vmem:[%s9154_s1 + $0x7f8] sm:$0xff] }
  0x68   :  { %1127 = vmatpush2.msra.mxu1 %v775_v15  ;;  %1051 = vmatprep.subr.mxu0 %v380_v16  ;;  %v668_v49 = vld [vmem:[%s9154_s1 + $0x13f8] sm:$0xff]  ;;  %v283_v50 = vld [vmem:[%s9154_s1 + $0x7f0] sm:$0xff]  ;;  %v214_v16 = vld [vmem:[%s9154_s1 + $0x5c8] sm:$0xff] }
  0x69   :  { %1128 = vmatprep.subr.mxu1 %v764_v17  ;;  %1052 = vmatpush2.msra.mxu0 %v379_v18  ;;  %v667_v51 = vld [vmem:[%s9154_s1 + $0x13f0] sm:$0xff]  ;;  %v272_v52 = vld [vmem:[%s9154_s1 + $0x798] sm:$0xff]  ;;  %v598_v17 = vld [vmem:[%s9154_s1 + $0x11c8] sm:$0xff] }
  0x6a   :  { %1129 = vmatpush2.msra.mxu1 %v763_v19  ;;  %1053 = vmatprep.subr.mxu0 %v368_v20  ;;  %v656_v53 = vld [vmem:[%s9154_s1 + $0x1398] sm:$0xff]  ;;  %v271_v54 = vld [vmem:[%s9154_s1 + $0x790] sm:$0xff]  ;;  %v213_v18 = vld [vmem:[%s9154_s1 + $0x5c0] sm:$0xff] }
  0x6b   :  { %1130 = vmatprep.subr.mxu1 %v752_v21  ;;  %1054 = vmatpush2.msra.mxu0 %v367_v22  ;;  %v655_v55 = vld [vmem:[%s9154_s1 + $0x1390] sm:$0xff]  ;;  %v260_v56 = vld [vmem:[%s9154_s1 + $0x738] sm:$0xff]  ;;  %v597_v19 = vld [vmem:[%s9154_s1 + $0x11c0] sm:$0xff] }
  0x6c   :  { %1131 = vmatpush2.msra.mxu1 %v751_v23  ;;  %1055 = vmatprep.subr.mxu0 %v356_v24  ;;  %v644_v57 = vld [vmem:[%s9154_s1 + $0x1338] sm:$0xff]  ;;  %v259_v58 = vld [vmem:[%s9154_s1 + $0x730] sm:$0xff]  ;;  %v586_v20 = vld [vmem:[%s9154_s1 + $0x1168] sm:$0xff] }
  0x6d   :  { %1132 = vmatprep.subr.mxu1 %v740_v25  ;;  %1056 = vmatpush2.msra.mxu0 %v355_v26  ;;  %v643_v59 = vld [vmem:[%s9154_s1 + $0x1330] sm:$0xff]  ;;  %v248_v61 = vld [vmem:[%s9154_s1 + $0x6d8] sm:$0xff]  ;;  %v190_v21 = vld [vmem:[%s9154_s1 + $0x508] sm:$0xff] }
  0x6e   :  { %1133 = vmatpush2.msra.mxu1 %v739_v27  ;;  %1057 = vmatprep.subr.mxu0 %v344_v28  ;;  %v632_v62 = vld [vmem:[%s9154_s1 + $0x12d8] sm:$0xff]  ;;  %v247_v3 = vld [vmem:[%s9154_s1 + $0x6d0] sm:$0xff]  ;;  %v574_v22 = vld [vmem:[%s9154_s1 + $0x1108] sm:$0xff] }
  0x6f   :  { %1134 = vmatprep.subr.mxu1 %v728_v29  ;;  %1058 = vmatpush2.msra.mxu0 %v343_v30  ;;  %v631_v4 = vld [vmem:[%s9154_s1 + $0x12d0] sm:$0xff]  ;;  %v6260_v6 = vld [vmem:[%s9153_s0 + $0x38] sm:$0xff]  ;;  %v573_v23 = vld [vmem:[%s9154_s1 + $0x1100] sm:$0xff] }
  0x70   :  { %1135 = vmatpush2.msra.mxu1 %v727_v31  ;;  %1059 = vmatprep.subr.mxu0 %v332_v32  ;;  %v236_v7 = vld [vmem:[%s9154_s1 + $0x678] sm:$0xff]  ;;  %v6272_v9 = vld [vmem:[%s9153_s0 + $0x30] sm:$0xff]  ;;  %v178_v24 = vld [vmem:[%s9154_s1 + $0x4a8] sm:$0xff] }
  0x71   :  { %1136 = vmatprep.subr.mxu1 %v716_v33  ;;  %1060 = vmatpush2.msra.mxu0 %v331_v34  ;;  %v620_v8 = vld [vmem:[%s9154_s1 + $0x1278] sm:$0xff]  ;;  %v235_v10 = vld [vmem:[%s9154_s1 + $0x670] sm:$0xff]  ;;  %v562_v25 = vld [vmem:[%s9154_s1 + $0x10a8] sm:$0xff] }
  0x72   :  { %1137 = vmatpush2.msra.mxu1 %v715_v35  ;;  %1061 = vmatprep.subr.mxu0 %v320_v36  ;;  %v619_v11 = vld [vmem:[%s9154_s1 + $0x1270] sm:$0xff]  ;;  %v224_v12 = vld [vmem:[%s9154_s1 + $0x618] sm:$0xff]  ;;  %v177_v26 = vld [vmem:[%s9154_s1 + $0x4a0] sm:$0xff] }
  0x73   :  { %1138 = vmatprep.subr.mxu1 %v704_v37  ;;  %1062 = vmatpush2.msra.mxu0 %v319_v38  ;;  %v608_v13 = vld [vmem:[%s9154_s1 + $0x1218] sm:$0xff]  ;;  %v223_v14 = vld [vmem:[%s9154_s1 + $0x610] sm:$0xff]  ;;  %v561_v27 = vld [vmem:[%s9154_s1 + $0x10a0] sm:$0xff] }
  0x74   :  { %1139 = vmatpush2.msra.mxu1 %v703_v39  ;;  %1063 = vmatprep.subr.mxu0 %v308_v40  ;;  %v607_v15 = vld [vmem:[%s9154_s1 + $0x1210] sm:$0xff]  ;;  %v166_v28 = vld [vmem:[%s9154_s1 + $0x448] sm:$0xff]  ;;  %v165_v30 = vld [vmem:[%s9154_s1 + $0x440] sm:$0xff] }
  0x75   :  { %1140 = vmatprep.subr.mxu1 %v692_v41  ;;  %1064 = vmatpush2.msra.mxu0 %v307_v42  ;;  %v550_v29 = vld [vmem:[%s9154_s1 + $0x1048] sm:$0xff]  ;;  %v549_v31 = vld [vmem:[%s9154_s1 + $0x1040] sm:$0xff] }
  0x76   :  { %1141 = vmatpush2.msra.mxu1 %v691_v43  ;;  %1065 = vmatprep.subr.mxu0 %v296_v44  ;;  %v154_v32 = vld [vmem:[%s9154_s1 + $0x3e8] sm:$0xff]  ;;  %v153_v34 = vld [vmem:[%s9154_s1 + $0x3e0] sm:$0xff] }
  0x77   :  { %1142 = vmatprep.subr.mxu1 %v680_v45  ;;  %1066 = vmatpush2.msra.mxu0 %v295_v46  ;;  %v538_v33 = vld [vmem:[%s9154_s1 + $0xfe8] sm:$0xff]  ;;  %v537_v35 = vld [vmem:[%s9154_s1 + $0xfe0] sm:$0xff] }
  0x78   :  { %1143 = vmatpush2.msra.mxu1 %v679_v47  ;;  %1067 = vmatprep.subr.mxu0 %v284_v48  ;;  %v142_v36 = vld [vmem:[%s9154_s1 + $0x388] sm:$0xff]  ;;  %v141_v38 = vld [vmem:[%s9154_s1 + $0x380] sm:$0xff] }
  0x79   :  { %1144 = vmatprep.subr.mxu1 %v668_v49  ;;  %1068 = vmatpush2.msra.mxu0 %v283_v50  ;;  %v526_v37 = vld [vmem:[%s9154_s1 + $0xf88] sm:$0xff]  ;;  %v525_v39 = vld [vmem:[%s9154_s1 + $0xf80] sm:$0xff] }
  0x7a   :  { %1145 = vmatpush2.msra.mxu1 %v667_v51  ;;  %1069 = vmatprep.subr.mxu0 %v272_v52  ;;  %v130_v40 = vld [vmem:[%s9154_s1 + $0x328] sm:$0xff]  ;;  %v129_v42 = vld [vmem:[%s9154_s1 + $0x320] sm:$0xff] }
  0x7b   :  { %1146 = vmatprep.subr.mxu1 %v656_v53  ;;  %1070 = vmatpush2.msra.mxu0 %v271_v54  ;;  %v514_v41 = vld [vmem:[%s9154_s1 + $0xf28] sm:$0xff]  ;;  %v513_v43 = vld [vmem:[%s9154_s1 + $0xf20] sm:$0xff] }
  0x7c   :  { %1147 = vmatpush2.msra.mxu1 %v655_v55  ;;  %1071 = vmatprep.subr.mxu0 %v260_v56  ;;  %v118_v44 = vld [vmem:[%s9154_s1 + $0x2c8] sm:$0xff]  ;;  %v117_v46 = vld [vmem:[%s9154_s1 + $0x2c0] sm:$0xff] }
  0x7d   :  { %1148 = vmatprep.subr.mxu1 %v644_v57  ;;  %1072 = vmatpush2.msra.mxu0 %v259_v58  ;;  %v502_v45 = vld [vmem:[%s9154_s1 + $0xec8] sm:$0xff]  ;;  %v501_v47 = vld [vmem:[%s9154_s1 + $0xec0] sm:$0xff] }
  0x7e   :  { %1149 = vmatpush2.msra.mxu1 %v643_v59  ;;  %931 = vmatprep.mubr.f32.mxu0 %v6237_v60  ;;  %v106_v48 = vld [vmem:[%s9154_s1 + $0x268] sm:$0xff]  ;;  %v105_v50 = vld [vmem:[%s9154_s1 + $0x260] sm:$0xff] }
  0x7f   :  { %1073 = vmatprep.subr.mxu0 %v248_v61  ;;  %1150 = vmatprep.subr.mxu1 %v632_v62  ;;  %v490_v49 = vld [vmem:[%s9154_s1 + $0xe68] sm:$0xff]  ;;  %v489_v51 = vld [vmem:[%s9154_s1 + $0xe60] sm:$0xff] }
  0x80   :  { %932 = vmatmul.mubr.f32.gmra.mxu0 %v6248_v0  ;;  %1151 = vmatpush2.msra.mxu1 %v631_v4  ;;  %v94_v52 = vld [vmem:[%s9154_s1 + $0x208] sm:$0xff]  ;;  %v93_v54 = vld [vmem:[%s9154_s1 + $0x200] sm:$0xff] }
  0x81   :  { %1074 = vmatpush2.msra.mxu0 %v247_v3  ;;  %1008 = vmatprep.mubr.f32.mxu1 %v6260_v6  ;;  %v478_v53 = vld [vmem:[%s9154_s1 + $0xe08] sm:$0xff]  ;;  %v477_v55 = vld [vmem:[%s9154_s1 + $0xe00] sm:$0xff] }
  0x82   :  { %1075 = vmatprep.subr.mxu0 %v236_v7  ;;  %1152 = vmatprep.subr.mxu1 %v620_v8  ;;  %v82_v56 = vld [vmem:[%s9154_s1 + $0x1a8] sm:$0xff]  ;;  %v81_v58 = vld [vmem:[%s9154_s1 + $0x1a0] sm:$0xff] }
  0x83   :  { %1009 = vmatmul.mubr.f32.gmra.mxu1 %v6272_v9  ;;  %1076 = vmatpush2.msra.mxu0 %v235_v10  ;;  %v466_v57 = vld [vmem:[%s9154_s1 + $0xda8] sm:$0xff]  ;;  %v465_v59 = vld [vmem:[%s9154_s1 + $0xda0] sm:$0xff] }
  0x84   :  { %1153 = vmatpush2.msra.mxu1 %v619_v11  ;;  %1077 = vmatprep.subr.mxu0 %v224_v12  ;;  %v70_v61 = vld [vmem:[%s9154_s1 + $0x148] sm:$0xff]  ;;  %v69_v3 = vld [vmem:[%s9154_s1 + $0x140] sm:$0xff] }
  0x85   :  { %1154 = vmatprep.subr.mxu1 %v608_v13  ;;  %1078 = vmatpush2.msra.mxu0 %v223_v14  ;;  %v454_v62 = vld [vmem:[%s9154_s1 + $0xd48] sm:$0xff]  ;;  %v453_v4 = vld [vmem:[%s9154_s1 + $0xd40] sm:$0xff] }
  0x86   :  { %1079 = vmatprep.mubr.f32.mxu0 %v5862_v63  ;;  %1155 = vmatpush2.msra.mxu1 %v607_v15  ;;  %v202_v63 = vld [vmem:[%s9154_s1 + $0x568] sm:$0xff]  ;;  %v57_v10 = vld [vmem:[%s9154_s1 + $0xe0] sm:$0xff] }
  0x87   :  { %1080 = vmatmul.mubr.f32.vlgmr.msra.gmra.mxu0 %v5870_v1  ;;  %1156 = vmatprep.mubr.f32.mxu1 %v5875_v2  ;;  %v201_v1 = vld [vmem:[%s9154_s1 + $0x560] sm:$0xff]  ;;  %v58_v7 = vld [vmem:[%s9154_s1 + $0xe8] sm:$0xff] }
  0x88   :  { %1169 = vmatprep.subr.mxu0 %v214_v16  ;;  %1246 = vmatprep.subr.mxu1 %v598_v17  ;;  %v585_v2 = vld [vmem:[%s9154_s1 + $0x1160] sm:$0xff]  ;;  %v442_v8 = vld [vmem:[%s9154_s1 + $0xce8] sm:$0xff] }
  0x89   :  { %1157 = vmatmul.mubr.f32.vlgmr.msra.gmra.mxu1 %v5887_v5  ;;  %1170 = vmatpush1.msra.mxu0 %v213_v18  ;;  %v189_v5 = vld [vmem:[%s9154_s1 + $0x500] sm:$0xff]  ;;  %v46_v12 = vld [vmem:[%s9154_s1 + $0x88] sm:$0xff] }
  0x8a   :  { %1247 = vmatpush1.msra.mxu1 %v597_v19  ;;  %1171 = vmatprep.subr.mxu0 %v202_v63  ;;  %v441_v11 = vld [vmem:[%s9154_s1 + $0xce0] sm:$0xff]  ;;  %v430_v13 = vld [vmem:[%s9154_s1 + $0xc88] sm:$0xff] }
  0x8b   :  { %1248 = vmatprep.subr.mxu1 %v586_v20  ;;  %1172 = vmatpush1.msra.mxu0 %v201_v1  ;;  %v45_v14 = vld [vmem:[%s9154_s1 + $0x80] sm:$0xff]  ;;  %v34_v16 = vld [vmem:[%s9154_s1 + $0x28] sm:$0xff] }
  0x8c   :  { %1249 = vmatpush1.msra.mxu1 %v585_v2  ;;  %1173 = vmatprep.subr.mxu0 %v190_v21  ;;  %v429_v15 = vld [vmem:[%s9154_s1 + $0xc80] sm:$0xff]  ;;  %v418_v17 = vld [vmem:[%s9154_s1 + $0xc28] sm:$0xff] }
  0x8d   :  { %1250 = vmatprep.subr.mxu1 %v574_v22  ;;  %1174 = vmatpush1.msra.mxu0 %v189_v5  ;;  %v33_v18 = vld [vmem:[%s9154_s1 + $0x20] sm:$0xff]  ;;  %v406_v63 = vld [vmem:[%s9154_s1 + $0xbc8] sm:$0xff] }
  0x8e   :  { %1251 = vmatpush1.msra.mxu1 %v573_v23  ;;  %1175 = vmatprep.subr.mxu0 %v178_v24  ;;  %v417_v19 = vld [vmem:[%s9154_s1 + $0xc20] sm:$0xff]  ;;  %v790_v20 = vld [vmem:[%s9154_s1 + $0x17c8] sm:$0xff] }
  0x8f   :  { %1252 = vmatprep.subr.mxu1 %v562_v25  ;;  %1176 = vmatpush1.msra.mxu0 %v177_v26  ;;  %v405_v1 = vld [vmem:[%s9154_s1 + $0xbc0] sm:$0xff]  ;;  %v394_v21 = vld [vmem:[%s9154_s1 + $0xb68] sm:$0xff] }
  0x90   :  { %1253 = vmatpush1.msra.mxu1 %v561_v27  ;;  %1177 = vmatprep.subr.mxu0 %v166_v28  ;;  %v789_v2 = vld [vmem:[%s9154_s1 + $0x17c0] sm:$0xff]  ;;  %v778_v22 = vld [vmem:[%s9154_s1 + $0x1768] sm:$0xff] }
  0x91   :  { %1254 = vmatprep.subr.mxu1 %v550_v29  ;;  %1178 = vmatpush1.msra.mxu0 %v165_v30  ;;  %v393_v5 = vld [vmem:[%s9154_s1 + $0xb60] sm:$0xff]  ;;  %v382_v24 = vld [vmem:[%s9154_s1 + $0xb08] sm:$0xff] }
  0x92   :  { %1255 = vmatpush1.msra.mxu1 %v549_v31  ;;  %1179 = vmatprep.subr.mxu0 %v154_v32  ;;  %v777_v23 = vld [vmem:[%s9154_s1 + $0x1760] sm:$0xff]  ;;  %v766_v25 = vld [vmem:[%s9154_s1 + $0x1708] sm:$0xff] }
  0x93   :  { %1256 = vmatprep.subr.mxu1 %v538_v33  ;;  %1180 = vmatpush1.msra.mxu0 %v153_v34  ;;  %v381_v26 = vld [vmem:[%s9154_s1 + $0xb00] sm:$0xff]  ;;  %v370_v28 = vld [vmem:[%s9154_s1 + $0xaa8] sm:$0xff] }
  0x94   :  { %1257 = vmatpush1.msra.mxu1 %v537_v35  ;;  %1181 = vmatprep.subr.mxu0 %v142_v36  ;;  %v765_v27 = vld [vmem:[%s9154_s1 + $0x1700] sm:$0xff]  ;;  %v754_v29 = vld [vmem:[%s9154_s1 + $0x16a8] sm:$0xff] }
  0x95   :  { %1258 = vmatprep.subr.mxu1 %v526_v37  ;;  %1182 = vmatpush1.msra.mxu0 %v141_v38  ;;  %v369_v30 = vld [vmem:[%s9154_s1 + $0xaa0] sm:$0xff]  ;;  %v358_v32 = vld [vmem:[%s9154_s1 + $0xa48] sm:$0xff] }
  0x96   :  { %1259 = vmatpush1.msra.mxu1 %v525_v39  ;;  %1183 = vmatprep.subr.mxu0 %v130_v40  ;;  %v753_v31 = vld [vmem:[%s9154_s1 + $0x16a0] sm:$0xff]  ;;  %v742_v33 = vld [vmem:[%s9154_s1 + $0x1648] sm:$0xff] }
  0x97   :  { %1260 = vmatprep.subr.mxu1 %v514_v41  ;;  %1184 = vmatpush1.msra.mxu0 %v129_v42  ;;  %v357_v34 = vld [vmem:[%s9154_s1 + $0xa40] sm:$0xff]  ;;  %v346_v36 = vld [vmem:[%s9154_s1 + $0x9e8] sm:$0xff] }
  0x98   :  { %1261 = vmatpush1.msra.mxu1 %v513_v43  ;;  %1185 = vmatprep.subr.mxu0 %v118_v44  ;;  %v741_v35 = vld [vmem:[%s9154_s1 + $0x1640] sm:$0xff]  ;;  %v730_v37 = vld [vmem:[%s9154_s1 + $0x15e8] sm:$0xff] }
  0x99   :  { %1262 = vmatprep.subr.mxu1 %v502_v45  ;;  %1186 = vmatpush1.msra.mxu0 %v117_v46  ;;  %v345_v38 = vld [vmem:[%s9154_s1 + $0x9e0] sm:$0xff]  ;;  %v334_v40 = vld [vmem:[%s9154_s1 + $0x988] sm:$0xff] }
  0x9a   :  { %1263 = vmatpush1.msra.mxu1 %v501_v47  ;;  %1187 = vmatprep.subr.mxu0 %v106_v48  ;;  %v729_v39 = vld [vmem:[%s9154_s1 + $0x15e0] sm:$0xff]  ;;  %v718_v41 = vld [vmem:[%s9154_s1 + $0x1588] sm:$0xff] }
  0x9b   :  { %1264 = vmatprep.subr.mxu1 %v490_v49  ;;  %1188 = vmatpush1.msra.mxu0 %v105_v50  ;;  %v333_v42 = vld [vmem:[%s9154_s1 + $0x980] sm:$0xff]  ;;  %v322_v44 = vld [vmem:[%s9154_s1 + $0x928] sm:$0xff] }
  0x9c   :  { %1265 = vmatpush1.msra.mxu1 %v489_v51  ;;  %1189 = vmatprep.subr.mxu0 %v94_v52  ;;  %v717_v43 = vld [vmem:[%s9154_s1 + $0x1580] sm:$0xff]  ;;  %v706_v45 = vld [vmem:[%s9154_s1 + $0x1528] sm:$0xff] }
  0x9d   :  { %1266 = vmatprep.subr.mxu1 %v478_v53  ;;  %1190 = vmatpush1.msra.mxu0 %v93_v54  ;;  %v321_v46 = vld [vmem:[%s9154_s1 + $0x920] sm:$0xff]  ;;  %v310_v48 = vld [vmem:[%s9154_s1 + $0x8c8] sm:$0xff] }
  0x9e   :  { %1267 = vmatpush1.msra.mxu1 %v477_v55  ;;  %1191 = vmatprep.subr.mxu0 %v82_v56  ;;  %v705_v47 = vld [vmem:[%s9154_s1 + $0x1520] sm:$0xff]  ;;  %v694_v49 = vld [vmem:[%s9154_s1 + $0x14c8] sm:$0xff] }
  0x9f   :  { %1268 = vmatprep.subr.mxu1 %v466_v57  ;;  %1192 = vmatpush1.msra.mxu0 %v81_v58  ;;  %v309_v50 = vld [vmem:[%s9154_s1 + $0x8c0] sm:$0xff]  ;;  %v298_v52 = vld [vmem:[%s9154_s1 + $0x868] sm:$0xff] }
  0xa0   :  { %1269 = vmatpush1.msra.mxu1 %v465_v59  ;;  %1193 = vmatprep.subr.mxu0 %v70_v61  ;;  %v693_v51 = vld [vmem:[%s9154_s1 + $0x14c0] sm:$0xff]  ;;  %v682_v53 = vld [vmem:[%s9154_s1 + $0x1468] sm:$0xff] }
  0xa1   :  { %1270 = vmatprep.subr.mxu1 %v454_v62  ;;  %1194 = vmatpush1.msra.mxu0 %v69_v3  ;;  %v297_v54 = vld [vmem:[%s9154_s1 + $0x860] sm:$0xff]  ;;  %v286_v56 = vld [vmem:[%s9154_s1 + $0x808] sm:$0xff] }
  0xa2   :  { %1271 = vmatpush1.msra.mxu1 %v453_v4  ;;  %1195 = vmatprep.subr.mxu0 %v58_v7  ;;  %v681_v55 = vld [vmem:[%s9154_s1 + $0x1460] sm:$0xff]  ;;  %v670_v57 = vld [vmem:[%s9154_s1 + $0x1408] sm:$0xff] }
  0xa3   :  { %1272 = vmatprep.subr.mxu1 %v442_v8  ;;  %1196 = vmatpush1.msra.mxu0 %v57_v10  ;;  %v285_v58 = vld [vmem:[%s9154_s1 + $0x800] sm:$0xff]  ;;  %v274_v61 = vld [vmem:[%s9154_s1 + $0x7a8] sm:$0xff] }
  0xa4   :  { %1273 = vmatpush1.msra.mxu1 %v441_v11  ;;  %1197 = vmatprep.subr.mxu0 %v46_v12  ;;  %v669_v59 = vld [vmem:[%s9154_s1 + $0x1400] sm:$0xff]  ;;  %v658_v62 = vld [vmem:[%s9154_s1 + $0x13a8] sm:$0xff] }
  0xa5   :  { %1274 = vmatprep.subr.mxu1 %v430_v13  ;;  %1198 = vmatpush1.msra.mxu0 %v45_v14  ;;  %v273_v3 = vld [vmem:[%s9154_s1 + $0x7a0] sm:$0xff]  ;;  %v262_v7 = vld [vmem:[%s9154_s1 + $0x748] sm:$0xff] }
  0xa6   :  { %1275 = vmatpush1.msra.mxu1 %v429_v15  ;;  %1199 = vmatprep.subr.mxu0 %v34_v16  ;;  %v657_v4 = vld [vmem:[%s9154_s1 + $0x13a0] sm:$0xff]  ;;  %v646_v8 = vld [vmem:[%s9154_s1 + $0x1348] sm:$0xff] }
  0xa7   :  { %1276 = vmatprep.subr.mxu1 %v418_v17  ;;  %1200 = vmatpush1.msra.mxu0 %v33_v18  ;;  %v261_v10 = vld [vmem:[%s9154_s1 + $0x740] sm:$0xff]  ;;  %v250_v12 = vld [vmem:[%s9154_s1 + $0x6e8] sm:$0xff] }
  0xa8   :  { %1277 = vmatpush1.msra.mxu1 %v417_v19  ;;  %1201 = vmatprep.subr.mxu0 %v406_v63  ;;  %v645_v11 = vld [vmem:[%s9154_s1 + $0x1340] sm:$0xff]  ;;  %v634_v13 = vld [vmem:[%s9154_s1 + $0x12e8] sm:$0xff] }
  0xa9   :  { %1278 = vmatprep.subr.mxu1 %v790_v20  ;;  %1202 = vmatpush2.msra.mxu0 %v405_v1  ;;  %v249_v14 = vld [vmem:[%s9154_s1 + $0x6e0] sm:$0xff]  ;;  %v238_v16 = vld [vmem:[%s9154_s1 + $0x688] sm:$0xff] }
  0xaa   :  { %1279 = vmatpush2.msra.mxu1 %v789_v2  ;;  %1203 = vmatprep.subr.mxu0 %v394_v21  ;;  %v633_v15 = vld [vmem:[%s9154_s1 + $0x12e0] sm:$0xff]  ;;  %v622_v17 = vld [vmem:[%s9154_s1 + $0x1288] sm:$0xff] }
  0xab   :  { %1280 = vmatprep.subr.mxu1 %v778_v22  ;;  %1204 = vmatpush2.msra.mxu0 %v393_v5  ;;  %v237_v18 = vld [vmem:[%s9154_s1 + $0x680] sm:$0xff]  ;;  %v226_v63 = vld [vmem:[%s9154_s1 + $0x628] sm:$0xff]  ;;  %v216_v22 = vld [vmem:[%s9154_s1 + $0x5d8] sm:$0xff] }
  0xac   :  { %1281 = vmatpush2.msra.mxu1 %v777_v23  ;;  %1205 = vmatprep.subr.mxu0 %v382_v24  ;;  %v621_v19 = vld [vmem:[%s9154_s1 + $0x1280] sm:$0xff]  ;;  %v610_v20 = vld [vmem:[%s9154_s1 + $0x1228] sm:$0xff]  ;;  %v6698_v5 = vld [vmem:[%s9153_s0 + $0x18] sm:$0xff] }
  0xad   :  { %1282 = vmatprep.subr.mxu1 %v766_v25  ;;  %1206 = vmatpush2.msra.mxu0 %v381_v26  ;;  %v225_v1 = vld [vmem:[%s9154_s1 + $0x620] sm:$0xff]  ;;  %v6689_v21 = vld [vmem:[%s9153_s0 + $0x8] sm:$0xff]  ;;  %v215_v23 = vld [vmem:[%s9154_s1 + $0x5d0] sm:$0xff] }
  0xae   :  { %1283 = vmatpush2.msra.mxu1 %v765_v27  ;;  %1207 = vmatprep.subr.mxu0 %v370_v28  ;;  %v609_v2 = vld [vmem:[%s9154_s1 + $0x1220] sm:$0xff]  ;;  %v600_v24 = vld [vmem:[%s9154_s1 + $0x11d8] sm:$0xff]  ;;  %v6716_v26 = vld [vmem:[%s9153_s0 + $0x10] sm:$0xff] }
  0xaf   :  { %1284 = vmatprep.subr.mxu1 %v754_v29  ;;  %1208 = vmatpush2.msra.mxu0 %v369_v30  ;;  %v6710_v25 = vld [vmem:[%s9153_s0] sm:$0xff]  ;;  %v204_v27 = vld [vmem:[%s9154_s1 + $0x578] sm:$0xff]  ;;  %v203_v28 = vld [vmem:[%s9154_s1 + $0x570] sm:$0xff] }
  0xb0   :  { %1285 = vmatpush2.msra.mxu1 %v753_v31  ;;  %1209 = vmatprep.subr.mxu0 %v358_v32  ;;  %v599_v29 = vld [vmem:[%s9154_s1 + $0x11d0] sm:$0xff]  ;;  %v192_v30 = vld [vmem:[%s9154_s1 + $0x518] sm:$0xff] }
  0xb1   :  { %1286 = vmatprep.subr.mxu1 %v742_v33  ;;  %1210 = vmatpush2.msra.mxu0 %v357_v34  ;;  %v180_v31 = vld [vmem:[%s9154_s1 + $0x4b8] sm:$0xff]  ;;  %v587_v33 = vld [vmem:[%s9154_s1 + $0x1170] sm:$0xff] }
  0xb2   :  { %1287 = vmatpush2.msra.mxu1 %v741_v35  ;;  %1211 = vmatprep.subr.mxu0 %v346_v36  ;;  %v588_v32 = vld [vmem:[%s9154_s1 + $0x1178] sm:$0xff]  ;;  %v167_v35 = vld [vmem:[%s9154_s1 + $0x450] sm:$0xff] }
  0xb3   :  { %1288 = vmatprep.subr.mxu1 %v730_v37  ;;  %1212 = vmatpush2.msra.mxu0 %v345_v38  ;;  %v168_v34 = vld [vmem:[%s9154_s1 + $0x458] sm:$0xff]  ;;  %v575_v36 = vld [vmem:[%s9154_s1 + $0x1110] sm:$0xff] }
  0xb4   :  { %1289 = vmatpush2.msra.mxu1 %v729_v39  ;;  %1213 = vmatprep.subr.mxu0 %v334_v40  ;;  %v564_v37 = vld [vmem:[%s9154_s1 + $0x10b8] sm:$0xff]  ;;  %v155_v38 = vld [vmem:[%s9154_s1 + $0x3f0] sm:$0xff] }
  0xb5   :  { %1290 = vmatprep.subr.mxu1 %v718_v41  ;;  %1214 = vmatpush2.msra.mxu0 %v333_v42  ;;  %v563_v39 = vld [vmem:[%s9154_s1 + $0x10b0] sm:$0xff]  ;;  %v144_v40 = vld [vmem:[%s9154_s1 + $0x398] sm:$0xff] }
  0xb6   :  { %1291 = vmatpush2.msra.mxu1 %v717_v43  ;;  %1215 = vmatprep.subr.mxu0 %v322_v44  ;;  %v552_v41 = vld [vmem:[%s9154_s1 + $0x1058] sm:$0xff]  ;;  %v143_v42 = vld [vmem:[%s9154_s1 + $0x390] sm:$0xff] }
  0xb7   :  { %1292 = vmatprep.subr.mxu1 %v706_v45  ;;  %1216 = vmatpush2.msra.mxu0 %v321_v46  ;;  %v551_v43 = vld [vmem:[%s9154_s1 + $0x1050] sm:$0xff]  ;;  %v132_v44 = vld [vmem:[%s9154_s1 + $0x338] sm:$0xff] }
  0xb8   :  { %1293 = vmatpush2.msra.mxu1 %v705_v47  ;;  %1217 = vmatprep.subr.mxu0 %v310_v48  ;;  %v540_v45 = vld [vmem:[%s9154_s1 + $0xff8] sm:$0xff]  ;;  %v131_v46 = vld [vmem:[%s9154_s1 + $0x330] sm:$0xff] }
  0xb9   :  { %1294 = vmatprep.subr.mxu1 %v694_v49  ;;  %1218 = vmatpush2.msra.mxu0 %v309_v50  ;;  %v539_v47 = vld [vmem:[%s9154_s1 + $0xff0] sm:$0xff]  ;;  %v120_v48 = vld [vmem:[%s9154_s1 + $0x2d8] sm:$0xff] }
  0xba   :  { %1295 = vmatpush2.msra.mxu1 %v693_v51  ;;  %1219 = vmatprep.subr.mxu0 %v298_v52  ;;  %v528_v49 = vld [vmem:[%s9154_s1 + $0xf98] sm:$0xff]  ;;  %v119_v50 = vld [vmem:[%s9154_s1 + $0x2d0] sm:$0xff] }
  0xbb   :  { %1296 = vmatprep.subr.mxu1 %v682_v53  ;;  %1220 = vmatpush2.msra.mxu0 %v297_v54  ;;  %v527_v51 = vld [vmem:[%s9154_s1 + $0xf90] sm:$0xff]  ;;  %v108_v52 = vld [vmem:[%s9154_s1 + $0x278] sm:$0xff] }
  0xbc   :  { %1297 = vmatpush2.msra.mxu1 %v681_v55  ;;  %1221 = vmatprep.subr.mxu0 %v286_v56  ;;  %v516_v53 = vld [vmem:[%s9154_s1 + $0xf38] sm:$0xff]  ;;  %v107_v54 = vld [vmem:[%s9154_s1 + $0x270] sm:$0xff] }
  0xbd   :  { %1298 = vmatprep.subr.mxu1 %v670_v57  ;;  %1222 = vmatpush2.msra.mxu0 %v285_v58  ;;  %v515_v55 = vld [vmem:[%s9154_s1 + $0xf30] sm:$0xff]  ;;  %v96_v56 = vld [vmem:[%s9154_s1 + $0x218] sm:$0xff] }
  0xbe   :  { %1299 = vmatpush2.msra.mxu1 %v669_v59  ;;  %1223 = vmatprep.subr.mxu0 %v274_v61  ;;  %v504_v57 = vld [vmem:[%s9154_s1 + $0xed8] sm:$0xff]  ;;  %v95_v58 = vld [vmem:[%s9154_s1 + $0x210] sm:$0xff] }
  0xbf   :  { %1300 = vmatprep.subr.mxu1 %v658_v62  ;;  %1224 = vmatpush2.msra.mxu0 %v273_v3  ;;  %v503_v59 = vld [vmem:[%s9154_s1 + $0xed0] sm:$0xff]  ;;  %v84_v61 = vld [vmem:[%s9154_s1 + $0x1b8] sm:$0xff] }
  0xc0   :  { %1301 = vmatpush2.msra.mxu1 %v657_v4  ;;  %1225 = vmatprep.subr.mxu0 %v262_v7  ;;  %v492_v62 = vld [vmem:[%s9154_s1 + $0xe78] sm:$0xff]  ;;  %v83_v3 = vld [vmem:[%s9154_s1 + $0x1b0] sm:$0xff] }
  0xc1   :  { %1302 = vmatprep.subr.mxu1 %v646_v8  ;;  %1085 = vmatprep.mubr.f32.mxu0 %v6237_v60  ;;  %v491_v4 = vld [vmem:[%s9154_s1 + $0xe70] sm:$0xff]  ;;  %v72_v7 = vld [vmem:[%s9154_s1 + $0x158] sm:$0xff] }
  0xc2   :  { %1226 = vmatpush2.msra.mxu0 %v261_v10  ;;  %1303 = vmatpush2.msra.mxu1 %v645_v11  ;;  %v480_v8 = vld [vmem:[%s9154_s1 + $0xe18] sm:$0xff]  ;;  %v71_v10 = vld [vmem:[%s9154_s1 + $0x150] sm:$0xff] }
  0xc3   :  { %1086 = vmatmul.mubr.f32.gmra.mxu0 %v6248_v0  ;;  %1227 = vmatprep.subr.mxu0 %v250_v12  ;;  %v479_v11 = vld [vmem:[%s9154_s1 + $0xe10] sm:$0xff]  ;;  %v60_v12 = vld [vmem:[%s9154_s1 + $0xf8] sm:$0xff] }
  0xc4   :  { %1304 = vmatprep.subr.mxu1 %v634_v13  ;;  %1162 = vmatprep.mubr.f32.mxu1 %v6260_v6  ;;  %v468_v13 = vld [vmem:[%s9154_s1 + $0xdb8] sm:$0xff] }
  0xc5   :  { %1228 = vmatpush2.msra.mxu0 %v249_v14  ;;  %1305 = vmatpush2.msra.mxu1 %v633_v15  ;;  %v59_v14 = vld [vmem:[%s9154_s1 + $0xf0] sm:$0xff] }
  0xc6   :  { %1229 = vmatprep.subr.mxu0 %v238_v16  ;;  %1163 = vmatmul.mubr.f32.gmra.mxu1 %v6272_v9  ;;  %v467_v15 = vld [vmem:[%s9154_s1 + $0xdb0] sm:$0xff]  ;;  %v48_v16 = vld [vmem:[%s9154_s1 + $0x98] sm:$0xff] }
  0xc7   :  { %1306 = vmatprep.subr.mxu1 %v622_v17  ;;  %1230 = vmatpush2.msra.mxu0 %v237_v18  ;;  %v456_v17 = vld [vmem:[%s9154_s1 + $0xd58] sm:$0xff]  ;;  %v47_v18 = vld [vmem:[%s9154_s1 + $0x90] sm:$0xff] }
  0xc8   :  { %1307 = vmatpush2.msra.mxu1 %v621_v19  ;;  %1231 = vmatprep.subr.mxu0 %v226_v63  ;;  %v455_v19 = vld [vmem:[%s9154_s1 + $0xd50] sm:$0xff] }
  0xc9   :  { %1308 = vmatprep.subr.mxu1 %v610_v20  ;;  %1232 = vmatpush2.msra.mxu0 %v225_v1 }
  0xca   :  { %1233 = vmatprep.mubr.f32.mxu0 %v6689_v21  ;;  %1309 = vmatpush2.msra.mxu1 %v609_v2 }
  0xcb   :  { %1310 = vmatprep.mubr.f32.mxu1 %v6698_v5  ;;  %1234 = vmatmul.mubr.f32.vlgmr.msra.gmra.mxu0 %v6710_v25 }
  0xcc   :  { %1311 = vmatmul.mubr.f32.vlgmr.msra.gmra.mxu1 %v6716_v26  ;;  %1323 = vmatprep.subr.mxu0 %v216_v22 }
  0xcd   :  { %1239 = vmatprep.mubr.f32.mxu0 %v6237_v60  ;;  %1324 = vmatpush1.msra.mxu0 %v215_v23  ;;  %v191_v60 = vld [vmem:[%s9154_s1 + $0x510] sm:$0xff] }
  0xce   :  { %1400 = vmatprep.subr.mxu1 %v600_v24  ;;  %1325 = vmatprep.subr.mxu0 %v204_v27 }
  0xcf   :  { %1316 = vmatprep.mubr.f32.mxu1 %v6260_v6  ;;  %1326 = vmatpush1.msra.mxu0 %v203_v28  ;;  %v179_v6 = vld [vmem:[%s9154_s1 + $0x4b0] sm:$0xff] }
  0xd0   :  { %1401 = vmatpush1.msra.mxu1 %v599_v29  ;;  %1240 = vmatmul.mubr.f32.gmra.mxu0 %v6248_v0  ;;  %v576_v0 = vld [vmem:[%s9154_s1 + $0x1118] sm:$0xff] }
  0xd1   :  { %1327 = vmatprep.subr.mxu0 %v192_v30  ;;  %1317 = vmatmul.mubr.f32.gmra.mxu1 %v6272_v9  ;;  %v156_v9 = vld [vmem:[%s9154_s1 + $0x3f8] sm:$0xff] }
  0xd2   :  { %1328 = vmatpush1.msra.mxu0 %v191_v60  ;;  %1402 = vmatprep.subr.mxu1 %v588_v32 }
  0xd3   :  { %1329 = vmatprep.subr.mxu0 %v180_v31  ;;  %1403 = vmatpush1.msra.mxu1 %v587_v33 }
  0xd4   :  { %1330 = vmatpush1.msra.mxu0 %v179_v6  ;;  %1404 = vmatprep.subr.mxu1 %v576_v0 }
  0xd5   :  { %1331 = vmatprep.subr.mxu0 %v168_v34  ;;  %1405 = vmatpush1.msra.mxu1 %v575_v36 }
  0xd6   :  { %1332 = vmatpush1.msra.mxu0 %v167_v35  ;;  %1406 = vmatprep.subr.mxu1 %v564_v37 }
  0xd7   :  { %1333 = vmatprep.subr.mxu0 %v156_v9  ;;  %1407 = vmatpush1.msra.mxu1 %v563_v39 }
  0xd8   :  { %1334 = vmatpush1.msra.mxu0 %v155_v38  ;;  %1408 = vmatprep.subr.mxu1 %v552_v41 }
  0xd9   :  { %1335 = vmatprep.subr.mxu0 %v144_v40  ;;  %1409 = vmatpush1.msra.mxu1 %v551_v43 }
  0xda   :  { %1336 = vmatpush1.msra.mxu0 %v143_v42  ;;  %1410 = vmatprep.subr.mxu1 %v540_v45 }
  0xdb   :  { %1337 = vmatprep.subr.mxu0 %v132_v44  ;;  %1411 = vmatpush1.msra.mxu1 %v539_v47 }
  0xdc   :  { %1338 = vmatpush1.msra.mxu0 %v131_v46  ;;  %1412 = vmatprep.subr.mxu1 %v528_v49 }
  0xdd   :  { %1339 = vmatprep.subr.mxu0 %v120_v48  ;;  %1413 = vmatpush1.msra.mxu1 %v527_v51 }
  0xde   :  { %1340 = vmatpush1.msra.mxu0 %v119_v50  ;;  %1414 = vmatprep.subr.mxu1 %v516_v53 }
  0xdf   :  { %1341 = vmatprep.subr.mxu0 %v108_v52  ;;  %1415 = vmatpush1.msra.mxu1 %v515_v55 }
  0xe0   :  { %1342 = vmatpush1.msra.mxu0 %v107_v54  ;;  %1416 = vmatprep.subr.mxu1 %v504_v57 }
  0xe1   :  { %1343 = vmatprep.subr.mxu0 %v96_v56  ;;  %1417 = vmatpush1.msra.mxu1 %v503_v59 }
  0xe2   :  { %1344 = vmatpush1.msra.mxu0 %v95_v58  ;;  %1418 = vmatprep.subr.mxu1 %v492_v62 }
  0xe3   :  { %1345 = vmatprep.subr.mxu0 %v84_v61  ;;  %1419 = vmatpush1.msra.mxu1 %v491_v4 }
  0xe4   :  { %1346 = vmatpush1.msra.mxu0 %v83_v3  ;;  %1420 = vmatprep.subr.mxu1 %v480_v8 }
  0xe5   :  { %1347 = vmatprep.subr.mxu0 %v72_v7  ;;  %1421 = vmatpush1.msra.mxu1 %v479_v11 }
  0xe6   :  { %1348 = vmatpush1.msra.mxu0 %v71_v10  ;;  %1422 = vmatprep.subr.mxu1 %v468_v13 }
  0xe7   :  { %1349 = vmatprep.subr.mxu0 %v60_v12 }
  0xe8   :  { %10 = vsyncpa [#allocation3], 0  ;;  %1350 = vmatpush1.msra.mxu0 %v59_v14  ;;  %1423 = vmatpush1.msra.mxu1 %v467_v15  ;;  %v36_v63 = vld [vmem:[%s9154_s1 + $0x38] sm:$0xff]  ;;  %v35_v1 = vld [vmem:[%s9154_s1 + $0x30] sm:$0xff]  ;;  %v801_v46 = vlaneseq  ;;  %vm1785_vm0 = vcmask 523264   ;;  %vm5443_vm1 = vmmov 0  }
  0xe9   :  { %v444_v20 = vld [vmem:[%s9154_s1 + $0xcf8] sm:$0xff]  ;;  %1351 = vmatprep.subr.mxu0 %v48_v16  ;;  %1424 = vmatprep.subr.mxu1 %v456_v17  ;;  %v443_v2 = vld [vmem:[%s9154_s1 + $0xcf0] sm:$0xff]  ;;  %v7034_v11 = vld [vmem:[%s9155_s2] sm:$0xff]  ;;  %vm1938_vm2 = vcmask 64512  }
  0xea   :  { %1352 = vmatpush1.msra.mxu0 %v47_v18  ;;  %1425 = vmatpush1.msra.mxu1 %v455_v19  ;;  %v408_v22 = vld [vmem:[%s9154_s1 + $0xbd8] sm:$0xff]  ;;  %v407_v24 = vld [vmem:[%s9154_s1 + $0xbd0] sm:$0xff]  ;;  %v6996_v55 = vshrl.u32 %v801_v46, 7  ;;  %v590_v46 = vld [vmem:[%s9154_s1 + $0x1188] sm:$0xff] }
  0xeb   :  { %v432_v23 = vld [vmem:[%s9154_s1 + $0xc98] sm:$0xff]  ;;  %1353 = vmatprep.subr.mxu0 %v36_v63  ;;  %1426 = vmatprep.subr.mxu1 %v444_v20  ;;  %v431_v27 = vld [vmem:[%s9154_s1 + $0xc90] sm:$0xff] }
  0xec   :  { %1354 = vmatpush1.msra.mxu0 %v35_v1  ;;  %1427 = vmatpush1.msra.mxu1 %v443_v2  ;;  %v396_v28 = vld [vmem:[%s9154_s1 + $0xb78] sm:$0xff]  ;;  %v395_v30 = vld [vmem:[%s9154_s1 + $0xb70] sm:$0xff]  ;;  %v7023_v7 = vsub.s32 1, %v6996_v55 }
  0xed   :  { %v420_v29 = vld [vmem:[%s9154_s1 + $0xc38] sm:$0xff]  ;;  %1355 = vmatprep.subr.mxu0 %v408_v22  ;;  %1428 = vmatprep.subr.mxu1 %v432_v23  ;;  %v419_v60 = vld [vmem:[%s9154_s1 + $0xc30] sm:$0xff] }
  0xee   :  { %1356 = vmatpush2.msra.mxu0 %v407_v24  ;;  %1429 = vmatpush1.msra.mxu1 %v431_v27  ;;  %v384_v31 = vld [vmem:[%s9154_s1 + $0xb18] sm:$0xff]  ;;  %v383_v6 = vld [vmem:[%s9154_s1 + $0xb10] sm:$0xff]  ;;  %v7056_v18 = vrot.slane %v7034_v11, %v7023_v7 }
  0xef   :  { %v792_v32 = vld [vmem:[%s9154_s1 + $0x17d8] sm:$0xff]  ;;  %1357 = vmatprep.subr.mxu0 %v396_v28  ;;  %1430 = vmatprep.subr.mxu1 %v420_v29  ;;  %v791_v33 = vld [vmem:[%s9154_s1 + $0x17d0] sm:$0xff] }
  0xf0   :  { %1358 = vmatpush2.msra.mxu0 %v395_v30  ;;  %1431 = vmatpush1.msra.mxu1 %v419_v60  ;;  %v372_v34 = vld [vmem:[%s9154_s1 + $0xab8] sm:$0xff]  ;;  %v371_v35 = vld [vmem:[%s9154_s1 + $0xab0] sm:$0xff] }
  0xf1   :  { %v780_v0 = vld [vmem:[%s9154_s1 + $0x1778] sm:$0xff]  ;;  %1359 = vmatprep.subr.mxu0 %v384_v31  ;;  %1432 = vmatprep.subr.mxu1 %v792_v32  ;;  %v779_v36 = vld [vmem:[%s9154_s1 + $0x1770] sm:$0xff] }
  0xf2   :  { %1360 = vmatpush2.msra.mxu0 %v383_v6  ;;  %1433 = vmatpush2.msra.mxu1 %v791_v33  ;;  %v360_v9 = vld [vmem:[%s9154_s1 + $0xa58] sm:$0xff]  ;;  %v359_v38 = vld [vmem:[%s9154_s1 + $0xa50] sm:$0xff] }
  0xf3   :  { %v768_v37 = vld [vmem:[%s9154_s1 + $0x1718] sm:$0xff]  ;;  %1361 = vmatprep.subr.mxu0 %v372_v34  ;;  %1434 = vmatprep.subr.mxu1 %v780_v0  ;;  %v767_v39 = vld [vmem:[%s9154_s1 + $0x1710] sm:$0xff] }
  0xf4   :  { %1362 = vmatpush2.msra.mxu0 %v371_v35  ;;  %1435 = vmatpush2.msra.mxu1 %v779_v36  ;;  %v348_v40 = vld [vmem:[%s9154_s1 + $0x9f8] sm:$0xff]  ;;  %v347_v42 = vld [vmem:[%s9154_s1 + $0x9f0] sm:$0xff] }
  0xf5   :  { %v756_v41 = vld [vmem:[%s9154_s1 + $0x16b8] sm:$0xff]  ;;  %1363 = vmatprep.subr.mxu0 %v360_v9  ;;  %1436 = vmatprep.subr.mxu1 %v768_v37  ;;  %v755_v43 = vld [vmem:[%s9154_s1 + $0x16b0] sm:$0xff]  ;;  %v218_v9 = vld [vmem:[%s9154_s1 + $0x5e8] sm:$0xff] }
  0xf6   :  { %1364 = vmatpush2.msra.mxu0 %v359_v38  ;;  %1437 = vmatpush2.msra.mxu1 %v767_v39  ;;  %v336_v44 = vld [vmem:[%s9154_s1 + $0x998] sm:$0xff]  ;;  %v335_v47 = vld [vmem:[%s9154_s1 + $0x990] sm:$0xff]  ;;  %v217_v38 = vld [vmem:[%s9154_s1 + $0x5e0] sm:$0xff] }
  0xf7   :  { %v744_v45 = vld [vmem:[%s9154_s1 + $0x1658] sm:$0xff]  ;;  %1365 = vmatprep.subr.mxu0 %v348_v40  ;;  %1438 = vmatprep.subr.mxu1 %v756_v41  ;;  %v743_v48 = vld [vmem:[%s9154_s1 + $0x1650] sm:$0xff]  ;;  %v206_v40 = vld [vmem:[%s9154_s1 + $0x588] sm:$0xff] }
  0xf8   :  { %1366 = vmatpush2.msra.mxu0 %v347_v42  ;;  %1439 = vmatpush2.msra.mxu1 %v755_v43  ;;  %v324_v49 = vld [vmem:[%s9154_s1 + $0x938] sm:$0xff]  ;;  %v323_v51 = vld [vmem:[%s9154_s1 + $0x930] sm:$0xff]  ;;  %v194_v42 = vld [vmem:[%s9154_s1 + $0x528] sm:$0xff] }
  0xf9   :  { %v732_v50 = vld [vmem:[%s9154_s1 + $0x15f8] sm:$0xff]  ;;  %1367 = vmatprep.subr.mxu0 %v336_v44  ;;  %1440 = vmatprep.subr.mxu1 %v744_v45  ;;  %v731_v52 = vld [vmem:[%s9154_s1 + $0x15f0] sm:$0xff]  ;;  %v193_v43 = vld [vmem:[%s9154_s1 + $0x520] sm:$0xff] }
  0xfa   :  { %1368 = vmatpush2.msra.mxu0 %v335_v47  ;;  %1441 = vmatpush2.msra.mxu1 %v743_v48  ;;  %v312_v53 = vld [vmem:[%s9154_s1 + $0x8d8] sm:$0xff]  ;;  %v311_v56 = vld [vmem:[%s9154_s1 + $0x8d0] sm:$0xff]  ;;  %v601_v44 = vld [vmem:[%s9154_s1 + $0x11e0] sm:$0xff] }
  0xfb   :  { %v720_v54 = vld [vmem:[%s9154_s1 + $0x1598] sm:$0xff]  ;;  %1369 = vmatprep.subr.mxu0 %v324_v49  ;;  %1442 = vmatprep.subr.mxu1 %v732_v50  ;;  %v719_v57 = vld [vmem:[%s9154_s1 + $0x1590] sm:$0xff]  ;;  %v182_v45 = vld [vmem:[%s9154_s1 + $0x4c8] sm:$0xff] }
  0xfc   :  { %1370 = vmatpush2.msra.mxu0 %v323_v51  ;;  %1443 = vmatpush2.msra.mxu1 %v731_v52  ;;  %v300_v58 = vld [vmem:[%s9154_s1 + $0x878] sm:$0xff]  ;;  %v299_v61 = vld [vmem:[%s9154_s1 + $0x870] sm:$0xff]  ;;  %v181_v47 = vld [vmem:[%s9154_s1 + $0x4c0] sm:$0xff] }
  0xfd   :  { %v708_v59 = vld [vmem:[%s9154_s1 + $0x1538] sm:$0xff]  ;;  %1371 = vmatprep.subr.mxu0 %v312_v53  ;;  %1444 = vmatprep.subr.mxu1 %v720_v54  ;;  %v707_v62 = vld [vmem:[%s9154_s1 + $0x1530] sm:$0xff]  ;;  %v170_v48 = vld [vmem:[%s9154_s1 + $0x468] sm:$0xff] }
  0xfe   :  { %1372 = vmatpush2.msra.mxu0 %v311_v56  ;;  %1445 = vmatpush2.msra.mxu1 %v719_v57  ;;  %v288_v3 = vld [vmem:[%s9154_s1 + $0x818] sm:$0xff]  ;;  %v287_v8 = vld [vmem:[%s9154_s1 + $0x810] sm:$0xff]  ;;  %v578_v49 = vld [vmem:[%s9154_s1 + $0x1128] sm:$0xff] }
  0xff   :  { %v696_v4 = vld [vmem:[%s9154_s1 + $0x14d8] sm:$0xff]  ;;  %1373 = vmatprep.subr.mxu0 %v300_v58  ;;  %1446 = vmatprep.subr.mxu1 %v708_v59  ;;  %v695_v10 = vld [vmem:[%s9154_s1 + $0x14d0] sm:$0xff]  ;;  %v577_v50 = vld [vmem:[%s9154_s1 + $0x1120] sm:$0xff] }
 0x100   :  { %1374 = vmatpush2.msra.mxu0 %v299_v61  ;;  %1447 = vmatpush2.msra.mxu1 %v707_v62  ;;  %v276_v12 = vld [vmem:[%s9154_s1 + $0x7b8] sm:$0xff]  ;;  %v275_v14 = vld [vmem:[%s9154_s1 + $0x7b0] sm:$0xff]  ;;  %v158_v51 = vld [vmem:[%s9154_s1 + $0x408] sm:$0xff] }
 0x101   :  { %v684_v13 = vld [vmem:[%s9154_s1 + $0x1478] sm:$0xff]  ;;  %1375 = vmatprep.subr.mxu0 %v288_v3  ;;  %1448 = vmatprep.subr.mxu1 %v696_v4  ;;  %v683_v15 = vld [vmem:[%s9154_s1 + $0x1470] sm:$0xff]  ;;  %v566_v52 = vld [vmem:[%s9154_s1 + $0x10c8] sm:$0xff] }
 0x102   :  { %1376 = vmatpush2.msra.mxu0 %v287_v8  ;;  %1449 = vmatpush2.msra.mxu1 %v695_v10  ;;  %v264_v16 = vld [vmem:[%s9154_s1 + $0x758] sm:$0xff]  ;;  %v263_v19 = vld [vmem:[%s9154_s1 + $0x750] sm:$0xff]  ;;  %v157_v53 = vld [vmem:[%s9154_s1 + $0x400] sm:$0xff] }
 0x103   :  { %v672_v17 = vld [vmem:[%s9154_s1 + $0x1418] sm:$0xff]  ;;  %1377 = vmatprep.subr.mxu0 %v276_v12  ;;  %1450 = vmatprep.subr.mxu1 %v684_v13  ;;  %v671_v63 = vld [vmem:[%s9154_s1 + $0x1410] sm:$0xff]  ;;  %v7064_v20 = vpop.f32.mrf.mxu0  ;;  %v565_v54 = vld [vmem:[%s9154_s1 + $0x10c0] sm:$0xff] }
 0x104   :  { %1378 = vmatpush2.msra.mxu0 %v275_v14  ;;  %1451 = vmatpush2.msra.mxu1 %v683_v15  ;;  %v252_v1 = vld [vmem:[%s9154_s1 + $0x6f8] sm:$0xff]  ;;  %v251_v22 = vld [vmem:[%s9154_s1 + $0x6f0] sm:$0xff]  ;;  %v146_v56 = vld [vmem:[%s9154_s1 + $0x3a8] sm:$0xff] }
 0x105   :  { %v660_v2 = vld [vmem:[%s9154_s1 + $0x13b8] sm:$0xff]  ;;  %1379 = vmatprep.subr.mxu0 %v264_v16  ;;  %1452 = vmatprep.subr.mxu1 %v672_v17  ;;  %v659_v23 = vld [vmem:[%s9154_s1 + $0x13b0] sm:$0xff]  ;;  %v7078_v24 = vpop.f32.mrf.mxu1  ;;  %v929_v27 = vpop.f32.mrf.mxu0  ;;  %v554_v57 = vld [vmem:[%s9154_s1 + $0x1068] sm:$0xff] }
 0x106   :  { %1380 = vmatpush2.msra.mxu0 %v263_v19  ;;  %1453 = vmatpush2.msra.mxu1 %v671_v63  ;;  %v240_v28 = vld [vmem:[%s9154_s1 + $0x698] sm:$0xff]  ;;  %v930_v30 = vadd.f32 %v929_v27, %v7056_v18  ;;  %v239_v60 = vld [vmem:[%s9154_s1 + $0x690] sm:$0xff]  ;;  %v145_v58 = vld [vmem:[%s9154_s1 + $0x3a0] sm:$0xff] }
 0x107   :  { %v648_v29 = vld [vmem:[%s9154_s1 + $0x1358] sm:$0xff]  ;;  %1381 = vmatprep.subr.mxu0 %v252_v1  ;;  %1454 = vmatprep.subr.mxu1 %v660_v2  ;;  %v647_v31 = vld [vmem:[%s9154_s1 + $0x1350] sm:$0xff]  ;;  %v1006_v32 = vpop.f32.mrf.mxu1  ;;  %v553_v59 = vld [vmem:[%s9154_s1 + $0x1060] sm:$0xff] }
 0x108   :  { %1382 = vmatpush2.msra.mxu0 %v251_v22  ;;  %1455 = vmatpush2.msra.mxu1 %v659_v23  ;;  %v228_v6 = vld [vmem:[%s9154_s1 + $0x638] sm:$0xff]  ;;  %v7099_v34 = vadd.f32 %v1006_v32, %v930_v30  ;;  %v227_v0 = vld [vmem:[%s9154_s1 + $0x630] sm:$0xff]  ;;  %v134_v61 = vld [vmem:[%s9154_s1 + $0x348] sm:$0xff] }
 0x109   :  { %v636_v33 = vld [vmem:[%s9154_s1 + $0x12f8] sm:$0xff]  ;;  %1383 = vmatprep.subr.mxu0 %v240_v28  ;;  %1456 = vmatprep.subr.mxu1 %v648_v29  ;;  %v635_v35 = vld [vmem:[%s9154_s1 + $0x12f0] sm:$0xff]  ;;  %v542_v62 = vld [vmem:[%s9154_s1 + $0x1008] sm:$0xff] }
 0x10a   :  { %1384 = vmatpush2.msra.mxu0 %v239_v60  ;;  %1457 = vmatpush2.msra.mxu1 %v647_v31  ;;  %v624_v36 = vld [vmem:[%s9154_s1 + $0x1298] sm:$0xff]  ;;  %v623_v37 = vld [vmem:[%s9154_s1 + $0x1290] sm:$0xff]  ;;  %v133_v3 = vld [vmem:[%s9154_s1 + $0x340] sm:$0xff] }
 0x10b   :  { %1385 = vmatprep.subr.mxu0 %v228_v6  ;;  %1458 = vmatprep.subr.mxu1 %v636_v33  ;;  %v612_v39 = vld [vmem:[%s9154_s1 + $0x1238] sm:$0xff]  ;;  %v611_v41 = vld [vmem:[%s9154_s1 + $0x1230] sm:$0xff]  ;;  %v541_v4 = vld [vmem:[%s9154_s1 + $0x1000] sm:$0xff] }
 0x10c   :  { %1386 = vmatpush2.msra.mxu0 %v227_v0  ;;  %1459 = vmatpush2.msra.mxu1 %v635_v35  ;;  %v122_v8 = vld [vmem:[%s9154_s1 + $0x2e8] sm:$0xff]  ;;  %v121_v12 = vld [vmem:[%s9154_s1 + $0x2e0] sm:$0xff] }
 0x10d   :  { %1387 = vmatprep.mubr.f32.mxu0 %v6689_v21  ;;  %1460 = vmatprep.subr.mxu1 %v624_v36  ;;  %v205_v21 = vld [vmem:[%s9154_s1 + $0x580] sm:$0xff]  ;;  %v530_v10 = vld [vmem:[%s9154_s1 + $0xfa8] sm:$0xff] }
 0x10e   :  { %1477 = vmatprep.subr.mxu0 %v218_v9  ;;  %1388 = vmatmul.mubr.f32.vlgmr.msra.gmra.mxu0 %v6710_v25  ;;  %v602_v25 = vld [vmem:[%s9154_s1 + $0x11e8] sm:$0xff]  ;;  %v529_v13 = vld [vmem:[%s9154_s1 + $0xfa0] sm:$0xff] }
 0x10f   :  { %1461 = vmatpush2.msra.mxu1 %v623_v37  ;;  %1478 = vmatpush1.msra.mxu0 %v217_v38  ;;  %v110_v14 = vld [vmem:[%s9154_s1 + $0x288] sm:$0xff]  ;;  %v109_v16 = vld [vmem:[%s9154_s1 + $0x280] sm:$0xff] }
 0x110   :  { %1462 = vmatprep.subr.mxu1 %v612_v39  ;;  %1479 = vmatprep.subr.mxu0 %v206_v40  ;;  %v518_v15 = vld [vmem:[%s9154_s1 + $0xf48] sm:$0xff]  ;;  %v517_v17 = vld [vmem:[%s9154_s1 + $0xf40] sm:$0xff] }
 0x111   :  { %1463 = vmatpush2.msra.mxu1 %v611_v41  ;;  %1480 = vmatpush1.msra.mxu0 %v205_v21  ;;  %v98_v19 = vld [vmem:[%s9154_s1 + $0x228] sm:$0xff]  ;;  %v97_v1 = vld [vmem:[%s9154_s1 + $0x220] sm:$0xff] }
 0x112   :  { %1464 = vmatprep.mubr.f32.mxu1 %v6698_v5  ;;  %1481 = vmatprep.subr.mxu0 %v194_v42  ;;  %v589_v5 = vld [vmem:[%s9154_s1 + $0x1180] sm:$0xff]  ;;  %v506_v63 = vld [vmem:[%s9154_s1 + $0xee8] sm:$0xff] }
 0x113   :  { %1554 = vmatprep.subr.mxu1 %v602_v25  ;;  %1465 = vmatmul.mubr.f32.vlgmr.msra.gmra.mxu1 %v6716_v26  ;;  %v169_v26 = vld [vmem:[%s9154_s1 + $0x460] sm:$0xff]  ;;  %v86_v22 = vld [vmem:[%s9154_s1 + $0x1c8] sm:$0xff] }
 0x114   :  { %1482 = vmatpush1.msra.mxu0 %v193_v43  ;;  %1555 = vmatpush1.msra.mxu1 %v601_v44  ;;  %v505_v2 = vld [vmem:[%s9154_s1 + $0xee0] sm:$0xff]  ;;  %v494_v23 = vld [vmem:[%s9154_s1 + $0xe88] sm:$0xff] }
 0x115   :  { %1483 = vmatprep.subr.mxu0 %v182_v45  ;;  %1556 = vmatprep.subr.mxu1 %v590_v46  ;;  %v85_v27 = vld [vmem:[%s9154_s1 + $0x1c0] sm:$0xff]  ;;  %v74_v29 = vld [vmem:[%s9154_s1 + $0x168] sm:$0xff] }
 0x116   :  { %1484 = vmatpush1.msra.mxu0 %v181_v47  ;;  %1557 = vmatpush1.msra.mxu1 %v589_v5  ;;  %v493_v28 = vld [vmem:[%s9154_s1 + $0xe80] sm:$0xff]  ;;  %v482_v30 = vld [vmem:[%s9154_s1 + $0xe28] sm:$0xff] }
 0x117   :  { %1485 = vmatprep.subr.mxu0 %v170_v48  ;;  %1558 = vmatprep.subr.mxu1 %v578_v49  ;;  %v73_v60 = vld [vmem:[%s9154_s1 + $0x160] sm:$0xff]  ;;  %v62_v32 = vld [vmem:[%s9154_s1 + $0x108] sm:$0xff] }
 0x118   :  { %1486 = vmatpush1.msra.mxu0 %v169_v26  ;;  %1559 = vmatpush1.msra.mxu1 %v577_v50  ;;  %v481_v31 = vld [vmem:[%s9154_s1 + $0xe20] sm:$0xff]  ;;  %v470_v6 = vld [vmem:[%s9154_s1 + $0xdc8] sm:$0xff] }
 0x119   :  { %1487 = vmatprep.subr.mxu0 %v158_v51  ;;  %1560 = vmatprep.subr.mxu1 %v566_v52  ;;  %v61_v33 = vld [vmem:[%s9154_s1 + $0x100] sm:$0xff]  ;;  %v50_v35 = vld [vmem:[%s9154_s1 + $0xa8] sm:$0xff] }
 0x11a   :  { %1488 = vmatpush1.msra.mxu0 %v157_v53  ;;  %1561 = vmatpush1.msra.mxu1 %v565_v54  ;;  %v469_v0 = vld [vmem:[%s9154_s1 + $0xdc0] sm:$0xff]  ;;  %v458_v36 = vld [vmem:[%s9154_s1 + $0xd68] sm:$0xff] }
 0x11b   :  { %1489 = vmatprep.subr.mxu0 %v146_v56  ;;  %1562 = vmatprep.subr.mxu1 %v554_v57  ;;  %v49_v9 = vld [vmem:[%s9154_s1 + $0xa0] sm:$0xff]  ;;  %v38_v38 = vld [vmem:[%s9154_s1 + $0x48] sm:$0xff] }
 0x11c   :  { %1490 = vmatpush1.msra.mxu0 %v145_v58  ;;  %1563 = vmatpush1.msra.mxu1 %v553_v59  ;;  %v457_v37 = vld [vmem:[%s9154_s1 + $0xd60] sm:$0xff]  ;;  %v446_v39 = vld [vmem:[%s9154_s1 + $0xd08] sm:$0xff] }
 0x11d   :  { %1491 = vmatprep.subr.mxu0 %v134_v61  ;;  %1564 = vmatprep.subr.mxu1 %v542_v62  ;;  %v37_v40 = vld [vmem:[%s9154_s1 + $0x40] sm:$0xff]  ;;  %v410_v21 = vld [vmem:[%s9154_s1 + $0xbe8] sm:$0xff] }
 0x11e   :  { %1492 = vmatpush1.msra.mxu0 %v133_v3  ;;  %1565 = vmatpush1.msra.mxu1 %v541_v4  ;;  %v445_v41 = vld [vmem:[%s9154_s1 + $0xd00] sm:$0xff]  ;;  %v434_v42 = vld [vmem:[%s9154_s1 + $0xca8] sm:$0xff] }
 0x11f   :  { %1493 = vmatprep.subr.mxu0 %v122_v8  ;;  %1566 = vmatprep.subr.mxu1 %v530_v10  ;;  %v409_v25 = vld [vmem:[%s9154_s1 + $0xbe0] sm:$0xff]  ;;  %v398_v44 = vld [vmem:[%s9154_s1 + $0xb88] sm:$0xff] }
 0x120   :  { %1494 = vmatpush1.msra.mxu0 %v121_v12  ;;  %1567 = vmatpush1.msra.mxu1 %v529_v13  ;;  %v433_v43 = vld [vmem:[%s9154_s1 + $0xca0] sm:$0xff]  ;;  %v422_v45 = vld [vmem:[%s9154_s1 + $0xc48] sm:$0xff] }
 0x121   :  { %1495 = vmatprep.subr.mxu0 %v110_v14  ;;  %1568 = vmatprep.subr.mxu1 %v518_v15  ;;  %v397_v46 = vld [vmem:[%s9154_s1 + $0xb80] sm:$0xff]  ;;  %v386_v5 = vld [vmem:[%s9154_s1 + $0xb28] sm:$0xff] }
 0x122   :  { %1496 = vmatpush1.msra.mxu0 %v109_v16  ;;  %1569 = vmatpush1.msra.mxu1 %v517_v17  ;;  %v421_v47 = vld [vmem:[%s9154_s1 + $0xc40] sm:$0xff]  ;;  %v794_v48 = vld [vmem:[%s9154_s1 + $0x17e8] sm:$0xff] }
 0x123   :  { %1497 = vmatprep.subr.mxu0 %v98_v19  ;;  %1570 = vmatprep.subr.mxu1 %v506_v63  ;;  %v385_v49 = vld [vmem:[%s9154_s1 + $0xb20] sm:$0xff]  ;;  %v374_v50 = vld [vmem:[%s9154_s1 + $0xac8] sm:$0xff] }
 0x124   :  { %1498 = vmatpush1.msra.mxu0 %v97_v1  ;;  %1571 = vmatpush1.msra.mxu1 %v505_v2  ;;  %v793_v26 = vld [vmem:[%s9154_s1 + $0x17e0] sm:$0xff]  ;;  %v782_v51 = vld [vmem:[%s9154_s1 + $0x1788] sm:$0xff] }
 0x125   :  { %1499 = vmatprep.subr.mxu0 %v86_v22  ;;  %1572 = vmatprep.subr.mxu1 %v494_v23  ;;  %v373_v52 = vld [vmem:[%s9154_s1 + $0xac0] sm:$0xff]  ;;  %v362_v54 = vld [vmem:[%s9154_s1 + $0xa68] sm:$0xff] }
 0x126   :  { %1500 = vmatpush1.msra.mxu0 %v85_v27  ;;  %1573 = vmatpush1.msra.mxu1 %v493_v28  ;;  %v781_v53 = vld [vmem:[%s9154_s1 + $0x1780] sm:$0xff]  ;;  %v770_v56 = vld [vmem:[%s9154_s1 + $0x1728] sm:$0xff] }
 0x127   :  { %1501 = vmatprep.subr.mxu0 %v74_v29  ;;  %1574 = vmatprep.subr.mxu1 %v482_v30  ;;  %v361_v57 = vld [vmem:[%s9154_s1 + $0xa60] sm:$0xff]  ;;  %v350_v59 = vld [vmem:[%s9154_s1 + $0xa08] sm:$0xff] }
 0x128   :  { %1502 = vmatpush1.msra.mxu0 %v73_v60  ;;  %1575 = vmatpush1.msra.mxu1 %v481_v31  ;;  %v769_v58 = vld [vmem:[%s9154_s1 + $0x1720] sm:$0xff]  ;;  %v758_v61 = vld [vmem:[%s9154_s1 + $0x16c8] sm:$0xff]  ;;  %v7432_v60 = vsub.s32 2, %v6996_v55 }
 0x129   :  { %1503 = vmatprep.subr.mxu0 %v62_v32  ;;  %1576 = vmatprep.subr.mxu1 %v470_v6  ;;  %v349_v62 = vld [vmem:[%s9154_s1 + $0xa00] sm:$0xff]  ;;  %v338_v4 = vld [vmem:[%s9154_s1 + $0x9a8] sm:$0xff] }
 0x12a   :  { %1504 = vmatpush1.msra.mxu0 %v61_v33  ;;  %1577 = vmatpush1.msra.mxu1 %v469_v0  ;;  %v757_v3 = vld [vmem:[%s9154_s1 + $0x16c0] sm:$0xff]  ;;  %v746_v8 = vld [vmem:[%s9154_s1 + $0x1668] sm:$0xff] }
 0x12b   :  { %1505 = vmatprep.subr.mxu0 %v50_v35  ;;  %1578 = vmatprep.subr.mxu1 %v458_v36  ;;  %v337_v10 = vld [vmem:[%s9154_s1 + $0x9a0] sm:$0xff]  ;;  %v326_v13 = vld [vmem:[%s9154_s1 + $0x948] sm:$0xff]  ;;  %v7447_v35 = vsub.s32 3, %v6996_v55 }
 0x12c   :  { %1506 = vmatpush1.msra.mxu0 %v49_v9  ;;  %1579 = vmatpush1.msra.mxu1 %v457_v37  ;;  %v745_v12 = vld [vmem:[%s9154_s1 + $0x1660] sm:$0xff]  ;;  %v734_v14 = vld [vmem:[%s9154_s1 + $0x1608] sm:$0xff] }
 0x12d   :  { %1507 = vmatprep.subr.mxu0 %v38_v38  ;;  %1580 = vmatprep.subr.mxu1 %v446_v39  ;;  %v325_v15 = vld [vmem:[%s9154_s1 + $0x940] sm:$0xff]  ;;  %v314_v17 = vld [vmem:[%s9154_s1 + $0x8e8] sm:$0xff] }
 0x12e   :  { %1508 = vmatpush1.msra.mxu0 %v37_v40  ;;  %1581 = vmatpush1.msra.mxu1 %v445_v41  ;;  %v733_v16 = vld [vmem:[%s9154_s1 + $0x1600] sm:$0xff]  ;;  %v722_v19 = vld [vmem:[%s9154_s1 + $0x15a8] sm:$0xff]  ;;  %v7466_v41 = vrot.slane %v7034_v11, %v7432_v60 }
 0x12f   :  { %1509 = vmatprep.subr.mxu0 %v410_v21  ;;  %1582 = vmatprep.subr.mxu1 %v434_v42  ;;  %v313_v63 = vld [vmem:[%s9154_s1 + $0x8e0] sm:$0xff]  ;;  %v302_v2 = vld [vmem:[%s9154_s1 + $0x888] sm:$0xff] }
 0x130   :  { %1510 = vmatpush2.msra.mxu0 %v409_v25  ;;  %1583 = vmatpush1.msra.mxu1 %v433_v43  ;;  %v721_v1 = vld [vmem:[%s9154_s1 + $0x15a0] sm:$0xff]  ;;  %v710_v22 = vld [vmem:[%s9154_s1 + $0x1548] sm:$0xff] }
 0x131   :  { %1511 = vmatprep.subr.mxu0 %v398_v44  ;;  %1584 = vmatprep.subr.mxu1 %v422_v45  ;;  %v301_v23 = vld [vmem:[%s9154_s1 + $0x880] sm:$0xff]  ;;  %v290_v28 = vld [vmem:[%s9154_s1 + $0x828] sm:$0xff]  ;;  %v7484_v45 = vrot.slane %v7034_v11, %v7447_v35 }
 0x132   :  { %1512 = vmatpush2.msra.mxu0 %v397_v46  ;;  %1585 = vmatpush1.msra.mxu1 %v421_v47  ;;  %v709_v27 = vld [vmem:[%s9154_s1 + $0x1540] sm:$0xff]  ;;  %v698_v29 = vld [vmem:[%s9154_s1 + $0x14e8] sm:$0xff] }
 0x133   :  { %1513 = vmatprep.subr.mxu0 %v386_v5  ;;  %1586 = vmatprep.subr.mxu1 %v794_v48  ;;  %v289_v31 = vld [vmem:[%s9154_s1 + $0x820] sm:$0xff]  ;;  %v278_v6 = vld [vmem:[%s9154_s1 + $0x7c8] sm:$0xff] }
 0x134   :  { %1514 = vmatpush2.msra.mxu0 %v385_v49  ;;  %1587 = vmatpush2.msra.mxu1 %v793_v26  ;;  %v697_v32 = vld [vmem:[%s9154_s1 + $0x14e0] sm:$0xff]  ;;  %v686_v33 = vld [vmem:[%s9154_s1 + $0x1488] sm:$0xff] }
 0x135   :  { %1515 = vmatprep.subr.mxu0 %v374_v50  ;;  %1588 = vmatprep.subr.mxu1 %v782_v51  ;;  %v277_v36 = vld [vmem:[%s9154_s1 + $0x7c0] sm:$0xff]  ;;  %v266_v39 = vld [vmem:[%s9154_s1 + $0x768] sm:$0xff] }
 0x136   :  { %1516 = vmatpush2.msra.mxu0 %v373_v52  ;;  %1589 = vmatpush2.msra.mxu1 %v781_v53  ;;  %v685_v9 = vld [vmem:[%s9154_s1 + $0x1480] sm:$0xff]  ;;  %v674_v40 = vld [vmem:[%s9154_s1 + $0x1428] sm:$0xff] }
 0x137   :  { %1517 = vmatprep.subr.mxu0 %v362_v54  ;;  %1590 = vmatprep.subr.mxu1 %v770_v56  ;;  %v673_v21 = vld [vmem:[%s9154_s1 + $0x1420] sm:$0xff]  ;;  %v254_v25 = vld [vmem:[%s9154_s1 + $0x708] sm:$0xff] }
 0x138   :  { %1518 = vmatpush2.msra.mxu0 %v361_v57  ;;  %1591 = vmatpush2.msra.mxu1 %v769_v58  ;;  %v662_v43 = vld [vmem:[%s9154_s1 + $0x13c8] sm:$0xff]  ;;  %v253_v46 = vld [vmem:[%s9154_s1 + $0x700] sm:$0xff] }
 0x139   :  { %1519 = vmatprep.subr.mxu0 %v350_v59  ;;  %1592 = vmatprep.subr.mxu1 %v758_v61  ;;  %v661_v47 = vld [vmem:[%s9154_s1 + $0x13c0] sm:$0xff]  ;;  %v242_v48 = vld [vmem:[%s9154_s1 + $0x6a8] sm:$0xff] }
 0x13a   :  { %1520 = vmatpush2.msra.mxu0 %v349_v62  ;;  %1593 = vmatpush2.msra.mxu1 %v757_v3  ;;  %v650_v49 = vld [vmem:[%s9154_s1 + $0x1368] sm:$0xff]  ;;  %v241_v51 = vld [vmem:[%s9154_s1 + $0x6a0] sm:$0xff] }
 0x13b   :  { %1521 = vmatprep.subr.mxu0 %v338_v4  ;;  %1594 = vmatprep.subr.mxu1 %v746_v8  ;;  %v649_v52 = vld [vmem:[%s9154_s1 + $0x1360] sm:$0xff]  ;;  %v7511_v56 = vld [vmem:[%s9153_s0 + $0x28] sm:$0xff] }
 0x13c   :  { %1522 = vmatpush2.msra.mxu0 %v337_v10  ;;  %1595 = vmatpush2.msra.mxu1 %v745_v12  ;;  %v230_v57 = vld [vmem:[%s9154_s1 + $0x648] sm:$0xff]  ;;  %v7523_v61 = vld [vmem:[%s9153_s0 + $0x20] sm:$0xff]  ;;  %v220_v10 = vld [vmem:[%s9154_s1 + $0x5f8] sm:$0xff] }
 0x13d   :  { %1523 = vmatprep.subr.mxu0 %v326_v13  ;;  %1596 = vmatprep.subr.mxu1 %v734_v14  ;;  %v638_v58 = vld [vmem:[%s9154_s1 + $0x1308] sm:$0xff]  ;;  %v229_v62 = vld [vmem:[%s9154_s1 + $0x640] sm:$0xff]  ;;  %v7543_v12 = vld [vmem:[%s9153_s0 + $0x38] sm:$0xff] }
 0x13e   :  { %1524 = vmatpush2.msra.mxu0 %v325_v15  ;;  %1597 = vmatpush2.msra.mxu1 %v733_v16  ;;  %v637_v3 = vld [vmem:[%s9154_s1 + $0x1300] sm:$0xff]  ;;  %v626_v8 = vld [vmem:[%s9154_s1 + $0x12a8] sm:$0xff]  ;;  %v219_v15 = vld [vmem:[%s9154_s1 + $0x5f0] sm:$0xff] }
 0x13f   :  { %1525 = vmatprep.subr.mxu0 %v314_v17  ;;  %1598 = vmatprep.subr.mxu1 %v722_v19  ;;  %v7549_v13 = vld [vmem:[%s9153_s0 + $0x8] sm:$0xff]  ;;  %v625_v14 = vld [vmem:[%s9154_s1 + $0x12a0] sm:$0xff]  ;;  %v208_v17 = vld [vmem:[%s9154_s1 + $0x598] sm:$0xff] }
 0x140   :  { %1526 = vmatpush2.msra.mxu0 %v313_v63  ;;  %1599 = vmatpush2.msra.mxu1 %v721_v1  ;;  %v7429_v30 = vpop.f32.mrf.mxu0  ;;  %v614_v16 = vld [vmem:[%s9154_s1 + $0x1248] sm:$0xff]  ;;  %v7567_v19 = vld [vmem:[%s9153_s0 + $0x30] sm:$0xff]  ;;  %v7573_v63 = vld [vmem:[%s9153_s0] sm:$0xff] }
 0x141   :  { %1527 = vmatprep.subr.mxu0 %v302_v2  ;;  %1600 = vmatprep.subr.mxu1 %v710_v22  ;;  %v613_v1 = vld [vmem:[%s9154_s1 + $0x1240] sm:$0xff]  ;;  %v207_v2 = vld [vmem:[%s9154_s1 + $0x590] sm:$0xff]  ;;  %v196_v22 = vld [vmem:[%s9154_s1 + $0x538] sm:$0xff] }
 0x142   :  { %1528 = vmatpush2.msra.mxu0 %v301_v23  ;;  %1601 = vmatpush2.msra.mxu1 %v709_v27  ;;  %v935_v0 = vpop.f32.mrf.mxu0  ;;  %v604_v23 = vld [vmem:[%s9154_s1 + $0x11f8] sm:$0xff]  ;;  %v195_v27 = vld [vmem:[%s9154_s1 + $0x530] sm:$0xff] }
 0x143   :  { %1529 = vmatprep.subr.mxu0 %v290_v28  ;;  %1602 = vmatprep.subr.mxu1 %v698_v29  ;;  %v936_v37 = vadd.f32 %v935_v0, %v7056_v18  ;;  %v7456_v38 = vpop.f32.mrf.mxu1  ;;  %v265_v18 = vld [vmem:[%s9154_s1 + $0x760] sm:$0xff]  ;;  %v603_v28 = vld [vmem:[%s9154_s1 + $0x11f0] sm:$0xff]  ;;  %v7597_v29 = vld [vmem:[%s9153_s0 + $0x18] sm:$0xff] }
 0x144   :  { %1530 = vmatpush2.msra.mxu0 %v289_v31  ;;  %1603 = vmatpush2.msra.mxu1 %v697_v32  ;;  %v184_v31 = vld [vmem:[%s9154_s1 + $0x4d8] sm:$0xff]  ;;  %v591_v0 = vld [vmem:[%s9154_s1 + $0x1190] sm:$0xff] }
 0x145   :  { %1531 = vmatprep.subr.mxu0 %v278_v6  ;;  %1604 = vmatprep.subr.mxu1 %v686_v33  ;;  %v1012_v42 = vpop.f32.mrf.mxu1  ;;  %v592_v32 = vld [vmem:[%s9154_s1 + $0x1198] sm:$0xff]  ;;  %v7609_v6 = vld [vmem:[%s9153_s0 + $0x10] sm:$0xff] }
 0x146   :  { %1532 = vmatpush2.msra.mxu0 %v277_v36  ;;  %1605 = vmatpush2.msra.mxu1 %v685_v9  ;;  %v7480_v44 = vadd.f32 %v1012_v42, %v936_v37  ;;  %v183_v33 = vld [vmem:[%s9154_s1 + $0x4d0] sm:$0xff]  ;;  %v172_v36 = vld [vmem:[%s9154_s1 + $0x478] sm:$0xff] }
 0x147   :  { %1533 = vmatprep.subr.mxu0 %v266_v39  ;;  %1606 = vmatprep.subr.mxu1 %v674_v40  ;;  %v1081_v5 = vpop.f32.mrf.mxu0  ;;  %v580_v9 = vld [vmem:[%s9154_s1 + $0x1138] sm:$0xff]  ;;  %v171_v37 = vld [vmem:[%s9154_s1 + $0x470] sm:$0xff] }
 0x148   :  { %1534 = vmatpush2.msra.mxu0 %v265_v18  ;;  %1607 = vmatpush2.msra.mxu1 %v673_v21  ;;  %v1082_v11 = vadd.f32 %v1081_v5, %v7466_v41  ;;  %v579_v39 = vld [vmem:[%s9154_s1 + $0x1130] sm:$0xff]  ;;  %v160_v40 = vld [vmem:[%s9154_s1 + $0x418] sm:$0xff] }
 0x149   :  { %1535 = vmatprep.subr.mxu0 %v254_v25  ;;  %1608 = vmatprep.subr.mxu1 %v662_v43  ;;  %v1158_v26 = vpop.f32.mrf.mxu1  ;;  %v1083_v50 = vpop.f32.mrf.mxu0  ;;  %v568_v18 = vld [vmem:[%s9154_s1 + $0x10d8] sm:$0xff]  ;;  %v159_v21 = vld [vmem:[%s9154_s1 + $0x410] sm:$0xff] }
 0x14a   :  { %1536 = vmatpush2.msra.mxu0 %v253_v46  ;;  %1609 = vmatpush2.msra.mxu1 %v661_v47  ;;  %v7505_v53 = vadd.f32 %v1158_v26, %v1082_v11  ;;  %v1084_v54 = vadd.f32 %v1083_v50, %v7484_v45  ;;  %v567_v42 = vld [vmem:[%s9154_s1 + $0x10d0] sm:$0xff]  ;;  %v148_v25 = vld [vmem:[%s9154_s1 + $0x3b8] sm:$0xff] }
 0x14b   :  { %1393 = vmatprep.mubr.f32.mxu0 %v7511_v56  ;;  %1537 = vmatprep.subr.mxu0 %v242_v48  ;;  %v1160_v59 = vpop.f32.mrf.mxu1  ;;  %v556_v43 = vld [vmem:[%s9154_s1 + $0x1078] sm:$0xff]  ;;  %v147_v46 = vld [vmem:[%s9154_s1 + $0x3b0] sm:$0xff] }
 0x14c   :  { %1610 = vmatprep.subr.mxu1 %v650_v49  ;;  %1394 = vmatmul.mubr.f32.gmra.mxu0 %v7523_v61  ;;  %v7532_v4 = vadd.f32 %v1160_v59, %v1084_v54  ;;  %v555_v47 = vld [vmem:[%s9154_s1 + $0x1070] sm:$0xff]  ;;  %v136_v5 = vld [vmem:[%s9154_s1 + $0x358] sm:$0xff] }
 0x14d   :  { %1538 = vmatpush2.msra.mxu0 %v241_v51  ;;  %1611 = vmatpush2.msra.mxu1 %v649_v52  ;;  %v544_v48 = vld [vmem:[%s9154_s1 + $0x1018] sm:$0xff]  ;;  %v135_v11 = vld [vmem:[%s9154_s1 + $0x350] sm:$0xff] }
 0x14e   :  { %1539 = vmatprep.subr.mxu0 %v230_v57  ;;  %1612 = vmatprep.subr.mxu1 %v638_v58  ;;  %v543_v49 = vld [vmem:[%s9154_s1 + $0x1010] sm:$0xff]  ;;  %v124_v26 = vld [vmem:[%s9154_s1 + $0x2f8] sm:$0xff] }
 0x14f   :  { %1540 = vmatpush2.msra.mxu0 %v229_v62  ;;  %1613 = vmatpush2.msra.mxu1 %v637_v3  ;;  %v532_v50 = vld [vmem:[%s9154_s1 + $0xfb8] sm:$0xff]  ;;  %v123_v51 = vld [vmem:[%s9154_s1 + $0x2f0] sm:$0xff] }
 0x150   :  { %1470 = vmatprep.mubr.f32.mxu1 %v7543_v12  ;;  %1541 = vmatprep.mubr.f32.mxu0 %v7549_v13  ;;  %v531_v52 = vld [vmem:[%s9154_s1 + $0xfb0] sm:$0xff]  ;;  %v112_v54 = vld [vmem:[%s9154_s1 + $0x298] sm:$0xff] }
 0x151   :  { %1614 = vmatprep.subr.mxu1 %v626_v8  ;;  %1631 = vmatprep.subr.mxu0 %v220_v10  ;;  %v520_v57 = vld [vmem:[%s9154_s1 + $0xf58] sm:$0xff]  ;;  %v111_v58 = vld [vmem:[%s9154_s1 + $0x290] sm:$0xff] }
 0x152   :  { %1471 = vmatmul.mubr.f32.gmra.mxu1 %v7567_v19  ;;  %1542 = vmatmul.mubr.f32.vlgmr.msra.gmra.mxu0 %v7573_v63  ;;  %v519_v59 = vld [vmem:[%s9154_s1 + $0xf50] sm:$0xff]  ;;  %v100_v62 = vld [vmem:[%s9154_s1 + $0x238] sm:$0xff] }
 0x153   :  { %1615 = vmatpush2.msra.mxu1 %v625_v14  ;;  %1632 = vmatpush1.msra.mxu0 %v219_v15  ;;  %v508_v3 = vld [vmem:[%s9154_s1 + $0xef8] sm:$0xff]  ;;  %v99_v8 = vld [vmem:[%s9154_s1 + $0x230] sm:$0xff] }
 0x154   :  { %1616 = vmatprep.subr.mxu1 %v614_v16  ;;  %1633 = vmatprep.subr.mxu0 %v208_v17  ;;  %v507_v10 = vld [vmem:[%s9154_s1 + $0xef0] sm:$0xff]  ;;  %v88_v14 = vld [vmem:[%s9154_s1 + $0x1d8] sm:$0xff] }
 0x155   :  { %1617 = vmatpush2.msra.mxu1 %v613_v1  ;;  %1634 = vmatpush1.msra.mxu0 %v207_v2  ;;  %v496_v15 = vld [vmem:[%s9154_s1 + $0xe98] sm:$0xff]  ;;  %v87_v16 = vld [vmem:[%s9154_s1 + $0x1d0] sm:$0xff] }
 0x156   :  { %1618 = vmatprep.mubr.f32.mxu1 %v7597_v29  ;;  %1635 = vmatprep.subr.mxu0 %v196_v22  ;;  %v495_v17 = vld [vmem:[%s9154_s1 + $0xe90] sm:$0xff]  ;;  %v76_v1 = vld [vmem:[%s9154_s1 + $0x178] sm:$0xff] }
 0x157   :  { %1708 = vmatprep.subr.mxu1 %v604_v23  ;;  %1619 = vmatmul.mubr.f32.vlgmr.msra.gmra.mxu1 %v7609_v6  ;;  %v484_v2 = vld [vmem:[%s9154_s1 + $0xe38] sm:$0xff]  ;;  %v75_v22 = vld [vmem:[%s9154_s1 + $0x170] sm:$0xff] }
 0x158   :  { %1636 = vmatpush1.msra.mxu0 %v195_v27  ;;  %1709 = vmatpush1.msra.mxu1 %v603_v28  ;;  %v483_v23 = vld [vmem:[%s9154_s1 + $0xe30] sm:$0xff]  ;;  %v64_v27 = vld [vmem:[%s9154_s1 + $0x118] sm:$0xff] }
 0x159   :  { %1637 = vmatprep.subr.mxu0 %v184_v31  ;;  %1710 = vmatprep.subr.mxu1 %v592_v32  ;;  %v472_v28 = vld [vmem:[%s9154_s1 + $0xdd8] sm:$0xff]  ;;  %v63_v31 = vld [vmem:[%s9154_s1 + $0x110] sm:$0xff] }
 0x15a   :  { %1638 = vmatpush1.msra.mxu0 %v183_v33  ;;  %1711 = vmatpush1.msra.mxu1 %v591_v0  ;;  %v471_v32 = vld [vmem:[%s9154_s1 + $0xdd0] sm:$0xff]  ;;  %v52_v33 = vld [vmem:[%s9154_s1 + $0xb8] sm:$0xff] }
 0x15b   :  { %1639 = vmatprep.subr.mxu0 %v172_v36  ;;  %1712 = vmatprep.subr.mxu1 %v580_v9  ;;  %v460_v0 = vld [vmem:[%s9154_s1 + $0xd78] sm:$0xff]  ;;  %v51_v36 = vld [vmem:[%s9154_s1 + $0xb0] sm:$0xff] }
 0x15c   :  { %1640 = vmatpush1.msra.mxu0 %v171_v37  ;;  %1713 = vmatpush1.msra.mxu1 %v579_v39  ;;  %v459_v9 = vld [vmem:[%s9154_s1 + $0xd70] sm:$0xff]  ;;  %v40_v37 = vld [vmem:[%s9154_s1 + $0x58] sm:$0xff] }
 0x15d   :  { %1641 = vmatprep.subr.mxu0 %v160_v40  ;;  %1714 = vmatprep.subr.mxu1 %v568_v18  ;;  %v448_v39 = vld [vmem:[%s9154_s1 + $0xd18] sm:$0xff]  ;;  %v39_v40 = vld [vmem:[%s9154_s1 + $0x50] sm:$0xff] }
 0x15e   :  { %1642 = vmatpush1.msra.mxu0 %v159_v21  ;;  %1715 = vmatpush1.msra.mxu1 %v567_v42  ;;  %v447_v18 = vld [vmem:[%s9154_s1 + $0xd10] sm:$0xff]  ;;  %v412_v21 = vld [vmem:[%s9154_s1 + $0xbf8] sm:$0xff] }
 0x15f   :  { %1643 = vmatprep.subr.mxu0 %v148_v25  ;;  %1716 = vmatprep.subr.mxu1 %v556_v43  ;;  %v436_v42 = vld [vmem:[%s9154_s1 + $0xcb8] sm:$0xff]  ;;  %v411_v25 = vld [vmem:[%s9154_s1 + $0xbf0] sm:$0xff] }
 0x160   :  { %1644 = vmatpush1.msra.mxu0 %v147_v46  ;;  %1717 = vmatpush1.msra.mxu1 %v555_v47  ;;  %v435_v43 = vld [vmem:[%s9154_s1 + $0xcb0] sm:$0xff]  ;;  %v400_v46 = vld [vmem:[%s9154_s1 + $0xb98] sm:$0xff] }
 0x161   :  { %1645 = vmatprep.subr.mxu0 %v136_v5  ;;  %1718 = vmatprep.subr.mxu1 %v544_v48  ;;  %v424_v47 = vld [vmem:[%s9154_s1 + $0xc58] sm:$0xff]  ;;  %v399_v5 = vld [vmem:[%s9154_s1 + $0xb90] sm:$0xff] }
 0x162   :  { %1646 = vmatpush1.msra.mxu0 %v135_v11  ;;  %1719 = vmatpush1.msra.mxu1 %v543_v49  ;;  %v423_v48 = vld [vmem:[%s9154_s1 + $0xc50] sm:$0xff]  ;;  %v388_v11 = vld [vmem:[%s9154_s1 + $0xb38] sm:$0xff] }
 0x163   :  { %1647 = vmatprep.subr.mxu0 %v124_v26  ;;  %1720 = vmatprep.subr.mxu1 %v532_v50  ;;  %v796_v49 = vld [vmem:[%s9154_s1 + $0x17f8] sm:$0xff]  ;;  %v387_v26 = vld [vmem:[%s9154_s1 + $0xb30] sm:$0xff] }
 0x164   :  { %1648 = vmatpush1.msra.mxu0 %v123_v51  ;;  %1721 = vmatpush1.msra.mxu1 %v531_v52  ;;  %v795_v50 = vld [vmem:[%s9154_s1 + $0x17f0] sm:$0xff]  ;;  %v376_v51 = vld [vmem:[%s9154_s1 + $0xad8] sm:$0xff] }
 0x165   :  { %1649 = vmatprep.subr.mxu0 %v112_v54  ;;  %1722 = vmatprep.subr.mxu1 %v520_v57  ;;  %v784_v52 = vld [vmem:[%s9154_s1 + $0x1798] sm:$0xff]  ;;  %v375_v54 = vld [vmem:[%s9154_s1 + $0xad0] sm:$0xff] }
 0x166   :  { %1650 = vmatpush1.msra.mxu0 %v111_v58  ;;  %1723 = vmatpush1.msra.mxu1 %v519_v59  ;;  %v783_v57 = vld [vmem:[%s9154_s1 + $0x1790] sm:$0xff]  ;;  %v364_v58 = vld [vmem:[%s9154_s1 + $0xa78] sm:$0xff] }
 0x167   :  { %1651 = vmatprep.subr.mxu0 %v100_v62  ;;  %1724 = vmatprep.subr.mxu1 %v508_v3  ;;  %v772_v59 = vld [vmem:[%s9154_s1 + $0x1738] sm:$0xff]  ;;  %v363_v62 = vld [vmem:[%s9154_s1 + $0xa70] sm:$0xff] }
 0x168   :  { %1652 = vmatpush1.msra.mxu0 %v99_v8  ;;  %1725 = vmatpush1.msra.mxu1 %v507_v10  ;;  %v771_v3 = vld [vmem:[%s9154_s1 + $0x1730] sm:$0xff]  ;;  %v352_v8 = vld [vmem:[%s9154_s1 + $0xa18] sm:$0xff] }
 0x169   :  { %1653 = vmatprep.subr.mxu0 %v88_v14  ;;  %1726 = vmatprep.subr.mxu1 %v496_v15  ;;  %v760_v10 = vld [vmem:[%s9154_s1 + $0x16d8] sm:$0xff]  ;;  %v351_v14 = vld [vmem:[%s9154_s1 + $0xa10] sm:$0xff] }
 0x16a   :  { %1654 = vmatpush1.msra.mxu0 %v87_v16  ;;  %1727 = vmatpush1.msra.mxu1 %v495_v17  ;;  %v759_v15 = vld [vmem:[%s9154_s1 + $0x16d0] sm:$0xff]  ;;  %v340_v16 = vld [vmem:[%s9154_s1 + $0x9b8] sm:$0xff] }
 0x16b   :  { %1655 = vmatprep.subr.mxu0 %v76_v1  ;;  %1728 = vmatprep.subr.mxu1 %v484_v2  ;;  %v748_v17 = vld [vmem:[%s9154_s1 + $0x1678] sm:$0xff]  ;;  %v339_v1 = vld [vmem:[%s9154_s1 + $0x9b0] sm:$0xff] }
 0x16c   :  { %1656 = vmatpush1.msra.mxu0 %v75_v22  ;;  %1729 = vmatpush1.msra.mxu1 %v483_v23  ;;  %v747_v2 = vld [vmem:[%s9154_s1 + $0x1670] sm:$0xff]  ;;  %v328_v22 = vld [vmem:[%s9154_s1 + $0x958] sm:$0xff] }
 0x16d   :  { %1657 = vmatprep.subr.mxu0 %v64_v27  ;;  %1730 = vmatprep.subr.mxu1 %v472_v28  ;;  %v736_v23 = vld [vmem:[%s9154_s1 + $0x1618] sm:$0xff]  ;;  %v327_v27 = vld [vmem:[%s9154_s1 + $0x950] sm:$0xff] }
 0x16e   :  { %1658 = vmatpush1.msra.mxu0 %v63_v31  ;;  %1731 = vmatpush1.msra.mxu1 %v471_v32  ;;  %v735_v28 = vld [vmem:[%s9154_s1 + $0x1610] sm:$0xff]  ;;  %v316_v31 = vld [vmem:[%s9154_s1 + $0x8f8] sm:$0xff] }
 0x16f   :  { %1659 = vmatprep.subr.mxu0 %v52_v33  ;;  %1732 = vmatprep.subr.mxu1 %v460_v0  ;;  %v724_v32 = vld [vmem:[%s9154_s1 + $0x15b8] sm:$0xff]  ;;  %v315_v33 = vld [vmem:[%s9154_s1 + $0x8f0] sm:$0xff] }
 0x170   :  { %1660 = vmatpush1.msra.mxu0 %v51_v36  ;;  %1733 = vmatpush1.msra.mxu1 %v459_v9  ;;  %v723_v0 = vld [vmem:[%s9154_s1 + $0x15b0] sm:$0xff]  ;;  %v304_v36 = vld [vmem:[%s9154_s1 + $0x898] sm:$0xff] }
 0x171   :  { %1661 = vmatprep.subr.mxu0 %v40_v37  ;;  %1734 = vmatprep.subr.mxu1 %v448_v39  ;;  %v712_v9 = vld [vmem:[%s9154_s1 + $0x1558] sm:$0xff]  ;;  %v303_v37 = vld [vmem:[%s9154_s1 + $0x890] sm:$0xff] }
 0x172   :  { %1662 = vmatpush1.msra.mxu0 %v39_v40  ;;  %1735 = vmatpush1.msra.mxu1 %v447_v18  ;;  %v711_v39 = vld [vmem:[%s9154_s1 + $0x1550] sm:$0xff]  ;;  %v292_v18 = vld [vmem:[%s9154_s1 + $0x838] sm:$0xff] }
 0x173   :  { %1663 = vmatprep.subr.mxu0 %v412_v21  ;;  %1736 = vmatprep.subr.mxu1 %v436_v42  ;;  %v700_v21 = vld [vmem:[%s9154_s1 + $0x14f8] sm:$0xff] }
 0x174   :  { %1664 = vmatpush2.msra.mxu0 %v411_v25  ;;  %1737 = vmatpush1.msra.mxu1 %v435_v43  ;;  %v291_v25 = vld [vmem:[%s9154_s1 + $0x830] sm:$0xff] }
 0x175   :  { %1665 = vmatprep.subr.mxu0 %v400_v46  ;;  %1738 = vmatprep.subr.mxu1 %v424_v47  ;;  %v699_v43 = vld [vmem:[%s9154_s1 + $0x14f0] sm:$0xff]  ;;  %v280_v47 = vld [vmem:[%s9154_s1 + $0x7d8] sm:$0xff] }
 0x176   :  { %1666 = vmatpush2.msra.mxu0 %v399_v5  ;;  %1739 = vmatpush1.msra.mxu1 %v423_v48  ;;  %v279_v48 = vld [vmem:[%s9154_s1 + $0x7d0] sm:$0xff] }
 0x177   :  { %1667 = vmatprep.subr.mxu0 %v388_v11  ;;  %1740 = vmatprep.subr.mxu1 %v796_v49  ;;  %v687_v11 = vld [vmem:[%s9154_s1 + $0x1490] sm:$0xff] }
 0x178   :  { %1668 = vmatpush2.msra.mxu0 %v387_v26  ;;  %1741 = vmatpush2.msra.mxu1 %v795_v50  ;;  %v823_v26 = vsub.s32 5, %v6996_v55  ;;  %v268_v50 = vld [vmem:[%s9154_s1 + $0x778] sm:$0xff] }
 0x179   :  { %1669 = vmatprep.subr.mxu0 %v376_v51  ;;  %1742 = vmatprep.subr.mxu1 %v784_v52  ;;  %v267_v52 = vld [vmem:[%s9154_s1 + $0x770] sm:$0xff] }
 0x17a   :  { %1670 = vmatpush2.msra.mxu0 %v375_v54  ;;  %1743 = vmatpush2.msra.mxu1 %v783_v57  ;;  %v675_v54 = vld [vmem:[%s9154_s1 + $0x1430] sm:$0xff] }
 0x17b   :  { %1671 = vmatprep.subr.mxu0 %v364_v58  ;;  %1744 = vmatprep.subr.mxu1 %v772_v59  ;;  %v256_v58 = vld [vmem:[%s9154_s1 + $0x718] sm:$0xff] }
 0x17c   :  { %1672 = vmatpush2.msra.mxu0 %v363_v62  ;;  %1745 = vmatpush2.msra.mxu1 %v771_v3  ;;  %v664_v59 = vld [vmem:[%s9154_s1 + $0x13d8] sm:$0xff]  ;;  %v819_v3 = vsub.s32 4, %v6996_v55 }
 0x17d   :  { %1673 = vmatprep.subr.mxu0 %v352_v8  ;;  %1746 = vmatprep.subr.mxu1 %v760_v10  ;;  %v255_v8 = vld [vmem:[%s9154_s1 + $0x710] sm:$0xff]  ;;  %v7938_v10 = vld [vmem:[%s9155_s2] sm:$0xff] }
 0x17e   :  { %1674 = vmatpush2.msra.mxu0 %v351_v14  ;;  %1747 = vmatpush2.msra.mxu1 %v759_v15  ;;  %v824_v14 = vrot.slane %v7938_v10, %v823_v26  ;;  %v663_v15 = vld [vmem:[%s9154_s1 + $0x13d0] sm:$0xff] }
 0x17f   :  { %1675 = vmatprep.subr.mxu0 %v340_v16  ;;  %1748 = vmatprep.subr.mxu1 %v748_v17 }
 0x180   :  { %1676 = vmatpush2.msra.mxu0 %v339_v1  ;;  %1749 = vmatpush2.msra.mxu1 %v747_v2  ;;  %v244_v1 = vld [vmem:[%s9154_s1 + $0x6b8] sm:$0xff] }
 0x181   :  { %1677 = vmatprep.subr.mxu0 %v328_v22  ;;  %1750 = vmatprep.subr.mxu1 %v736_v23  ;;  %v652_v2 = vld [vmem:[%s9154_s1 + $0x1378] sm:$0xff]  ;;  %v243_v22 = vld [vmem:[%s9154_s1 + $0x6b0] sm:$0xff] }
 0x182   :  { %1678 = vmatpush2.msra.mxu0 %v327_v27  ;;  %1751 = vmatpush2.msra.mxu1 %v735_v28  ;;  %v651_v23 = vld [vmem:[%s9154_s1 + $0x1370] sm:$0xff]  ;;  %v820_v27 = vrot.slane %v7938_v10, %v819_v3  ;;  %v798_v3 = vld [vmem:[%s9155_s2 + $0x8] sm:$0xf]  ;;  %s5444_s2 = smov 64  }
 0x183   :  { %1679 = vmatprep.subr.mxu0 %v316_v31  ;;  %1752 = vmatprep.subr.mxu1 %v724_v32  ;;  %v1087_v40 = vpop.f32.mrf.mxu0  ;;  %v7959_v31 = vsub.s32 0, %v6996_v55  ;;  %v232_v32 = vld [vmem:[%s9154_s1 + $0x658] sm:$0xff] }
 0x184   :  { %1680 = vmatpush2.msra.mxu0 %v315_v33  ;;  %1753 = vmatpush2.msra.mxu1 %v723_v0  ;;  %v1088_v42 = vadd.f32 %v1087_v40, %v7466_v41  ;;  %v688_v41 = vld [vmem:[%s9154_s1 + $0x1498] sm:$0xff] }
 0x185   :  { %1681 = vmatprep.subr.mxu0 %v304_v36  ;;  %1754 = vmatprep.subr.mxu1 %v712_v9  ;;  %v1089_v46 = vpop.f32.mrf.mxu0  ;;  %v640_v33 = vld [vmem:[%s9154_s1 + $0x1318] sm:$0xff]  ;;  %v231_v36 = vld [vmem:[%s9154_s1 + $0x650] sm:$0xff] }
 0x186   :  { %1682 = vmatpush2.msra.mxu0 %v303_v37  ;;  %1755 = vmatpush2.msra.mxu1 %v711_v39  ;;  %v1090_v5 = vadd.f32 %v1089_v46, %v7484_v45  ;;  %v1164_v49 = vpop.f32.mrf.mxu1  ;;  %v676_v45 = vld [vmem:[%s9154_s1 + $0x1438] sm:$0xff]  ;;  %v639_v37 = vld [vmem:[%s9154_s1 + $0x1310] sm:$0xff] }
 0x187   :  { %1683 = vmatprep.subr.mxu0 %v292_v18  ;;  %1756 = vmatprep.subr.mxu1 %v700_v21  ;;  %v7915_v51 = vadd.f32 %v1164_v49, %v1088_v42  ;;  %v804_v42 = vrot.slane %v7938_v10, %v7959_v31  ;;  %v627_v46 = vld [vmem:[%s9154_s1 + $0x12b0] sm:$0xff] }
 0x188   :  { %1684 = vmatpush2.msra.mxu0 %v291_v25  ;;  %1757 = vmatpush2.msra.mxu1 %v699_v43  ;;  %v1166_v57 = vpop.f32.mrf.mxu1  ;;  %v628_v25 = vld [vmem:[%s9154_s1 + $0x12b8] sm:$0xff] }
 0x189   :  { %1685 = vmatprep.subr.mxu0 %v280_v47  ;;  %1758 = vmatprep.subr.mxu1 %v688_v41  ;;  %v7929_v62 = vadd.f32 %v1166_v57, %v1090_v5  ;;  %v616_v5 = vld [vmem:[%s9154_s1 + $0x1258] sm:$0xff]  ;;  %v928_v26 = vadd.f32 %v7064_v20, %v804_v42 }
 0x18a   :  { %1686 = vmatpush2.msra.mxu0 %v279_v48  ;;  %1759 = vmatpush2.msra.mxu1 %v687_v11 }
 0x18b   :  { %1687 = vmatprep.subr.mxu0 %v268_v50  ;;  %1760 = vmatprep.subr.mxu1 %v676_v45  ;;  %v1235_v16 = vpop.f32.mrf.mxu0  ;;  %v8009_v20 = vadd.f32 %v7078_v24, %v928_v26 }
 0x18c   :  { %1688 = vmatpush2.msra.mxu0 %v267_v52  ;;  %1761 = vmatpush2.msra.mxu1 %v675_v54  ;;  %v1312_v17 = vpop.f32.mrf.mxu1  ;;  %v1236_v18 = vadd.f32 %v1235_v16, %v820_v27 }
 0x18d   :  { %1689 = vmatprep.subr.mxu0 %v256_v58  ;;  %1762 = vmatprep.subr.mxu1 %v664_v59  ;;  %v1237_v28 = vpop.f32.mrf.mxu0 }
 0x18e   :  { %1547 = vmatprep.mubr.f32.mxu0 %v7511_v56  ;;  %1690 = vmatpush2.msra.mxu0 %v255_v8  ;;  %v1238_v0 = vadd.f32 %v1237_v28, %v824_v14  ;;  %v1314_v9 = vpop.f32.mrf.mxu1  ;;  %v7991_v11 = vadd.f32 %v1312_v17, %v1236_v18  ;;  %v840_v17 = vrot.slane %v798_v3, %v7023_v7 }
 0x18f   :  { %1763 = vmatpush2.msra.mxu1 %v663_v15  ;;  %1548 = vmatmul.mubr.f32.gmra.mxu0 %v7523_v61  ;;  %v844_v18 = vrot.slane %v798_v3, %v7432_v60 }
 0x190   :  { %1691 = vmatprep.subr.mxu0 %v244_v1  ;;  %1764 = vmatprep.subr.mxu1 %v652_v2  ;;  %v7974_v39 = vadd.f32 %v1314_v9, %v1238_v0  ;;  %v1241_v40 = vpop.f32.mrf.mxu0 }
 0x191   :  { %1692 = vmatpush2.msra.mxu0 %v243_v22  ;;  %1765 = vmatpush2.msra.mxu1 %v651_v23  ;;  %v1318_v21 = vpop.f32.mrf.mxu1  ;;  %v1242_v48 = vadd.f32 %v1241_v40, %v820_v27 }
 0x192   :  { %1693 = vmatprep.subr.mxu0 %v232_v32  ;;  %1766 = vmatprep.subr.mxu1 %v640_v33  ;;  %v1243_v43 = vpop.f32.mrf.mxu0 }
 0x193   :  { %1624 = vmatprep.mubr.f32.mxu1 %v7543_v12  ;;  %1694 = vmatpush2.msra.mxu0 %v231_v36  ;;  %v1244_v47 = vadd.f32 %v1243_v43, %v824_v14  ;;  %v1320_v41 = vpop.f32.mrf.mxu1  ;;  %v836_v14 = vrot.slane %v798_v3, %v7959_v31  ;;  %v848_v43 = vrot.slane %v798_v3, %v7447_v35 }
 0x194   :  { %1695 = vmatprep.mubr.f32.mxu0 %v7549_v13  ;;  %1767 = vmatpush2.msra.mxu1 %v639_v37  ;;  %v615_v13 = vld [vmem:[%s9154_s1 + $0x1250] sm:$0xff] }
 0x195   :  { %1625 = vmatmul.mubr.f32.gmra.mxu1 %v7567_v19  ;;  %1696 = vmatmul.mubr.f32.vlgmr.msra.gmra.mxu0 %v7573_v63  ;;  %v7997_v49 = vadd.f32 %v1320_v41, %v1244_v47  ;;  %v5442_v63 = vmov 0.0  }
 0x196   :  { %1768 = vmatprep.subr.mxu1 %v628_v25  ;;  %1701 = vmatprep.mubr.f32.mxu0 %v7511_v56  ;;  %v8003_v56 = vadd.f32 %v1318_v21, %v1242_v48 }
 0x197   :  { %1769 = vmatpush2.msra.mxu1 %v627_v46  ;;  %1772 = vmatprep.mubr.f32.mxu1 %v7597_v29  ;;  %v934_v29 = vadd.f32 %v7429_v30, %v804_v42  ;;  %v827_v30 = vsub.s32 6, %v6996_v55 }
 0x198   :  { %1770 = vmatprep.subr.mxu1 %v616_v5  ;;  %5157 = vmatprep.subr.mxu0 %v5442_v63 }
 0x199   :  { %1771 = vmatpush2.msra.mxu1 %v615_v13  ;;  %1702 = vmatmul.mubr.f32.gmra.mxu0 %v7523_v61  ;;  %v8028_v24 = vadd.f32 %v7456_v38, %v934_v29  ;;  %v831_v61 = vsub.s32 7, %v6996_v55 }
 0x19a   :  { %1773 = vmatmul.mubr.f32.vlgmr.msra.gmra.mxu1 %v7609_v6  ;;  %5158 = vmatpush3.xpose.msk.msra.mxu0 %vm1785_vm0, %v7991_v11 }
 0x19b   :  { %1778 = vmatprep.mubr.f32.mxu1 %v7543_v12  ;;  %5159 = vmatprep.mubr.msk.f32.mxu0 %vm5443_vm1, %v5442_v63  ;;  %v828_v12 = vrot.slane %v7938_v10, %v827_v30  ;;  %v832_v6 = vrot.slane %v7938_v10, %v831_v61 }
 0x19c   :  { %5162 = vmatprep.subr.mxu1 %v5442_v63  ;;  %5167 = vmatprep.subr.mxu0 %v5442_v63 }
 0x19d   :  { %5160 = vmatmul.mubr.msk.f32.vlgmr.msra.gmra.mxu0 %vm1785_vm0, %v8009_v20  ;;  %5163 = vmatpush3.xpose.msk.msra.mxu1 %vm1785_vm0, %v8003_v56 }
 0x19e   :  { %1779 = vmatmul.mubr.f32.gmra.mxu1 %v7567_v19  ;;  %5172 = vmatprep.subr.mxu1 %v5442_v63 }
 0x19f   :  { %5164 = vmatprep.mubr.msk.f32.mxu1 %vm5443_vm1, %v5442_v63  ;;  %5169 = vmatprep.mubr.msk.f32.mxu0 %vm5443_vm1, %v5442_v63 }
 0x1a2   :  { %5165 = vmatmul.mubr.msk.f32.vlgmr.msra.gmra.mxu1 %vm1785_vm0, %v8028_v24 }
 0x1a3   :  { %5174 = vmatprep.mubr.msk.f32.mxu1 %vm5443_vm1, %v5442_v63 }
 0x1ce   :  { %v1389_v19 = vpop.f32.mrf.mxu0 }
 0x1cf   :  { %v1390_v50 = vadd.f32 %v1389_v19, %v828_v12 }
 0x1d0   :  { %v1391_v45 = vpop.f32.mrf.mxu0 }
 0x1d1   :  { %v1392_v52 = vadd.f32 %v1391_v45, %v832_v6 }
 0x1d3   :  { %v1466_v38 = vpop.f32.mrf.mxu1 }
 0x1d4   :  { %v8038_v54 = vadd.f32 %v1466_v38, %v1390_v50 }
 0x1d5   :  { %v1468_v57 = vpop.f32.mrf.mxu1 }
 0x1d6   :  { %v8040_v58 = vadd.f32 %v1468_v57, %v1392_v52 }
 0x20c   :  { %v1395_v59 = vpop.f32.mrf.mxu0 }
 0x20d   :  { %v1396_v8 = vadd.f32 %v1395_v59, %v828_v12 }
 0x20e   :  { %v1397_v55 = vpop.f32.mrf.mxu0 }
 0x20f   :  { %v1398_v15 = vadd.f32 %v1397_v55, %v832_v6 }
 0x212   :  { %v1472_v10 = vpop.f32.mrf.mxu1  ;;  %v1543_v16 = vpop.f32.mrf.mxu0 }
 0x213   :  { %v8047_v1 = vadd.f32 %v1472_v10, %v1396_v8  ;;  %v1544_v22 = vadd.f32 %v1543_v16, %v836_v14 }
 0x214   :  { %v1474_v2 = vpop.f32.mrf.mxu1  ;;  %v1545_v23 = vpop.f32.mrf.mxu0 }
 0x215   :  { %v8049_v27 = vadd.f32 %v1474_v2, %v1398_v15  ;;  %v1546_v28 = vadd.f32 %v1545_v23, %v840_v17 }
 0x217   :  { %v1620_v32 = vpop.f32.mrf.mxu1 }
 0x218   :  { %v8051_v33 = vadd.f32 %v1620_v32, %v1544_v22 }
 0x219   :  { %v1622_v0 = vpop.f32.mrf.mxu1 }
 0x21a   :  { %v8053_v36 = vadd.f32 %v1622_v0, %v1546_v28  ;;  %5168 = vmatpush3.msra.mxu0 %v8051_v33 }
 0x21b   :  { %5177 = vmatprep.subr.mxu0 %v5442_v63 }
 0x24f   :  { %v1549_v9 = vpop.f32.mrf.mxu0 }
 0x250   :  { %v1550_v40 = vadd.f32 %v1549_v9, %v836_v14 }
 0x251   :  { %v1551_v37 = vpop.f32.mrf.mxu0 }
 0x252   :  { %v1552_v21 = vadd.f32 %v1551_v37, %v840_v17 }
 0x255   :  { %v1626_v42 = vpop.f32.mrf.mxu1  ;;  %v1697_v25 = vpop.f32.mrf.mxu0 }
 0x256   :  { %v8059_v46 = vadd.f32 %v1626_v42, %v1550_v40  ;;  %v1698_v47 = vadd.f32 %v1697_v25, %v844_v18 }
 0x257   :  { %v1628_v41 = vpop.f32.mrf.mxu1  ;;  %v1699_v5 = vpop.f32.mrf.mxu0 }
 0x258   :  { %v8061_v48 = vadd.f32 %v1628_v41, %v1552_v21  ;;  %5173 = vmatpush3.msra.mxu1 %v8059_v46  ;;  %v1700_v13 = vadd.f32 %v1699_v5, %v848_v43 }
 0x259   :  { %v1703_v26 = vpop.f32.mrf.mxu0  ;;  %5182 = vmatprep.subr.mxu1 %v5442_v63 }
 0x25a   :  { %v1774_v29 = vpop.f32.mrf.mxu1  ;;  %v1704_v30 = vadd.f32 %v1703_v26, %v844_v18 }
 0x25b   :  { %v8065_v61 = vadd.f32 %v1774_v29, %v1698_v47  ;;  %v1705_v12 = vpop.f32.mrf.mxu0 }
 0x25c   :  { %v1776_v19 = vpop.f32.mrf.mxu1  ;;  %v1706_v6 = vadd.f32 %v1705_v12, %v848_v43 }
 0x25d   :  { %v8067_v50 = vadd.f32 %v1776_v19, %v1700_v13  ;;  %v1858_v45 = vpop.f32.mrf.mxu0 }
 0x25e   :  { %v1780_v52 = vpop.f32.mrf.mxu1  ;;  %v1939_v38 = vsel %vm1938_vm2, %v1858_v45, -inf }
 0x25f   :  { %v8070_v57 = vadd.f32 %v1780_v52, %v1704_v30  ;;  %1940 = vmax.xlane.f32.xlu0 %v1939_v38  ;;  %v5161_v59 = vpop.f32.mrf.mxu0 }
 0x260   :  { %v1782_v3 = vpop.f32.mrf.mxu1 }
 0x261   :  { %v8072_v55 = vadd.f32 %v1782_v3, %v1706_v6 }
 0x262   :  { %v1934_v8 = vpop.f32.mrf.mxu1 }
 0x263   :  { %v1942_v14 = vsel %vm1938_vm2, %v1934_v8, -inf }
 0x264   :  { %v5166_v15 = vpop.f32.mrf.mxu1  ;;  %1943 = vmax.xlane.f32.xlu0 %v1942_v14 }
 0x27a   :  { %2107 = vrot.lane.b32.xlu0 %v8009_v20, %s5444_s2 }
 0x27e   :  { %2187 = vrot.lane.b32.xlu0 %v8003_v56, %s5444_s2 }
 0x282   :  { %2185 = vrot.lane.b32.xlu0 %v8028_v24, %s5444_s2 }
 0x2e8   :  { %v1941_v10 = vpop.xlane.xlu0 %1940 }
 0x2e9   :  { %v1945_v16 = vsub.f32 %v1858_v45, %v1941_v10 }
 0x2eb   :  { %v1947_v17 = vmul.f32 1.442695, %v1945_v16 }
 0x2ed   :  { %5343 = vpow2.f32 %v1947_v17  ;;  %v1944_v23 = vpop.xlane.xlu0 %1943 }
 0x2ee   :  { %v1946_v28 = vsub.f32 %v1934_v8, %v1944_v23 }
 0x2f0   :  { %v1949_v20 = vmul.f32 1.442695, %v1946_v28 }
 0x2f2   :  { %5345 = vpow2.f32 %v1949_v20 }
 0x2fa   :  { %v5344_v2 = vpop.eup %5343 }
 0x2fb   :  { %v1951_v22 = vsel %vm1938_vm2, %v5344_v2, 0.0 }
 0x2fc   :  { %1952 = vadd.xlane.f32.xlu1 %v1951_v22 }
 0x2ff   :  { %v5346_v32 = vpop.eup %5345 }
 0x300   :  { %v1954_v56 = vsel %vm1938_vm2, %v5346_v32, 0.0 }
 0x30d   :  { %2109 = vrot.lane.b32.xlu1 %v7991_v11, %s5444_s2  ;;  %v2108_v11 = vpop.permute.xlu0 %2107 }
 0x311   :  { %v2188_v21 = vpop.permute.xlu0 %2187 }
 0x315   :  { %v2186_v25 = vpop.permute.xlu0 %2185 }
 0x331   :  { %1955 = vadd.xlane.f32.xlu1 %v1954_v56 }
 0x385   :  { %v1953_v24 = vpop.xlane.xlu1 %1952 }
 0x386   :  { %5347 = vrcp.f32 %v1953_v24 }
 0x389   :  { %v2110_v37 = vpop.permute.xlu1 %2109 }
 0x393   :  { %v5348_v0 = vpop.eup %5347 }
 0x394   :  { %v1958_v9 = vmul.f32 %v5348_v0, %v5344_v2 }
 0x396   :  { %5170 = vmatmul.mubr.msk.f32.vlgmr.msra.gmra.mxu0 %vm1938_vm2, %v1958_v9 }
 0x397   :  { %5178 = vmatpush3.xpose.msk.msra.mxu0 %vm1785_vm0, %v2110_v37  ;;  %5179 = vmatprep.mubr.msk.f32.mxu0 %vm5443_vm1, %v5442_v63 }
 0x398   :  { %5187 = vmatprep.subr.mxu0 %v5442_v63 }
 0x39a   :  { %5180 = vmatmul.mubr.msk.f32.vlgmr.msra.gmra.mxu0 %vm1785_vm0, %v2108_v11 }
 0x39b   :  { %5189 = vmatprep.mubr.msk.f32.mxu0 %vm5443_vm1, %v5442_v63 }
 0x3ba   :  { %v1956_v40 = vpop.xlane.xlu1 %1955 }
 0x3bb   :  { %5349 = vrcp.f32 %v1956_v40 }
 0x3c8   :  { %v5350_v18 = vpop.eup %5349 }
 0x3c9   :  { %v1960_v42 = vmul.f32 %v5350_v18, %v5346_v32 }
 0x3cb   :  { %5175 = vmatmul.mubr.msk.f32.vlgmr.msra.gmra.mxu1 %vm1938_vm2, %v1960_v42 }
 0x3cc   :  { %5183 = vmatpush3.xpose.msk.msra.mxu1 %vm1785_vm0, %v2188_v21  ;;  %5184 = vmatprep.mubr.msk.f32.mxu1 %vm5443_vm1, %v5442_v63 }
 0x3cd   :  { %5192 = vmatprep.subr.mxu1 %v5442_v63 }
 0x3cf   :  { %5185 = vmatmul.mubr.msk.f32.vlgmr.msra.gmra.mxu1 %vm1785_vm0, %v2186_v25 }
 0x3d0   :  { %5194 = vmatprep.mubr.msk.f32.mxu1 %vm5443_vm1, %v5442_v63 }
 0x456   :  { %v8101_v43 = vpop.f32.mrf.mxu0 }
 0x458   :  { %v5171_v47 = vpop.f32.mrf.mxu0 }
 0x45a   :  { %v2181_v41 = vpop.f32.mrf.mxu0 }
 0x45b   :  { %v2263_v5 = vsel %vm1938_vm2, %v2181_v41, -inf }
 0x45c   :  { %2264 = vmax.xlane.f32.xlu0 %v2263_v5  ;;  %v5181_v13 = vpop.f32.mrf.mxu0 }
 0x48b   :  { %v8104_v26 = vpop.f32.mrf.mxu1 }
 0x48d   :  { %v5176_v29 = vpop.f32.mrf.mxu1 }
 0x48f   :  { %v2259_v30 = vpop.f32.mrf.mxu1 }
 0x490   :  { %v2266_v12 = vsel %vm1938_vm2, %v2259_v30, -inf }
 0x491   :  { %2267 = vmax.xlane.f32.xlu1 %v2266_v12  ;;  %v5186_v19 = vpop.f32.mrf.mxu1 }
 0x4e5   :  { %v2265_v6 = vpop.xlane.xlu0 %2264 }
 0x4e6   :  { %v2269_v45 = vsub.f32 %v2181_v41, %v2265_v6 }
 0x4e8   :  { %v2271_v52 = vmul.f32 1.442695, %v2269_v45 }
 0x4ea   :  { %5351 = vpow2.f32 %v2271_v52 }
 0x4f7   :  { %v5352_v38 = vpop.eup %5351 }
 0x4f8   :  { %v2275_v59 = vsel %vm1938_vm2, %v5352_v38, 0.0 }
 0x4f9   :  { %2276 = vadd.xlane.f32.xlu1 %v2275_v59 }
 0x50a   :  { %2286 = vrot.lane.b32.xlu1 %v8051_v33, %s5444_s2 }
 0x51a   :  { %v2268_v3 = vpop.xlane.xlu1 %2267 }
 0x51b   :  { %v2270_v8 = vsub.f32 %v2259_v30, %v2268_v3 }
 0x51d   :  { %v2273_v14 = vmul.f32 1.442695, %v2270_v8 }
 0x51f   :  { %5353 = vpow2.f32 %v2273_v14 }
 0x52c   :  { %v5354_v15 = vpop.eup %5353 }
 0x52d   :  { %v2278_v10 = vsel %vm1938_vm2, %v5354_v15, 0.0 }
 0x52e   :  { %2279 = vadd.xlane.f32.xlu0 %v2278_v10 }
 0x544   :  { %2363 = vrot.lane.b32.xlu0 %v8059_v46, %s5444_s2 }
 0x582   :  { %v2277_v16 = vpop.xlane.xlu1 %2276 }
 0x583   :  { %5355 = vrcp.f32 %v2277_v16 }
 0x586   :  { %v2287_v17 = vpop.permute.xlu1 %2286 }
 0x587   :  { %5188 = vmatpush3.msra.mxu0 %v2287_v17 }
 0x588   :  { %5197 = vmatprep.subr.mxu0 %v5442_v63 }
 0x590   :  { %v5356_v2 = vpop.eup %5355 }
 0x591   :  { %v2282_v22 = vmul.f32 %v5356_v2, %v5352_v38 }
 0x593   :  { %5190 = vmatmul.mubr.msk.f32.vlgmr.msra.gmra.mxu0 %vm1938_vm2, %v2282_v22 }
 0x594   :  { %5198 = vmatpush3.xpose.msk.msra.mxu0 %vm1785_vm0, %v7974_v39  ;;  %5199 = vmatprep.mubr.msk.f32.mxu0 %vm5443_vm1, %v5442_v63 }
 0x595   :  { %5207 = vmatprep.subr.mxu0 %v5442_v63 }
 0x597   :  { %5200 = vmatmul.mubr.msk.f32.vlgmr.msra.gmra.mxu0 %vm1785_vm0, %v7099_v34 }
 0x598   :  { %5208 = vmatpush3.msra.mxu0 %v8053_v36  ;;  %5209 = vmatprep.mubr.msk.f32.mxu0 %vm5443_vm1, %v5442_v63 }
 0x599   :  { %5217 = vmatprep.subr.mxu0 %v5442_v63 }
 0x5b7   :  { %v2280_v33 = vpop.xlane.xlu0 %2279 }
 0x5b8   :  { %5357 = vrcp.f32 %v2280_v33 }
 0x5bb   :  { %v2364_v46 = vpop.permute.xlu0 %2363 }
 0x5bc   :  { %5193 = vmatpush3.msra.mxu1 %v2364_v46 }
 0x5bd   :  { %5202 = vmatprep.subr.mxu1 %v5442_v63 }
 0x5c5   :  { %v5358_v23 = vpop.eup %5357 }
 0x5c6   :  { %v2284_v28 = vmul.f32 %v5358_v23, %v5354_v15 }
 0x5c8   :  { %5195 = vmatmul.mubr.msk.f32.vlgmr.msra.gmra.mxu1 %vm1938_vm2, %v2284_v28 }
 0x5c9   :  { %5203 = vmatpush3.xpose.msk.msra.mxu1 %vm1785_vm0, %v7997_v49  ;;  %5204 = vmatprep.mubr.msk.f32.mxu1 %vm5443_vm1, %v5442_v63 }
 0x5ca   :  { %5212 = vmatprep.subr.mxu1 %v5442_v63 }
 0x5cc   :  { %5205 = vmatmul.mubr.msk.f32.vlgmr.msra.gmra.mxu1 %vm1785_vm0, %v7480_v44 }
 0x5cd   :  { %5213 = vmatpush3.msra.mxu1 %v8061_v48  ;;  %5214 = vmatprep.mubr.msk.f32.mxu1 %vm5443_vm1, %v5442_v63 }
 0x5ce   :  { %5222 = vmatprep.subr.mxu1 %v5442_v63 }
 0x653   :  { %v8139_v20 = vpop.f32.mrf.mxu0 }
 0x655   :  { %v5191_v32 = vpop.f32.mrf.mxu0 }
 0x657   :  { %v2511_v56 = vpop.f32.mrf.mxu0 }
 0x658   :  { %v2591_v24 = vsel %vm1938_vm2, %v2511_v56, -inf }
 0x659   :  { %2592 = vmax.xlane.f32.xlu1 %v2591_v24  ;;  %v5201_v0 = vpop.f32.mrf.mxu0 }
 0x688   :  { %v8142_v9 = vpop.f32.mrf.mxu1 }
 0x68a   :  { %v5196_v37 = vpop.f32.mrf.mxu1 }
 0x68c   :  { %v2587_v11 = vpop.f32.mrf.mxu1 }
 0x68d   :  { %v2594_v40 = vsel %vm1938_vm2, %v2587_v11, -inf }
 0x68e   :  { %2595 = vmax.xlane.f32.xlu0 %v2594_v40  ;;  %v5206_v18 = vpop.f32.mrf.mxu1 }
 0x6a4   :  { %2759 = vrot.lane.b32.xlu0 %v7099_v34, %s5444_s2 }
 0x6a8   :  { %2839 = vrot.lane.b32.xlu0 %v7997_v49, %s5444_s2 }
 0x6ac   :  { %2837 = vrot.lane.b32.xlu0 %v7480_v44, %s5444_s2 }
 0x6e2   :  { %v2593_v21 = vpop.xlane.xlu1 %2592 }
 0x6e3   :  { %v2597_v42 = vsub.f32 %v2511_v56, %v2593_v21 }
 0x6e5   :  { %v2599_v25 = vmul.f32 1.442695, %v2597_v42 }
 0x6e7   :  { %5359 = vpow2.f32 %v2599_v25 }
 0x6f4   :  { %v5360_v47 = vpop.eup %5359 }
 0x6f5   :  { %v2603_v41 = vsel %vm1938_vm2, %v5360_v47, 0.0 }
 0x6f6   :  { %2604 = vadd.xlane.f32.xlu1 %v2603_v41 }
 0x707   :  { %2761 = vrot.lane.b32.xlu1 %v7974_v39, %s5444_s2 }
 0x717   :  { %v2596_v5 = vpop.xlane.xlu0 %2595 }
 0x718   :  { %v2598_v13 = vsub.f32 %v2587_v11, %v2596_v5 }
 0x71a   :  { %v2601_v34 = vmul.f32 1.442695, %v2598_v13 }
 0x71b   :  { %v2760_v39 = vpop.permute.xlu0 %2759 }
 0x71c   :  { %5361 = vpow2.f32 %v2601_v34 }
 0x71f   :  { %v2840_v52 = vpop.permute.xlu0 %2839 }
 0x723   :  { %v2838_v59 = vpop.permute.xlu0 %2837 }
 0x729   :  { %v5362_v29 = vpop.eup %5361 }
 0x72a   :  { %v2606_v49 = vsel %vm1938_vm2, %v5362_v29, 0.0 }
 0x72b   :  { %2607 = vadd.xlane.f32.xlu1 %v2606_v49 }
 0x77f   :  { %v2605_v44 = vpop.xlane.xlu1 %2604 }
 0x780   :  { %5363 = vrcp.f32 %v2605_v44 }
 0x783   :  { %v2762_v19 = vpop.permute.xlu1 %2761 }
 0x78d   :  { %v5364_v30 = vpop.eup %5363 }
 0x78e   :  { %v2610_v12 = vmul.f32 %v5364_v30, %v5360_v47 }
 0x790   :  { %5210 = vmatmul.mubr.msk.f32.vlgmr.msra.gmra.mxu0 %vm1938_vm2, %v2610_v12 }
 0x791   :  { %5218 = vmatpush3.xpose.msk.msra.mxu0 %vm1785_vm0, %v2762_v19  ;;  %5219 = vmatprep.mubr.msk.f32.mxu0 %vm5443_vm1, %v5442_v63 }
 0x792   :  { %5227 = vmatprep.subr.mxu0 %v5442_v63 }
 0x794   :  { %5220 = vmatmul.mubr.msk.f32.vlgmr.msra.gmra.mxu0 %vm1785_vm0, %v2760_v39 }
 0x795   :  { %5229 = vmatprep.mubr.msk.f32.mxu0 %vm5443_vm1, %v5442_v63 }
 0x7b4   :  { %v2608_v6 = vpop.xlane.xlu1 %2607 }
 0x7b5   :  { %5365 = vrcp.f32 %v2608_v6 }
 0x7c2   :  { %v5366_v45 = vpop.eup %5365 }
 0x7c3   :  { %v2612_v38 = vmul.f32 %v5366_v45, %v5362_v29 }
 0x7c5   :  { %5215 = vmatmul.mubr.msk.f32.vlgmr.msra.gmra.mxu1 %vm1938_vm2, %v2612_v38 }
 0x7c6   :  { %5223 = vmatpush3.xpose.msk.msra.mxu1 %vm1785_vm0, %v2840_v52  ;;  %5224 = vmatprep.mubr.msk.f32.mxu1 %vm5443_vm1, %v5442_v63 }
 0x7c7   :  { %5232 = vmatprep.subr.mxu1 %v5442_v63 }
 0x7c9   :  { %5225 = vmatmul.mubr.msk.f32.vlgmr.msra.gmra.mxu1 %vm1785_vm0, %v2838_v59 }
 0x7ca   :  { %5234 = vmatprep.mubr.msk.f32.mxu1 %vm5443_vm1, %v5442_v63 }
 0x850   :  { %v8171_v3 = vpop.f32.mrf.mxu0 }
 0x852   :  { %v5211_v8 = vpop.f32.mrf.mxu0 }
 0x854   :  { %v2833_v14 = vpop.f32.mrf.mxu0 }
 0x855   :  { %v2915_v15 = vsel %vm1938_vm2, %v2833_v14, -inf }
 0x856   :  { %2916 = vmax.xlane.f32.xlu0 %v2915_v15  ;;  %v5221_v10 = vpop.f32.mrf.mxu0 }
 0x885   :  { %v8174_v16 = vpop.f32.mrf.mxu1 }
 0x887   :  { %v5216_v17 = vpop.f32.mrf.mxu1 }
 0x889   :  { %v2911_v2 = vpop.f32.mrf.mxu1 }
 0x88a   :  { %v2918_v22 = vsel %vm1938_vm2, %v2911_v2, -inf }
 0x88b   :  { %2919 = vmax.xlane.f32.xlu1 %v2918_v22  ;;  %v5226_v33 = vpop.f32.mrf.mxu1 }
 0x8df   :  { %v2917_v46 = vpop.xlane.xlu0 %2916 }
 0x8e0   :  { %v2921_v23 = vsub.f32 %v2833_v14, %v2917_v46 }
 0x8e2   :  { %v2923_v28 = vmul.f32 1.442695, %v2921_v23 }
 0x8e4   :  { %5367 = vpow2.f32 %v2923_v28 }
 0x8f1   :  { %v5368_v32 = vpop.eup %5367 }
 0x8f2   :  { %v2927_v56 = vsel %vm1938_vm2, %v5368_v32, 0.0 }
 0x8f3   :  { %2928 = vadd.xlane.f32.xlu1 %v2927_v56 }
 0x904   :  { %2938 = vrot.lane.b32.xlu1 %v8053_v36, %s5444_s2 }
 0x914   :  { %v2920_v24 = vpop.xlane.xlu1 %2919 }
 0x915   :  { %v2922_v0 = vsub.f32 %v2911_v2, %v2920_v24 }
 0x917   :  { %v2925_v37 = vmul.f32 1.442695, %v2922_v0 }
 0x919   :  { %5369 = vpow2.f32 %v2925_v37 }
 0x926   :  { %v5370_v11 = vpop.eup %5369 }
 0x927   :  { %v2930_v40 = vsel %vm1938_vm2, %v5370_v11, 0.0 }
 0x928   :  { %2931 = vadd.xlane.f32.xlu0 %v2930_v40 }
 0x93e   :  { %3015 = vrot.lane.b32.xlu0 %v8061_v48, %s5444_s2 }
 0x97c   :  { %v2929_v18 = vpop.xlane.xlu1 %2928 }
 0x97d   :  { %5371 = vrcp.f32 %v2929_v18 }
 0x980   :  { %v2939_v21 = vpop.permute.xlu1 %2938 }
 0x981   :  { %5228 = vmatpush3.msra.mxu0 %v2939_v21 }
 0x982   :  { %5237 = vmatprep.subr.mxu0 %v5442_v63 }
 0x98a   :  { %v5372_v42 = vpop.eup %5371 }
 0x98b   :  { %v2934_v25 = vmul.f32 %v5372_v42, %v5368_v32 }
 0x98d   :  { %5230 = vmatmul.mubr.msk.f32.vlgmr.msra.gmra.mxu0 %vm1938_vm2, %v2934_v25 }
 0x98e   :  { %5238 = vmatpush3.xpose.msk.msra.mxu0 %vm1785_vm0, %v8038_v54  ;;  %5239 = vmatprep.mubr.msk.f32.mxu0 %vm5443_vm1, %v5442_v63 }
 0x98f   :  { %5247 = vmatprep.subr.mxu0 %v5442_v63 }
 0x991   :  { %5240 = vmatmul.mubr.msk.f32.vlgmr.msra.gmra.mxu0 %vm1785_vm0, %v7505_v53 }
 0x992   :  { %5248 = vmatpush3.msra.mxu0 %v8065_v61  ;;  %5249 = vmatprep.mubr.msk.f32.mxu0 %vm5443_vm1, %v5442_v63 }
 0x993   :  { %5257 = vmatprep.subr.mxu0 %v5442_v63 }
 0x9b1   :  { %v2932_v36 = vpop.xlane.xlu0 %2931 }
 0x9b2   :  { %5373 = vrcp.f32 %v2932_v36 }
 0x9b5   :  { %v3016_v48 = vpop.permute.xlu0 %3015 }
 0x9b6   :  { %5233 = vmatpush3.msra.mxu1 %v3016_v48 }
 0x9b7   :  { %5242 = vmatprep.subr.mxu1 %v5442_v63 }
 0x9bf   :  { %v5374_v47 = vpop.eup %5373 }
 0x9c0   :  { %v2936_v41 = vmul.f32 %v5374_v47, %v5370_v11 }
 0x9c2   :  { %5235 = vmatmul.mubr.msk.f32.vlgmr.msra.gmra.mxu1 %vm1938_vm2, %v2936_v41 }
 0x9c3   :  { %5243 = vmatpush3.xpose.msk.msra.mxu1 %vm1785_vm0, %v8047_v1  ;;  %5244 = vmatprep.mubr.msk.f32.mxu1 %vm5443_vm1, %v5442_v63 }
 0x9c4   :  { %5252 = vmatprep.subr.mxu1 %v5442_v63 }
 0x9c6   :  { %5245 = vmatmul.mubr.msk.f32.vlgmr.msra.gmra.mxu1 %vm1785_vm0, %v7915_v51 }
 0x9c7   :  { %5253 = vmatpush3.msra.mxu1 %v8070_v57  ;;  %5254 = vmatprep.mubr.msk.f32.mxu1 %vm5443_vm1, %v5442_v63 }
 0x9c8   :  { %5262 = vmatprep.subr.mxu1 %v5442_v63 }
 0xa4d   :  { %v8209_v5 = vpop.f32.mrf.mxu0 }
 0xa4f   :  { %v5231_v13 = vpop.f32.mrf.mxu0 }
 0xa51   :  { %v3163_v34 = vpop.f32.mrf.mxu0 }
 0xa52   :  { %v3243_v29 = vsel %vm1938_vm2, %v3163_v34, -inf }
 0xa53   :  { %3244 = vmax.xlane.f32.xlu1 %v3243_v29  ;;  %v5241_v49 = vpop.f32.mrf.mxu0 }
 0xa82   :  { %v8212_v44 = vpop.f32.mrf.mxu1 }
 0xa84   :  { %v5236_v30 = vpop.f32.mrf.mxu1 }
 0xa86   :  { %v3239_v12 = vpop.f32.mrf.mxu1 }
 0xa87   :  { %v3246_v19 = vsel %vm1938_vm2, %v3239_v12, -inf }
 0xa88   :  { %3247 = vmax.xlane.f32.xlu0 %v3246_v19  ;;  %v5246_v39 = vpop.f32.mrf.mxu1 }
 0xa9e   :  { %3411 = vrot.lane.b32.xlu0 %v7505_v53, %s5444_s2 }
 0xaa2   :  { %3491 = vrot.lane.b32.xlu0 %v8047_v1, %s5444_s2 }
 0xaa6   :  { %3489 = vrot.lane.b32.xlu0 %v7915_v51, %s5444_s2 }
 0xadc   :  { %v3245_v6 = vpop.xlane.xlu1 %3244 }
 0xadd   :  { %v3249_v45 = vsub.f32 %v3163_v34, %v3245_v6 }
 0xadf   :  { %v3251_v52 = vmul.f32 1.442695, %v3249_v45 }
 0xae1   :  { %5375 = vpow2.f32 %v3251_v52 }
 0xaee   :  { %v5376_v38 = vpop.eup %5375 }
 0xaef   :  { %v3255_v59 = vsel %vm1938_vm2, %v5376_v38, 0.0 }
 0xaf0   :  { %3256 = vadd.xlane.f32.xlu1 %v3255_v59 }
 0xb01   :  { %3413 = vrot.lane.b32.xlu1 %v8038_v54, %s5444_s2 }
 0xb11   :  { %v3248_v8 = vpop.xlane.xlu0 %3247 }
 0xb12   :  { %v3250_v14 = vsub.f32 %v3239_v12, %v3248_v8 }
 0xb14   :  { %v3253_v53 = vmul.f32 1.442695, %v3250_v14 }
 0xb15   :  { %v3412_v54 = vpop.permute.xlu0 %3411 }
 0xb16   :  { %5377 = vpow2.f32 %v3253_v53 }
 0xb19   :  { %v3492_v46 = vpop.permute.xlu0 %3491 }
 0xb1d   :  { %v3490_v28 = vpop.permute.xlu0 %3489 }
 0xb23   :  { %v5378_v15 = vpop.eup %5377 }
 0xb24   :  { %v3258_v1 = vsel %vm1938_vm2, %v5378_v15, 0.0 }
 0xb25   :  { %3259 = vadd.xlane.f32.xlu1 %v3258_v1 }
 0xb79   :  { %v3257_v51 = vpop.xlane.xlu1 %3256 }
 0xb7a   :  { %5379 = vrcp.f32 %v3257_v51 }
 0xb7d   :  { %v3414_v2 = vpop.permute.xlu1 %3413 }
 0xb87   :  { %v5380_v10 = vpop.eup %5379 }
 0xb88   :  { %v3262_v17 = vmul.f32 %v5380_v10, %v5376_v38 }
 0xb8a   :  { %5250 = vmatmul.mubr.msk.f32.vlgmr.msra.gmra.mxu0 %vm1938_vm2, %v3262_v17 }
 0xb8b   :  { %5258 = vmatpush3.xpose.msk.msra.mxu0 %vm1785_vm0, %v3414_v2  ;;  %5259 = vmatprep.mubr.msk.f32.mxu0 %vm5443_vm1, %v5442_v63 }
 0xb8c   :  { %5267 = vmatprep.subr.mxu0 %v5442_v63 }
 0xb8e   :  { %5260 = vmatmul.mubr.msk.f32.vlgmr.msra.gmra.mxu0 %vm1785_vm0, %v3412_v54 }
 0xb8f   :  { %5269 = vmatprep.mubr.msk.f32.mxu0 %vm5443_vm1, %v5442_v63 }
 0xbae   :  { %v3260_v22 = vpop.xlane.xlu1 %3259 }
 0xbaf   :  { %5381 = vrcp.f32 %v3260_v22 }
 0xbbc   :  { %v5382_v33 = vpop.eup %5381 }
 0xbbd   :  { %v3264_v23 = vmul.f32 %v5382_v33, %v5378_v15 }
 0xbbf   :  { %5255 = vmatmul.mubr.msk.f32.vlgmr.msra.gmra.mxu1 %vm1938_vm2, %v3264_v23 }
 0xbc0   :  { %5263 = vmatpush3.xpose.msk.msra.mxu1 %vm1785_vm0, %v3492_v46  ;;  %5264 = vmatprep.mubr.msk.f32.mxu1 %vm5443_vm1, %v5442_v63 }
 0xbc1   :  { %5272 = vmatprep.subr.mxu1 %v5442_v63 }
 0xbc3   :  { %5265 = vmatmul.mubr.msk.f32.vlgmr.msra.gmra.mxu1 %vm1785_vm0, %v3490_v28 }
 0xbc4   :  { %5274 = vmatprep.mubr.msk.f32.mxu1 %vm5443_vm1, %v5442_v63 }
 0xc4a   :  { %v8241_v32 = vpop.f32.mrf.mxu0 }
 0xc4c   :  { %v5251_v56 = vpop.f32.mrf.mxu0 }
 0xc4e   :  { %v3485_v24 = vpop.f32.mrf.mxu0 }
 0xc4f   :  { %v3567_v0 = vsel %vm1938_vm2, %v3485_v24, -inf }
 0xc50   :  { %3568 = vmax.xlane.f32.xlu0 %v3567_v0  ;;  %v5261_v37 = vpop.f32.mrf.mxu0 }
 0xc7f   :  { %v8244_v11 = vpop.f32.mrf.mxu1 }
 0xc81   :  { %v5256_v40 = vpop.f32.mrf.mxu1 }
 0xc83   :  { %v3563_v18 = vpop.f32.mrf.mxu1 }
 0xc84   :  { %v3570_v21 = vsel %vm1938_vm2, %v3563_v18, -inf }
 0xc85   :  { %3571 = vmax.xlane.f32.xlu1 %v3570_v21  ;;  %v5266_v42 = vpop.f32.mrf.mxu1 }
 0xcd9   :  { %v3569_v25 = vpop.xlane.xlu0 %3568 }
 0xcda   :  { %v3573_v36 = vsub.f32 %v3485_v24, %v3569_v25 }
 0xcdc   :  { %v3575_v48 = vmul.f32 1.442695, %v3573_v36 }
 0xcde   :  { %5383 = vpow2.f32 %v3575_v48 }
 0xceb   :  { %v5384_v47 = vpop.eup %5383 }
 0xcec   :  { %v3579_v41 = vsel %vm1938_vm2, %v5384_v47, 0.0 }
 0xced   :  { %3580 = vadd.xlane.f32.xlu1 %v3579_v41 }
 0xcfe   :  { %3590 = vrot.lane.b32.xlu1 %v8065_v61, %s5444_s2 }
 0xd0e   :  { %v3572_v13 = vpop.xlane.xlu1 %3571 }
 0xd0f   :  { %v3574_v34 = vsub.f32 %v3563_v18, %v3572_v13 }
 0xd11   :  { %v3577_v29 = vmul.f32 1.442695, %v3574_v34 }
 0xd13   :  { %5385 = vpow2.f32 %v3577_v29 }
 0xd20   :  { %v5386_v49 = vpop.eup %5385 }
 0xd21   :  { %v3582_v30 = vsel %vm1938_vm2, %v5386_v49, 0.0 }
 0xd22   :  { %3583 = vadd.xlane.f32.xlu0 %v3582_v30 }
 0xd38   :  { %3667 = vrot.lane.b32.xlu0 %v8070_v57, %s5444_s2 }
 0xd76   :  { %v3581_v12 = vpop.xlane.xlu1 %3580 }
 0xd77   :  { %5387 = vrcp.f32 %v3581_v12 }
 0xd7a   :  { %v3591_v19 = vpop.permute.xlu1 %3590 }
 0xd7b   :  { %5268 = vmatpush3.msra.mxu0 %v3591_v19 }
 0xd7c   :  { %5277 = vmatprep.subr.mxu0 %v5442_v63 }
 0xd84   :  { %v5388_v39 = vpop.eup %5387 }
 0xd85   :  { %v3586_v6 = vmul.f32 %v5388_v39, %v5384_v47 }
 0xd87   :  { %5270 = vmatmul.mubr.msk.f32.vlgmr.msra.gmra.mxu0 %vm1938_vm2, %v3586_v6 }
 0xd88   :  { %5278 = vmatpush3.xpose.msk.msra.mxu0 %vm1785_vm0, %v8040_v58  ;;  %5279 = vmatprep.mubr.msk.f32.mxu0 %vm5443_vm1, %v5442_v63 }
 0xd89   :  { %5287 = vmatprep.subr.mxu0 %v5442_v63 }
 0xd8b   :  { %5280 = vmatmul.mubr.msk.f32.vlgmr.msra.gmra.mxu0 %vm1785_vm0, %v7532_v4 }
 0xd8c   :  { %5288 = vmatpush3.msra.mxu0 %v8067_v50  ;;  %5289 = vmatprep.mubr.msk.f32.mxu0 %vm5443_vm1, %v5442_v63 }
 0xd8d   :  { %5297 = vmatprep.subr.mxu0 %v5442_v63 }
 0xdab   :  { %v3584_v61 = vpop.xlane.xlu0 %3583 }
 0xdac   :  { %5389 = vrcp.f32 %v3584_v61 }
 0xdaf   :  { %v3668_v57 = vpop.permute.xlu0 %3667 }
 0xdb0   :  { %5273 = vmatpush3.msra.mxu1 %v3668_v57  ;;  %v5323_v57 = vpack.i.bf16 %v8139_v20, %v8209_v5 }
 0xdb1   :  { %5282 = vmatprep.subr.mxu1 %v5442_v63 }
 0xdb9   :  { %v5390_v45 = vpop.eup %5389 }
 0xdba   :  { %v3588_v52 = vmul.f32 %v5390_v45, %v5386_v49 }
 0xdbc   :  { %5275 = vmatmul.mubr.msk.f32.vlgmr.msra.gmra.mxu1 %vm1938_vm2, %v3588_v52 }
 0xdbd   :  { %5283 = vmatpush3.xpose.msk.msra.mxu1 %vm1785_vm0, %v8049_v27  ;;  %5284 = vmatprep.mubr.msk.f32.mxu1 %vm5443_vm1, %v5442_v63 }
 0xdbe   :  { %5292 = vmatprep.subr.mxu1 %v5442_v63 }
 0xdc0   :  { %5285 = vmatmul.mubr.msk.f32.vlgmr.msra.gmra.mxu1 %vm1785_vm0, %v7929_v62 }
 0xdc1   :  { %5293 = vmatpush3.msra.mxu1 %v8072_v55  ;;  %5294 = vmatprep.mubr.msk.f32.mxu1 %vm5443_vm1, %v5442_v63 }
 0xdc2   :  { %5302 = vmatprep.subr.mxu1 %v5442_v63 }
 0xe47   :  { %v8279_v38 = vpop.f32.mrf.mxu0 }
 0xe49   :  { %v5271_v59 = vpop.f32.mrf.mxu0 }
 0xe4b   :  { %v3815_v8 = vpop.f32.mrf.mxu0 }
 0xe4c   :  { %v3895_v14 = vsel %vm1938_vm2, %v3815_v8, -inf }
 0xe4d   :  { %3896 = vmax.xlane.f32.xlu1 %v3895_v14  ;;  %v5281_v53 = vpop.f32.mrf.mxu0 }
 0xe7c   :  { %v8282_v15 = vpop.f32.mrf.mxu1 }
 0xe7e   :  { %v5276_v1 = vpop.f32.mrf.mxu1 }
 0xe80   :  { %v3891_v51 = vpop.f32.mrf.mxu1 }
 0xe81   :  { %v3898_v10 = vsel %vm1938_vm2, %v3891_v51, -inf }
 0xe82   :  { %3899 = vmax.xlane.f32.xlu0 %v3898_v10  ;;  %v5286_v17 = vpop.f32.mrf.mxu1 }
 0xe83   :  { %v4495_v17 = vld [vmem:[%s9156_s3 + $0x1e0] sm:$0xff] }
 0xe98   :  { %4063 = vrot.lane.b32.xlu0 %v7532_v4, %s5444_s2 }
 0xe9c   :  { %4143 = vrot.lane.b32.xlu0 %v8049_v27, %s5444_s2 }
 0xea0   :  { %4141 = vrot.lane.b32.xlu0 %v7929_v62, %s5444_s2 }
 0xed6   :  { %v3897_v2 = vpop.xlane.xlu1 %3896 }
 0xed7   :  { %v3901_v54 = vsub.f32 %v3815_v8, %v3897_v2 }
 0xed9   :  { %v3903_v22 = vmul.f32 1.442695, %v3901_v54  ;;  %v4491_v54 = vld [vmem:[%s9156_s3 + $0x1c0] sm:$0xff] }
 0xedb   :  { %5391 = vpow2.f32 %v3903_v22  ;;  %v4488_v22 = vld [vmem:[%s9156_s3 + $0x1a8] sm:$0xff] }
 0xee8   :  { %v5392_v33 = vpop.eup %5391 }
 0xee9   :  { %v3907_v46 = vsel %vm1938_vm2, %v5392_v33, 0.0 }
 0xeea   :  { %3908 = vadd.xlane.f32.xlu1 %v3907_v46  ;;  %v4483_v46 = vld [vmem:[%s9156_s3 + $0x180] sm:$0xff] }
 0xefb   :  { %4065 = vrot.lane.b32.xlu1 %v8040_v58, %s5444_s2 }
 0xf0b   :  { %v3900_v23 = vpop.xlane.xlu0 %3899 }
 0xf0c   :  { %v3902_v28 = vsub.f32 %v3891_v51, %v3900_v23  ;;  %v4480_v23 = vld [vmem:[%s9156_s3 + $0x168] sm:$0xff] }
 0xf0e   :  { %v3905_v4 = vmul.f32 1.442695, %v3902_v28  ;;  %v4479_v28 = vld [vmem:[%s9156_s3 + $0x160] sm:$0xff] }
 0xf0f   :  { %v4064_v58 = vpop.permute.xlu0 %4063 }
 0xf10   :  { %5393 = vpow2.f32 %v3905_v4  ;;  %v4476_v4 = vld [vmem:[%s9156_s3 + $0x148] sm:$0xff] }
 0xf13   :  { %v4144_v21 = vpop.permute.xlu0 %4143 }
 0xf17   :  { %v4142_v25 = vpop.permute.xlu0 %4141 }
 0xf1d   :  { %v5394_v56 = vpop.eup %5393 }
 0xf1e   :  { %v3910_v27 = vsel %vm1938_vm2, %v5394_v56, 0.0 }
 0xf1f   :  { %3911 = vadd.xlane.f32.xlu1 %v3910_v27  ;;  %v4472_v27 = vld [vmem:[%s9156_s3 + $0x128] sm:$0xff] }
 0xf73   :  { %v3909_v62 = vpop.xlane.xlu1 %3908 }
 0xf74   :  { %5395 = vrcp.f32 %v3909_v62  ;;  %v4471_v62 = vld [vmem:[%s9156_s3 + $0x120] sm:$0xff] }
 0xf77   :  { %v4066_v37 = vpop.permute.xlu1 %4065 }
 0xf81   :  { %v5396_v24 = vpop.eup %5395 }
 0xf82   :  { %v3914_v0 = vmul.f32 %v5396_v24, %v5392_v33  ;;  %v4487_v33 = vld [vmem:[%s9156_s3 + $0x1a0] sm:$0xff]  ;;  %v4468_v24 = vld [vmem:[%s9156_s3 + $0x108] sm:$0xff] }
 0xf84   :  { %5290 = vmatmul.mubr.msk.f32.vlgmr.msra.gmra.mxu0 %vm1938_vm2, %v3914_v0  ;;  %v4467_v0 = vld [vmem:[%s9156_s3 + $0x100] sm:$0xff] }
 0xf85   :  { %5298 = vmatpush3.xpose.msk.msra.mxu0 %vm1785_vm0, %v4066_v37  ;;  %5299 = vmatprep.mubr.msk.f32.mxu0 %vm5443_vm1, %v5442_v63  ;;  %v4464_v37 = vld [vmem:[%s9156_s3 + $0xe8] sm:$0xff] }
 0xf86   :  { %5307 = vmatprep.subr.mxu0 %v5442_v63 }
 0xf88   :  { %5300 = vmatmul.mubr.msk.f32.vlgmr.msra.gmra.mxu0 %vm1785_vm0, %v4064_v58  ;;  %v4463_v58 = vld [vmem:[%s9156_s3 + $0xe0] sm:$0xff] }
 0xf89   :  { %5309 = vmatprep.mubr.msk.f32.mxu0 %vm5443_vm1, %v5442_v63 }
 0xfa8   :  { %v3912_v40 = vpop.xlane.xlu1 %3911 }
 0xfa9   :  { %5397 = vrcp.f32 %v3912_v40  ;;  %v4460_v40 = vld [vmem:[%s9156_s3 + $0xc8] sm:$0xff] }
 0xfb6   :  { %v5398_v18 = vpop.eup %5397 }
 0xfb7   :  { %v3916_v42 = vmul.f32 %v5398_v18, %v5394_v56  ;;  %v4475_v56 = vld [vmem:[%s9156_s3 + $0x140] sm:$0xff] }
 0xfb8   :  { %v4459_v18 = vld [vmem:[%s9156_s3 + $0xc0] sm:$0xff] }
 0xfb9   :  { %5295 = vmatmul.mubr.msk.f32.vlgmr.msra.gmra.mxu1 %vm1938_vm2, %v3916_v42  ;;  %v4455_v42 = vld [vmem:[%s9156_s3 + $0xa0] sm:$0xff] }
 0xfba   :  { %5303 = vmatpush3.xpose.msk.msra.mxu1 %vm1785_vm0, %v4144_v21  ;;  %5304 = vmatprep.mubr.msk.f32.mxu1 %vm5443_vm1, %v5442_v63  ;;  %v4456_v21 = vld [vmem:[%s9156_s3 + $0xa8] sm:$0xff] }
 0xfbb   :  { %5312 = vmatprep.subr.mxu1 %v5442_v63 }
 0xfbd   :  { %5305 = vmatmul.mubr.msk.f32.vlgmr.msra.gmra.mxu1 %vm1785_vm0, %v4142_v25  ;;  %v4452_v25 = vld [vmem:[%s9156_s3 + $0x88] sm:$0xff] }
 0xfbe   :  { %5314 = vmatprep.mubr.msk.f32.mxu1 %vm5443_vm1, %v5442_v63 }
0x1044   :  { %v8311_v36 = vpop.f32.mrf.mxu0 }
0x1046   :  { %v5291_v48 = vpop.f32.mrf.mxu0 }
0x1047   :  { %v4451_v48 = vld [vmem:[%s9156_s3 + $0x80] sm:$0xff] }
0x1048   :  { %v4137_v47 = vpop.f32.mrf.mxu0 }
0x1049   :  { %v4219_v41 = vsel %vm1938_vm2, %v4137_v47, -inf }
0x104a   :  { %4220 = vmax.xlane.f32.xlu0 %v4219_v41  ;;  %v5301_v13 = vpop.f32.mrf.mxu0  ;;  %v4447_v41 = vld [vmem:[%s9156_s3 + $0x60] sm:$0xff] }
0x104b   :  { %v4444_v13 = vld [vmem:[%s9156_s3 + $0x48] sm:$0xff] }
0x1079   :  { %v8314_v34 = vpop.f32.mrf.mxu1 }
0x107b   :  { %v5296_v29 = vpop.f32.mrf.mxu1 }
0x107c   :  { %v4443_v29 = vld [vmem:[%s9156_s3 + $0x40] sm:$0xff] }
0x107d   :  { %v4215_v49 = vpop.f32.mrf.mxu1 }
0x107e   :  { %v4222_v30 = vsel %vm1938_vm2, %v4215_v49, -inf }
0x107f   :  { %4223 = vmax.xlane.f32.xlu1 %v4222_v30  ;;  %v5306_v12 = vpop.f32.mrf.mxu1  ;;  %v4439_v30 = vld [vmem:[%s9156_s3 + $0x20] sm:$0xff] }
0x1080   :  { %v4436_v12 = vld [vmem:[%s9156_s3 + $0x8] sm:$0xff] }
0x10d3   :  { %v4221_v19 = vpop.xlane.xlu0 %4220 }
0x10d4   :  { %v4225_v39 = vsub.f32 %v4137_v47, %v4221_v19  ;;  %v4448_v47 = vld [vmem:[%s9156_s3 + $0x68] sm:$0xff]  ;;  %v4435_v19 = vld [vmem:[%s9156_s3] sm:$0xff] }
0x10d6   :  { %v4227_v6 = vmul.f32 1.442695, %v4225_v39  ;;  %v4560_v39 = vld [vmem:[%s9156_s3 + $0x3e8] sm:$0xff] }
0x10d8   :  { %5399 = vpow2.f32 %v4227_v6  ;;  %v4559_v6 = vld [vmem:[%s9156_s3 + $0x3e0] sm:$0xff] }
0x10e5   :  { %v5400_v63 = vpop.eup %5399 }
0x10e6   :  { %v4231_v61 = vsel %vm1938_vm2, %v5400_v63, 0.0 }
0x10e7   :  { %4232 = vadd.xlane.f32.xlu1 %v4231_v61  ;;  %v4555_v61 = vld [vmem:[%s9156_s3 + $0x3c0] sm:$0xff] }
0x10f8   :  { %4242 = vrot.lane.b32.xlu1 %v8067_v50, %s5444_s2  ;;  %v4496_v50 = vld [vmem:[%s9156_s3 + $0x1e8] sm:$0xff] }
0x10fc   :  { %5324 = vrot.lane.b32.xlu1 %v5323_v57, %s5444_s2  ;;  %v4552_v57 = vld [vmem:[%s9156_s3 + $0x3a8] sm:$0xff] }
0x1108   :  { %v4224_v45 = vpop.xlane.xlu1 %4223 }
0x1109   :  { %v4226_v52 = vsub.f32 %v4215_v49, %v4224_v45  ;;  %v4440_v49 = vld [vmem:[%s9156_s3 + $0x28] sm:$0xff]  ;;  %v4551_v45 = vld [vmem:[%s9156_s3 + $0x3a0] sm:$0xff] }
0x110b   :  { %v4229_v59 = vmul.f32 1.442695, %v4226_v52  ;;  %v4548_v52 = vld [vmem:[%s9156_s3 + $0x388] sm:$0xff] }
0x110d   :  { %5401 = vpow2.f32 %v4229_v59 }
0x111a   :  { %v8323_v8 = vpop.eup %5401 }
0x111b   :  { %v4234_v14 = vsel %vm1938_vm2, %v8323_v8, 0.0 }
0x111c   :  { %4235 = vadd.xlane.f32.xlu0 %v4234_v14  ;;  %v4547_v14 = vld [vmem:[%s9156_s3 + $0x380] sm:$0xff] }
0x1132   :  { %4319 = vrot.lane.b32.xlu0 %v8072_v55, %s5444_s2  ;;  %v4492_v55 = vld [vmem:[%s9156_s3 + $0x1c8] sm:$0xff] }
0x1170   :  { %v4233_v53 = vpop.xlane.xlu1 %4232 }
0x1171   :  { %5403 = vrcp.f32 %v4233_v53  ;;  %v4544_v53 = vld [vmem:[%s9156_s3 + $0x368] sm:$0xff] }
0x1174   :  { %v4243_v20 = vpop.permute.xlu1 %4242 }
0x1175   :  { %5308 = vmatpush3.msra.mxu0 %v4243_v20  ;;  %v4540_v20 = vld [vmem:[%s9156_s3 + $0x348] sm:$0xff] }
0x1176   :  { %4713 = vmatprep.subr.mxu0 %v4496_v50  ;;  %v4543_v50 = vld [vmem:[%s9156_s3 + $0x360] sm:$0xff] }
0x1178   :  { %v8332_v5 = vpop.permute.xlu1 %5324 }
0x1179   :  { %v5326_v1 = vunpack.i.l.bf16 %v8332_v5 }
0x117b   :  { %v8344_v2 = vsel %vm1785_vm0, %v8171_v3, %v5326_v1  ;;  %v4484_v3 = vld [vmem:[%s9156_s3 + $0x188] sm:$0xff] }
0x117e   :  { %v5404_v51 = vpop.eup %5403 }
0x117f   :  { %v4238_v10 = vmul.f32 %v5404_v51, %v5400_v63  ;;  %v4556_v63 = vld [vmem:[%s9156_s3 + $0x3c8] sm:$0xff]  ;;  %v4539_v51 = vld [vmem:[%s9156_s3 + $0x340] sm:$0xff] }
0x1181   :  { %5310 = vmatmul.mubr.msk.f32.vlgmr.msra.gmra.mxu0 %vm1938_vm2, %v4238_v10  ;;  %v4536_v10 = vld [vmem:[%s9156_s3 + $0x328] sm:$0xff] }
0x1182   :  { %4714 = vmatpush1.msra.mxu0 %v4495_v17  ;;  %4777 = vmatprep.mubr.f32.mxu0 %v8344_v2  ;;  %v4535_v17 = vld [vmem:[%s9156_s3 + $0x320] sm:$0xff] }
0x1183   :  { %4715 = vmatprep.subr.mxu0 %v4492_v55  ;;  %v4532_v55 = vld [vmem:[%s9156_s3 + $0x308] sm:$0xff] }
0x1184   :  { %4716 = vmatpush1.msra.mxu0 %v4491_v54  ;;  %v4531_v54 = vld [vmem:[%s9156_s3 + $0x300] sm:$0xff] }
0x1185   :  { %4717 = vmatprep.subr.mxu0 %v4488_v22  ;;  %v4528_v22 = vld [vmem:[%s9156_s3 + $0x2e8] sm:$0xff] }
0x1186   :  { %4718 = vmatpush1.msra.mxu0 %v4487_v33  ;;  %v4527_v33 = vld [vmem:[%s9156_s3 + $0x2e0] sm:$0xff] }
0x1187   :  { %4719 = vmatprep.subr.mxu0 %v4484_v3  ;;  %v4524_v3 = vld [vmem:[%s9156_s3 + $0x2c8] sm:$0xff] }
0x1188   :  { %4720 = vmatpush1.msra.mxu0 %v4483_v46  ;;  %v4523_v46 = vld [vmem:[%s9156_s3 + $0x2c0] sm:$0xff] }
0x1189   :  { %4721 = vmatprep.subr.mxu0 %v4480_v23  ;;  %v4520_v23 = vld [vmem:[%s9156_s3 + $0x2a8] sm:$0xff] }
0x118a   :  { %4722 = vmatpush1.msra.mxu0 %v4479_v28 }
0x118b   :  { %4723 = vmatprep.subr.mxu0 %v4476_v4  ;;  %v4519_v4 = vld [vmem:[%s9156_s3 + $0x2a0] sm:$0xff] }
0x118c   :  { %4724 = vmatpush1.msra.mxu0 %v4475_v56 }
0x118d   :  { %4725 = vmatprep.subr.mxu0 %v4472_v27  ;;  %v4516_v27 = vld [vmem:[%s9156_s3 + $0x288] sm:$0xff] }
0x118e   :  { %4726 = vmatpush1.msra.mxu0 %v4471_v62  ;;  %v4515_v62 = vld [vmem:[%s9156_s3 + $0x280] sm:$0xff] }
0x118f   :  { %4727 = vmatprep.subr.mxu0 %v4468_v24  ;;  %v4512_v24 = vld [vmem:[%s9156_s3 + $0x268] sm:$0xff] }
0x1190   :  { %4728 = vmatpush1.msra.mxu0 %v4467_v0  ;;  %v4508_v0 = vld [vmem:[%s9156_s3 + $0x248] sm:$0xff] }
0x1191   :  { %4729 = vmatprep.subr.mxu0 %v4464_v37  ;;  %v4507_v37 = vld [vmem:[%s9156_s3 + $0x240] sm:$0xff] }
0x1192   :  { %4730 = vmatpush1.msra.mxu0 %v4463_v58  ;;  %v4504_v58 = vld [vmem:[%s9156_s3 + $0x228] sm:$0xff] }
0x1193   :  { %4731 = vmatprep.subr.mxu0 %v4460_v40  ;;  %v4503_v40 = vld [vmem:[%s9156_s3 + $0x220] sm:$0xff] }
0x1194   :  { %4732 = vmatpush1.msra.mxu0 %v4459_v18  ;;  %v5327_v18 = vunpack.i.h.bf16 %v8332_v5  ;;  %v4624_v5 = vld [vmem:[%s9156_s3 + $0x5e8] sm:$0xff] }
0x1195   :  { %4733 = vmatprep.subr.mxu0 %v4456_v21  ;;  %v4500_v21 = vld [vmem:[%s9156_s3 + $0x208] sm:$0xff] }
0x1196   :  { %4734 = vmatpush1.msra.mxu0 %v4455_v42  ;;  %v4499_v42 = vld [vmem:[%s9156_s3 + $0x200] sm:$0xff] }
0x1197   :  { %4735 = vmatprep.subr.mxu0 %v4452_v25  ;;  %v8535_v25 = vsel %vm1785_vm0, %v8101_v43, %v5327_v18  ;;  %v4619_v43 = vld [vmem:[%s9156_s3 + $0x5c0] sm:$0xff]  ;;  %v4462_v18 = vld [vmem:[%s9156_s3 + $0xd8] sm:$0xff] }
0x1198   :  { %4736 = vmatpush1.msra.mxu0 %v4451_v48  ;;  %v4623_v48 = vld [vmem:[%s9156_s3 + $0x5e0] sm:$0xff] }
0x1199   :  { %4737 = vmatprep.subr.mxu0 %v4448_v47  ;;  %v4620_v47 = vld [vmem:[%s9156_s3 + $0x5c8] sm:$0xff] }
0x119a   :  { %4738 = vmatpush1.msra.mxu0 %v4447_v41  ;;  %v4616_v41 = vld [vmem:[%s9156_s3 + $0x5a8] sm:$0xff] }
0x119b   :  { %4739 = vmatprep.subr.mxu0 %v4444_v13  ;;  %v4615_v13 = vld [vmem:[%s9156_s3 + $0x5a0] sm:$0xff] }
0x119c   :  { %4740 = vmatpush1.msra.mxu0 %v4443_v29  ;;  %v4612_v29 = vld [vmem:[%s9156_s3 + $0x588] sm:$0xff] }
0x119d   :  { %4741 = vmatprep.subr.mxu0 %v4440_v49  ;;  %v4611_v49 = vld [vmem:[%s9156_s3 + $0x580] sm:$0xff] }
0x119e   :  { %4742 = vmatpush1.msra.mxu0 %v4439_v30  ;;  %v4608_v30 = vld [vmem:[%s9156_s3 + $0x568] sm:$0xff] }
0x119f   :  { %4743 = vmatprep.subr.mxu0 %v4436_v12  ;;  %v4607_v12 = vld [vmem:[%s9156_s3 + $0x560] sm:$0xff] }
0x11a0   :  { %4744 = vmatpush1.msra.mxu0 %v4435_v19  ;;  %v4498_v19 = vld [vmem:[%s9156_s3 + $0x1f8] sm:$0xff] }
0x11a1   :  { %4745 = vmatprep.subr.mxu0 %v4560_v39  ;;  %v4604_v39 = vld [vmem:[%s9156_s3 + $0x548] sm:$0xff] }
0x11a2   :  { %4746 = vmatpush2.msra.mxu0 %v4559_v6  ;;  %v4497_v6 = vld [vmem:[%s9156_s3 + $0x1f0] sm:$0xff] }
0x11a3   :  { %4747 = vmatprep.subr.mxu0 %v4556_v63  ;;  %v4603_v63 = vld [vmem:[%s9156_s3 + $0x540] sm:$0xff] }
0x11a4   :  { %4748 = vmatpush2.msra.mxu0 %v4555_v61  ;;  %v4494_v61 = vld [vmem:[%s9156_s3 + $0x1d8] sm:$0xff] }
0x11a5   :  { %4749 = vmatprep.subr.mxu0 %v4552_v57  ;;  %v4236_v59 = vpop.xlane.xlu0 %4235  ;;  %v4600_v57 = vld [vmem:[%s9156_s3 + $0x528] sm:$0xff] }
0x11a6   :  { %4750 = vmatpush2.msra.mxu0 %v4551_v45  ;;  %5405 = vrcp.f32 %v4236_v59  ;;  %v4493_v45 = vld [vmem:[%s9156_s3 + $0x1d0] sm:$0xff]  ;;  %v4490_v59 = vld [vmem:[%s9156_s3 + $0x1b8] sm:$0xff] }
0x11a7   :  { %4751 = vmatprep.subr.mxu0 %v4548_v52  ;;  %v4599_v52 = vld [vmem:[%s9156_s3 + $0x520] sm:$0xff] }
0x11a8   :  { %4752 = vmatpush2.msra.mxu0 %v4547_v14  ;;  %v4596_v14 = vld [vmem:[%s9156_s3 + $0x508] sm:$0xff] }
0x11a9   :  { %4753 = vmatprep.subr.mxu0 %v4544_v53  ;;  %v4320_v1 = vpop.permute.xlu0 %4319  ;;  %v4489_v53 = vld [vmem:[%s9156_s3 + $0x1b0] sm:$0xff] }
0x11aa   :  { %4754 = vmatpush2.msra.mxu0 %v4543_v50  ;;  %5313 = vmatpush3.msra.mxu1 %v4320_v1  ;;  %v4486_v50 = vld [vmem:[%s9156_s3 + $0x198] sm:$0xff]  ;;  %v4485_v1 = vld [vmem:[%s9156_s3 + $0x190] sm:$0xff] }
0x11ab   :  { %4755 = vmatprep.subr.mxu0 %v4540_v20  ;;  %4790 = vmatprep.subr.mxu1 %v4624_v5  ;;  %v4595_v20 = vld [vmem:[%s9156_s3 + $0x500] sm:$0xff]  ;;  %v4568_v5 = vld [vmem:[%s9156_s3 + $0x428] sm:$0xff] }
0x11ac   :  { %4756 = vmatpush2.msra.mxu0 %v4539_v51  ;;  %v4592_v51 = vld [vmem:[%s9156_s3 + $0x4e8] sm:$0xff] }
0x11ad   :  { %4757 = vmatprep.subr.mxu0 %v4536_v10  ;;  %v4482_v10 = vld [vmem:[%s9156_s3 + $0x178] sm:$0xff] }
0x11ae   :  { %4758 = vmatpush2.msra.mxu0 %v4535_v17  ;;  %v4591_v17 = vld [vmem:[%s9156_s3 + $0x4e0] sm:$0xff] }
0x11af   :  { %4759 = vmatprep.subr.mxu0 %v4532_v55  ;;  %v4481_v55 = vld [vmem:[%s9156_s3 + $0x170] sm:$0xff] }
0x11b0   :  { %4760 = vmatpush2.msra.mxu0 %v4531_v54  ;;  %v4588_v54 = vld [vmem:[%s9156_s3 + $0x4c8] sm:$0xff] }
0x11b1   :  { %4761 = vmatprep.subr.mxu0 %v4528_v22  ;;  %v4478_v22 = vld [vmem:[%s9156_s3 + $0x158] sm:$0xff] }
0x11b2   :  { %4762 = vmatpush2.msra.mxu0 %v4527_v33  ;;  %v4587_v33 = vld [vmem:[%s9156_s3 + $0x4c0] sm:$0xff] }
0x11b3   :  { %v5406_v28 = vpop.eup %5405  ;;  %4763 = vmatprep.subr.mxu0 %v4524_v3  ;;  %v4477_v3 = vld [vmem:[%s9156_s3 + $0x150] sm:$0xff] }
0x11b4   :  { %4764 = vmatpush2.msra.mxu0 %v4523_v46  ;;  %v4240_v56 = vmul.f32 %v5406_v28, %v8323_v8  ;;  %v4511_v8 = vld [vmem:[%s9156_s3 + $0x260] sm:$0xff]  ;;  %v4584_v46 = vld [vmem:[%s9156_s3 + $0x4a8] sm:$0xff] }
0x11b5   :  { %4765 = vmatprep.subr.mxu0 %v4520_v23  ;;  %v4474_v23 = vld [vmem:[%s9156_s3 + $0x138] sm:$0xff]  ;;  %v4583_v28 = vld [vmem:[%s9156_s3 + $0x4a0] sm:$0xff] }
0x11b6   :  { %4766 = vmatpush2.msra.mxu0 %v4519_v4  ;;  %5315 = vmatmul.mubr.msk.f32.vlgmr.msra.gmra.mxu1 %vm1938_vm2, %v4240_v56  ;;  %v4473_v4 = vld [vmem:[%s9156_s3 + $0x130] sm:$0xff]  ;;  %v4580_v56 = vld [vmem:[%s9156_s3 + $0x488] sm:$0xff] }
0x11b7   :  { %4767 = vmatprep.subr.mxu0 %v4516_v27  ;;  %4791 = vmatpush1.msra.mxu1 %v4623_v48  ;;  %v4470_v27 = vld [vmem:[%s9156_s3 + $0x118] sm:$0xff] }
0x11b8   :  { %4768 = vmatpush2.msra.mxu0 %v4515_v62  ;;  %4792 = vmatprep.subr.mxu1 %v4620_v47  ;;  %v4579_v62 = vld [vmem:[%s9156_s3 + $0x480] sm:$0xff]  ;;  %v4458_v48 = vld [vmem:[%s9156_s3 + $0xb8] sm:$0xff] }
0x11b9   :  { %4769 = vmatprep.subr.mxu0 %v4512_v24  ;;  %4793 = vmatpush1.msra.mxu1 %v4619_v43  ;;  %v4469_v24 = vld [vmem:[%s9156_s3 + $0x110] sm:$0xff]  ;;  %v4567_v47 = vld [vmem:[%s9156_s3 + $0x420] sm:$0xff] }
0x11ba   :  { %4770 = vmatpush2.msra.mxu0 %v4511_v8  ;;  %4794 = vmatprep.subr.mxu1 %v4616_v41  ;;  %v4576_v8 = vld [vmem:[%s9156_s3 + $0x468] sm:$0xff]  ;;  %v4457_v43 = vld [vmem:[%s9156_s3 + $0xb0] sm:$0xff] }
0x11bb   :  { %4771 = vmatprep.subr.mxu0 %v4508_v0  ;;  %4795 = vmatpush1.msra.mxu1 %v4615_v13  ;;  %v4466_v0 = vld [vmem:[%s9156_s3 + $0xf8] sm:$0xff]  ;;  %v4564_v41 = vld [vmem:[%s9156_s3 + $0x408] sm:$0xff] }
0x11bc   :  { %4772 = vmatpush2.msra.mxu0 %v4507_v37  ;;  %4796 = vmatprep.subr.mxu1 %v4612_v29  ;;  %v4575_v37 = vld [vmem:[%s9156_s3 + $0x460] sm:$0xff]  ;;  %v4454_v13 = vld [vmem:[%s9156_s3 + $0x98] sm:$0xff] }
0x11bd   :  { %4773 = vmatprep.subr.mxu0 %v4504_v58  ;;  %4797 = vmatpush1.msra.mxu1 %v4611_v49  ;;  %v4465_v58 = vld [vmem:[%s9156_s3 + $0xf0] sm:$0xff]  ;;  %v4563_v29 = vld [vmem:[%s9156_s3 + $0x400] sm:$0xff] }
0x11be   :  { %4774 = vmatpush2.msra.mxu0 %v4503_v40  ;;  %4798 = vmatprep.subr.mxu1 %v4608_v30  ;;  %v4572_v40 = vld [vmem:[%s9156_s3 + $0x448] sm:$0xff]  ;;  %v4453_v49 = vld [vmem:[%s9156_s3 + $0x90] sm:$0xff] }
0x11bf   :  { %4775 = vmatprep.subr.mxu0 %v4500_v21  ;;  %4799 = vmatpush1.msra.mxu1 %v4607_v12  ;;  %v4571_v21 = vld [vmem:[%s9156_s3 + $0x440] sm:$0xff]  ;;  %v4688_v30 = vld [vmem:[%s9156_s3 + $0x7e8] sm:$0xff]  ;;  %v4450_v12 = vld [vmem:[%s9156_s3 + $0x78] sm:$0xff] }
0x11c0   :  { %4776 = vmatpush2.msra.mxu0 %v4499_v42  ;;  %4800 = vmatprep.subr.mxu1 %v4604_v39  ;;  %v4461_v42 = vld [vmem:[%s9156_s3 + $0xd0] sm:$0xff] }
0x11c1   :  { %4778 = vmatmul.mubr.f32.vlgmr.msra.gmra.mxu0 %v8535_v25  ;;  %4867 = vmatprep.subr.mxu0 %v4498_v19  ;;  %v4687_v19 = vld [vmem:[%s9156_s3 + $0x7e0] sm:$0xff]  ;;  %v4449_v39 = vld [vmem:[%s9156_s3 + $0x70] sm:$0xff] }
0x11c2   :  { %4868 = vmatpush1.msra.mxu0 %v4497_v6  ;;  %4801 = vmatpush1.msra.mxu1 %v4603_v63  ;;  %v4684_v6 = vld [vmem:[%s9156_s3 + $0x7c8] sm:$0xff]  ;;  %v4446_v63 = vld [vmem:[%s9156_s3 + $0x58] sm:$0xff] }
0x11c3   :  { %4869 = vmatprep.subr.mxu0 %v4494_v61  ;;  %4802 = vmatprep.subr.mxu1 %v4600_v57  ;;  %v4683_v61 = vld [vmem:[%s9156_s3 + $0x7c0] sm:$0xff]  ;;  %v4445_v57 = vld [vmem:[%s9156_s3 + $0x50] sm:$0xff] }
0x11c4   :  { %4870 = vmatpush1.msra.mxu0 %v4493_v45  ;;  %4803 = vmatpush1.msra.mxu1 %v4599_v52  ;;  %v4680_v45 = vld [vmem:[%s9156_s3 + $0x7a8] sm:$0xff]  ;;  %v4442_v52 = vld [vmem:[%s9156_s3 + $0x38] sm:$0xff] }
0x11c5   :  { %4871 = vmatprep.subr.mxu0 %v4490_v59  ;;  %4804 = vmatprep.subr.mxu1 %v4596_v14  ;;  %v4679_v59 = vld [vmem:[%s9156_s3 + $0x7a0] sm:$0xff]  ;;  %v4441_v14 = vld [vmem:[%s9156_s3 + $0x30] sm:$0xff] }
0x11c6   :  { %4872 = vmatpush1.msra.mxu0 %v4489_v53  ;;  %4805 = vmatpush1.msra.mxu1 %v4595_v20  ;;  %v4676_v53 = vld [vmem:[%s9156_s3 + $0x788] sm:$0xff]  ;;  %v4675_v20 = vld [vmem:[%s9156_s3 + $0x780] sm:$0xff] }
0x11c7   :  { %4873 = vmatprep.subr.mxu0 %v4486_v50  ;;  %4806 = vmatprep.subr.mxu1 %v4592_v51  ;;  %v4438_v50 = vld [vmem:[%s9156_s3 + $0x18] sm:$0xff]  ;;  %v4672_v51 = vld [vmem:[%s9156_s3 + $0x768] sm:$0xff] }
0x11c8   :  { %4874 = vmatpush1.msra.mxu0 %v4485_v1  ;;  %4807 = vmatpush1.msra.mxu1 %v4591_v17  ;;  %v4437_v1 = vld [vmem:[%s9156_s3 + $0x10] sm:$0xff]  ;;  %v4671_v17 = vld [vmem:[%s9156_s3 + $0x760] sm:$0xff] }
0x11c9   :  { %4875 = vmatprep.subr.mxu0 %v4482_v10  ;;  %4808 = vmatprep.subr.mxu1 %v4588_v54  ;;  %v4562_v10 = vld [vmem:[%s9156_s3 + $0x3f8] sm:$0xff]  ;;  %v4668_v54 = vld [vmem:[%s9156_s3 + $0x748] sm:$0xff] }
0x11ca   :  { %4876 = vmatpush1.msra.mxu0 %v4481_v55  ;;  %4809 = vmatpush1.msra.mxu1 %v4587_v33  ;;  %v4561_v55 = vld [vmem:[%s9156_s3 + $0x3f0] sm:$0xff]  ;;  %v4667_v33 = vld [vmem:[%s9156_s3 + $0x740] sm:$0xff] }
0x11cb   :  { %4877 = vmatprep.subr.mxu0 %v4478_v22  ;;  %4810 = vmatprep.subr.mxu1 %v4584_v46  ;;  %v4558_v22 = vld [vmem:[%s9156_s3 + $0x3d8] sm:$0xff]  ;;  %v4664_v46 = vld [vmem:[%s9156_s3 + $0x728] sm:$0xff] }
0x11cc   :  { %4878 = vmatpush1.msra.mxu0 %v4477_v3  ;;  %4811 = vmatpush1.msra.mxu1 %v4583_v28  ;;  %v4557_v3 = vld [vmem:[%s9156_s3 + $0x3d0] sm:$0xff]  ;;  %v4663_v28 = vld [vmem:[%s9156_s3 + $0x720] sm:$0xff] }
0x11cd   :  { %4879 = vmatprep.subr.mxu0 %v4474_v23  ;;  %4812 = vmatprep.subr.mxu1 %v4580_v56  ;;  %v4554_v23 = vld [vmem:[%s9156_s3 + $0x3b8] sm:$0xff]  ;;  %v4660_v56 = vld [vmem:[%s9156_s3 + $0x708] sm:$0xff] }
0x11ce   :  { %4880 = vmatpush1.msra.mxu0 %v4473_v4  ;;  %4813 = vmatpush1.msra.mxu1 %v4579_v62  ;;  %v4553_v4 = vld [vmem:[%s9156_s3 + $0x3b0] sm:$0xff]  ;;  %v4659_v62 = vld [vmem:[%s9156_s3 + $0x700] sm:$0xff] }
0x11cf   :  { %4881 = vmatprep.subr.mxu0 %v4470_v27  ;;  %4814 = vmatprep.subr.mxu1 %v4576_v8  ;;  %v4550_v27 = vld [vmem:[%s9156_s3 + $0x398] sm:$0xff]  ;;  %v4656_v8 = vld [vmem:[%s9156_s3 + $0x6e8] sm:$0xff] }
0x11d0   :  { %4882 = vmatpush1.msra.mxu0 %v4469_v24  ;;  %4815 = vmatpush1.msra.mxu1 %v4575_v37  ;;  %v4549_v24 = vld [vmem:[%s9156_s3 + $0x390] sm:$0xff]  ;;  %v4655_v37 = vld [vmem:[%s9156_s3 + $0x6e0] sm:$0xff] }
0x11d1   :  { %4883 = vmatprep.subr.mxu0 %v4466_v0  ;;  %4816 = vmatprep.subr.mxu1 %v4572_v40  ;;  %v4546_v0 = vld [vmem:[%s9156_s3 + $0x378] sm:$0xff]  ;;  %v4652_v40 = vld [vmem:[%s9156_s3 + $0x6c8] sm:$0xff] }
0x11d2   :  { %4884 = vmatpush1.msra.mxu0 %v4465_v58  ;;  %4817 = vmatpush1.msra.mxu1 %v4571_v21  ;;  %v4545_v58 = vld [vmem:[%s9156_s3 + $0x370] sm:$0xff]  ;;  %v4651_v21 = vld [vmem:[%s9156_s3 + $0x6c0] sm:$0xff] }
0x11d3   :  { %4885 = vmatprep.subr.mxu0 %v4462_v18  ;;  %4818 = vmatprep.subr.mxu1 %v4568_v5  ;;  %v4542_v18 = vld [vmem:[%s9156_s3 + $0x358] sm:$0xff]  ;;  %v4648_v5 = vld [vmem:[%s9156_s3 + $0x6a8] sm:$0xff] }
0x11d4   :  { %4886 = vmatpush1.msra.mxu0 %v4461_v42  ;;  %4819 = vmatpush1.msra.mxu1 %v4567_v47  ;;  %v4541_v42 = vld [vmem:[%s9156_s3 + $0x350] sm:$0xff]  ;;  %v4647_v47 = vld [vmem:[%s9156_s3 + $0x6a0] sm:$0xff] }
0x11d5   :  { %4887 = vmatprep.subr.mxu0 %v4458_v48  ;;  %4820 = vmatprep.subr.mxu1 %v4564_v41  ;;  %v4538_v48 = vld [vmem:[%s9156_s3 + $0x338] sm:$0xff]  ;;  %v4644_v41 = vld [vmem:[%s9156_s3 + $0x688] sm:$0xff] }
0x11d6   :  { %4888 = vmatpush1.msra.mxu0 %v4457_v43  ;;  %4821 = vmatpush1.msra.mxu1 %v4563_v29  ;;  %v4537_v43 = vld [vmem:[%s9156_s3 + $0x330] sm:$0xff]  ;;  %v4643_v29 = vld [vmem:[%s9156_s3 + $0x680] sm:$0xff] }
0x11d7   :  { %4889 = vmatprep.subr.mxu0 %v4454_v13  ;;  %4822 = vmatprep.subr.mxu1 %v4688_v30  ;;  %v4534_v13 = vld [vmem:[%s9156_s3 + $0x318] sm:$0xff]  ;;  %v4640_v30 = vld [vmem:[%s9156_s3 + $0x668] sm:$0xff] }
0x11d8   :  { %4890 = vmatpush1.msra.mxu0 %v4453_v49  ;;  %4823 = vmatpush2.msra.mxu1 %v4687_v19  ;;  %v4533_v49 = vld [vmem:[%s9156_s3 + $0x310] sm:$0xff]  ;;  %v4639_v19 = vld [vmem:[%s9156_s3 + $0x660] sm:$0xff] }
0x11d9   :  { %4891 = vmatprep.subr.mxu0 %v4450_v12  ;;  %4824 = vmatprep.subr.mxu1 %v4684_v6  ;;  %v4530_v12 = vld [vmem:[%s9156_s3 + $0x2f8] sm:$0xff]  ;;  %v4636_v6 = vld [vmem:[%s9156_s3 + $0x648] sm:$0xff] }
0x11da   :  { %4892 = vmatpush1.msra.mxu0 %v4449_v39  ;;  %4825 = vmatpush2.msra.mxu1 %v4683_v61  ;;  %v4529_v39 = vld [vmem:[%s9156_s3 + $0x2f0] sm:$0xff]  ;;  %v4635_v61 = vld [vmem:[%s9156_s3 + $0x640] sm:$0xff] }
0x11db   :  { %4893 = vmatprep.subr.mxu0 %v4446_v63  ;;  %4826 = vmatprep.subr.mxu1 %v4680_v45  ;;  %v4526_v63 = vld [vmem:[%s9156_s3 + $0x2d8] sm:$0xff]  ;;  %v4632_v45 = vld [vmem:[%s9156_s3 + $0x628] sm:$0xff] }
0x11dc   :  { %4894 = vmatpush1.msra.mxu0 %v4445_v57  ;;  %4827 = vmatpush2.msra.mxu1 %v4679_v59  ;;  %v4525_v57 = vld [vmem:[%s9156_s3 + $0x2d0] sm:$0xff]  ;;  %v4522_v59 = vld [vmem:[%s9156_s3 + $0x2b8] sm:$0xff] }
0x11dd   :  { %4895 = vmatprep.subr.mxu0 %v4442_v52  ;;  %4828 = vmatprep.subr.mxu1 %v4676_v53  ;;  %v4631_v52 = vld [vmem:[%s9156_s3 + $0x620] sm:$0xff]  ;;  %v4521_v53 = vld [vmem:[%s9156_s3 + $0x2b0] sm:$0xff] }
0x11de   :  { %4896 = vmatpush1.msra.mxu0 %v4441_v14  ;;  %4829 = vmatpush2.msra.mxu1 %v4675_v20  ;;  %v4628_v14 = vld [vmem:[%s9156_s3 + $0x608] sm:$0xff]  ;;  %v4627_v20 = vld [vmem:[%s9156_s3 + $0x600] sm:$0xff] }
0x11df   :  { %4897 = vmatprep.subr.mxu0 %v4438_v50  ;;  %4830 = vmatprep.subr.mxu1 %v4672_v51  ;;  %v4518_v50 = vld [vmem:[%s9156_s3 + $0x298] sm:$0xff] }
0x11e0   :  { %4898 = vmatpush1.msra.mxu0 %v4437_v1  ;;  %4831 = vmatpush2.msra.mxu1 %v4671_v17  ;;  %v4517_v1 = vld [vmem:[%s9156_s3 + $0x290] sm:$0xff]  ;;  %v4626_v51 = vld [vmem:[%s9156_s3 + $0x5f8] sm:$0xff] }
0x11e1   :  { %4899 = vmatprep.subr.mxu0 %v4562_v10  ;;  %4832 = vmatprep.subr.mxu1 %v4668_v54  ;;  %v4514_v10 = vld [vmem:[%s9156_s3 + $0x278] sm:$0xff]  ;;  %v4513_v17 = vld [vmem:[%s9156_s3 + $0x270] sm:$0xff] }
0x11e2   :  { %4900 = vmatpush2.msra.mxu0 %v4561_v55  ;;  %4833 = vmatpush2.msra.mxu1 %v4667_v33  ;;  %v4510_v55 = vld [vmem:[%s9156_s3 + $0x258] sm:$0xff]  ;;  %v4509_v54 = vld [vmem:[%s9156_s3 + $0x250] sm:$0xff] }
0x11e3   :  { %4901 = vmatprep.subr.mxu0 %v4558_v22  ;;  %4834 = vmatprep.subr.mxu1 %v4664_v46  ;;  %v4506_v22 = vld [vmem:[%s9156_s3 + $0x238] sm:$0xff]  ;;  %v4505_v33 = vld [vmem:[%s9156_s3 + $0x230] sm:$0xff] }
0x11e4   :  { %4902 = vmatpush2.msra.mxu0 %v4557_v3  ;;  %4835 = vmatpush2.msra.mxu1 %v4663_v28  ;;  %v4502_v46 = vld [vmem:[%s9156_s3 + $0x218] sm:$0xff]  ;;  %v4501_v28 = vld [vmem:[%s9156_s3 + $0x210] sm:$0xff] }
0x11e5   :  { %4903 = vmatprep.subr.mxu0 %v4554_v23  ;;  %4836 = vmatprep.subr.mxu1 %v4660_v56  ;;  %v5333_v56 = vpack.i.bf16 %v8142_v9, %v8212_v44  ;;  %v4625_v9 = vld [vmem:[%s9156_s3 + $0x5f0] sm:$0xff] }
0x11e6   :  { %4904 = vmatpush2.msra.mxu0 %v4553_v4  ;;  %4837 = vmatpush2.msra.mxu1 %v4659_v62 }
0x11e7   :  { %4905 = vmatprep.subr.mxu0 %v4550_v27  ;;  %4838 = vmatprep.subr.mxu1 %v4656_v8 }
0x11e8   :  { %4906 = vmatpush2.msra.mxu0 %v4549_v24  ;;  %4839 = vmatpush2.msra.mxu1 %v4655_v37 }
0x11e9   :  { %4907 = vmatprep.subr.mxu0 %v4546_v0  ;;  %4840 = vmatprep.subr.mxu1 %v4652_v40 }
0x11ea   :  { %4908 = vmatpush2.msra.mxu0 %v4545_v58  ;;  %4841 = vmatpush2.msra.mxu1 %v4651_v21 }
0x11eb   :  { %4909 = vmatprep.subr.mxu0 %v4542_v18  ;;  %4842 = vmatprep.subr.mxu1 %v4648_v5  ;;  %v4617_v5 = vld [vmem:[%s9156_s3 + $0x5b0] sm:$0xff] }
0x11ec   :  { %4910 = vmatpush2.msra.mxu0 %v4541_v42  ;;  %4843 = vmatpush2.msra.mxu1 %v4647_v47  ;;  %v4613_v47 = vld [vmem:[%s9156_s3 + $0x590] sm:$0xff] }
0x11ed   :  { %4911 = vmatprep.subr.mxu0 %v4538_v48  ;;  %4844 = vmatprep.subr.mxu1 %v4644_v41  ;;  %v4614_v48 = vld [vmem:[%s9156_s3 + $0x598] sm:$0xff] }
0x11ee   :  { %4912 = vmatpush2.msra.mxu0 %v4537_v43  ;;  %4845 = vmatpush2.msra.mxu1 %v4643_v29  ;;  %v4606_v43 = vld [vmem:[%s9156_s3 + $0x558] sm:$0xff]  ;;  %v4597_v29 = vld [vmem:[%s9156_s3 + $0x510] sm:$0xff] }
0x11ef   :  { %4913 = vmatprep.subr.mxu0 %v4534_v13  ;;  %4846 = vmatprep.subr.mxu1 %v4640_v30  ;;  %v4602_v41 = vld [vmem:[%s9156_s3 + $0x538] sm:$0xff]  ;;  %v4601_v13 = vld [vmem:[%s9156_s3 + $0x530] sm:$0xff] }
0x11f0   :  { %4914 = vmatpush2.msra.mxu0 %v4533_v49  ;;  %4847 = vmatpush2.msra.mxu1 %v4639_v19  ;;  %v4594_v49 = vld [vmem:[%s9156_s3 + $0x4f8] sm:$0xff]  ;;  %v4593_v30 = vld [vmem:[%s9156_s3 + $0x4f0] sm:$0xff] }
0x11f1   :  { %4915 = vmatprep.subr.mxu0 %v4530_v12  ;;  %4848 = vmatprep.subr.mxu1 %v4636_v6  ;;  %v4590_v12 = vld [vmem:[%s9156_s3 + $0x4d8] sm:$0xff]  ;;  %v4589_v19 = vld [vmem:[%s9156_s3 + $0x4d0] sm:$0xff] }
0x11f2   :  { %4916 = vmatpush2.msra.mxu0 %v4529_v39  ;;  %4849 = vmatpush2.msra.mxu1 %v4635_v61  ;;  %v4586_v39 = vld [vmem:[%s9156_s3 + $0x4b8] sm:$0xff]  ;;  %v4585_v6 = vld [vmem:[%s9156_s3 + $0x4b0] sm:$0xff] }
0x11f3   :  { %4917 = vmatprep.subr.mxu0 %v4526_v63  ;;  %4850 = vmatprep.subr.mxu1 %v4632_v45  ;;  %v4582_v63 = vld [vmem:[%s9156_s3 + $0x498] sm:$0xff]  ;;  %v4581_v61 = vld [vmem:[%s9156_s3 + $0x490] sm:$0xff] }
0x11f4   :  { %4918 = vmatpush2.msra.mxu0 %v4525_v57  ;;  %4851 = vmatpush2.msra.mxu1 %v4631_v52  ;;  %v4578_v57 = vld [vmem:[%s9156_s3 + $0x478] sm:$0xff]  ;;  %v4577_v45 = vld [vmem:[%s9156_s3 + $0x470] sm:$0xff] }
0x11f5   :  { %4919 = vmatprep.subr.mxu0 %v4522_v59  ;;  %4852 = vmatprep.subr.mxu1 %v4628_v14  ;;  %v4574_v52 = vld [vmem:[%s9156_s3 + $0x458] sm:$0xff]  ;;  %v4573_v59 = vld [vmem:[%s9156_s3 + $0x450] sm:$0xff] }
0x11f6   :  { %4920 = vmatpush2.msra.mxu0 %v4521_v53  ;;  %4853 = vmatpush2.msra.mxu1 %v4627_v20  ;;  %v4570_v14 = vld [vmem:[%s9156_s3 + $0x438] sm:$0xff]  ;;  %v4569_v53 = vld [vmem:[%s9156_s3 + $0x430] sm:$0xff] }
0x11f7   :  { %4921 = vmatprep.subr.mxu0 %v4518_v50  ;;  %4944 = vmatprep.subr.mxu1 %v4626_v51  ;;  %v4566_v50 = vld [vmem:[%s9156_s3 + $0x418] sm:$0xff]  ;;  %v4565_v20 = vld [vmem:[%s9156_s3 + $0x410] sm:$0xff] }
0x11f8   :  { %4922 = vmatpush2.msra.mxu0 %v4517_v1  ;;  %v4690_v1 = vld [vmem:[%s9156_s3 + $0x7f8] sm:$0xff]  ;;  %v4689_v51 = vld [vmem:[%s9156_s3 + $0x7f0] sm:$0xff] }
0x11f9   :  { %4923 = vmatprep.subr.mxu0 %v4514_v10  ;;  %v4686_v10 = vld [vmem:[%s9156_s3 + $0x7d8] sm:$0xff] }
0x11fa   :  { %4924 = vmatpush2.msra.mxu0 %v4513_v17  ;;  %v4685_v17 = vld [vmem:[%s9156_s3 + $0x7d0] sm:$0xff] }
0x11fb   :  { %4925 = vmatprep.subr.mxu0 %v4510_v55  ;;  %v4682_v55 = vld [vmem:[%s9156_s3 + $0x7b8] sm:$0xff] }
0x11fc   :  { %4926 = vmatpush2.msra.mxu0 %v4509_v54  ;;  %v4681_v54 = vld [vmem:[%s9156_s3 + $0x7b0] sm:$0xff] }
0x11fd   :  { %4927 = vmatprep.subr.mxu0 %v4506_v22  ;;  %v4678_v22 = vld [vmem:[%s9156_s3 + $0x798] sm:$0xff] }
0x11fe   :  { %4928 = vmatpush2.msra.mxu0 %v4505_v33  ;;  %v4677_v33 = vld [vmem:[%s9156_s3 + $0x790] sm:$0xff] }
0x11ff   :  { %4929 = vmatprep.subr.mxu0 %v4502_v46  ;;  %v4673_v46 = vld [vmem:[%s9156_s3 + $0x770] sm:$0xff] }
0x1200   :  { %4930 = vmatpush2.msra.mxu0 %v4501_v28  ;;  %v4669_v28 = vld [vmem:[%s9156_s3 + $0x750] sm:$0xff] }
0x1241   :  { %v4314_v3 = vpop.f32.mrf.mxu0 }
0x1242   :  { %v5328_v23 = vpack.i.bf16 %v8279_v38, %v4314_v3  ;;  %v4674_v3 = vld [vmem:[%s9156_s3 + $0x778] sm:$0xff] }
0x1243   :  { %v5311_v4 = vpop.f32.mrf.mxu0 }
0x1244   :  { %5329 = vrot.lane.b32.xlu1 %v5328_v23, %s5444_s2  ;;  %v4670_v23 = vld [vmem:[%s9156_s3 + $0x758] sm:$0xff] }
0x1245   :  { %v4666_v4 = vld [vmem:[%s9156_s3 + $0x738] sm:$0xff] }
0x1248   :  { %5334 = vrot.lane.b32.xlu1 %v5333_v56, %s5444_s2  ;;  %v4665_v56 = vld [vmem:[%s9156_s3 + $0x730] sm:$0xff] }
0x1276   :  { %v4391_v27 = vpop.f32.mrf.mxu1 }
0x1277   :  { %v5338_v62 = vpack.i.bf16 %v8282_v15, %v4391_v27  ;;  %v4622_v15 = vld [vmem:[%s9156_s3 + $0x5d8] sm:$0xff] }
0x1278   :  { %v5316_v24 = vpop.f32.mrf.mxu1  ;;  %v4662_v27 = vld [vmem:[%s9156_s3 + $0x718] sm:$0xff] }
0x1279   :  { %5339 = vrot.lane.b32.xlu1 %v5338_v62, %s5444_s2  ;;  %v4661_v62 = vld [vmem:[%s9156_s3 + $0x710] sm:$0xff]  ;;  %v4658_v24 = vld [vmem:[%s9156_s3 + $0x6f8] sm:$0xff] }
0x12b6   :  { %v5330_v38 = vpop.permute.xlu1 %5329 }
0x12b7   :  { %v5332_v8 = vunpack.i.h.bf16 %v5330_v38  ;;  %v5331_v0 = vunpack.i.l.bf16 %v5330_v38  ;;  %v4657_v38 = vld [vmem:[%s9156_s3 + $0x6f0] sm:$0xff] }
0x12b9   :  { %v8934_v37 = vsel %vm1785_vm0, %v8311_v36, %v5331_v0  ;;  %v8938_v58 = vsel %vm1785_vm0, %v8241_v32, %v5332_v8  ;;  %v4621_v32 = vld [vmem:[%s9156_s3 + $0x5d0] sm:$0xff]  ;;  %v4618_v36 = vld [vmem:[%s9156_s3 + $0x5b8] sm:$0xff] }
0x12ba   :  { %v5335_v44 = vpop.permute.xlu1 %5334  ;;  %4854 = vmatprep.mubr.f32.mxu1 %v8934_v37  ;;  %v4654_v8 = vld [vmem:[%s9156_s3 + $0x6d8] sm:$0xff] }
0x12bb   :  { %v5337_v40 = vunpack.i.h.bf16 %v5335_v44  ;;  %v5336_v18 = vunpack.i.l.bf16 %v5335_v44  ;;  %4855 = vmatmul.mubr.f32.vlgmr.msra.gmra.mxu1 %v8938_v58 }
0x12bc   :  { %4945 = vmatpush1.msra.mxu1 %v4625_v9  ;;  %v4653_v9 = vld [vmem:[%s9156_s3 + $0x6d0] sm:$0xff] }
0x12bd   :  { %4946 = vmatprep.subr.mxu1 %v4622_v15  ;;  %v4430_v21 = vsel %vm1785_vm0, %v8174_v16, %v5336_v18  ;;  %v4428_v42 = vsel %vm1785_vm0, %v8104_v26, %v5337_v40  ;;  %v4610_v26 = vld [vmem:[%s9156_s3 + $0x578] sm:$0xff]  ;;  %v4609_v16 = vld [vmem:[%s9156_s3 + $0x570] sm:$0xff] }
0x12be   :  { %4947 = vmatpush1.msra.mxu1 %v4621_v32  ;;  %4783 = vmatprep.mubr.f32.mxu0 %v4430_v21  ;;  %v4650_v40 = vld [vmem:[%s9156_s3 + $0x6b8] sm:$0xff]  ;;  %v4649_v18 = vld [vmem:[%s9156_s3 + $0x6b0] sm:$0xff] }
0x12bf   :  { %4948 = vmatprep.subr.mxu1 %v4618_v36  ;;  %4784 = vmatmul.mubr.f32.gmra.mxu0 %v4428_v42 }
0x12c0   :  { %4949 = vmatpush1.msra.mxu1 %v4617_v5  ;;  %4931 = vmatprep.mubr.f32.mxu0 %v8344_v2  ;;  %v4605_v2 = vld [vmem:[%s9156_s3 + $0x550] sm:$0xff]  ;;  %v4642_v5 = vld [vmem:[%s9156_s3 + $0x678] sm:$0xff] }
0x12c1   :  { %4950 = vmatprep.subr.mxu1 %v4614_v48  ;;  %v4637_v48 = vld [vmem:[%s9156_s3 + $0x650] sm:$0xff] }
0x12c2   :  { %4951 = vmatpush1.msra.mxu1 %v4613_v47  ;;  %v4634_v47 = vld [vmem:[%s9156_s3 + $0x638] sm:$0xff] }
0x12c3   :  { %4952 = vmatprep.subr.mxu1 %v4610_v26  ;;  %4932 = vmatmul.mubr.f32.vlgmr.msra.gmra.mxu0 %v8535_v25  ;;  %v4598_v25 = vld [vmem:[%s9156_s3 + $0x518] sm:$0xff]  ;;  %v4633_v26 = vld [vmem:[%s9156_s3 + $0x630] sm:$0xff] }
0x12c4   :  { %4953 = vmatpush1.msra.mxu1 %v4609_v16  ;;  %4937 = vmatprep.mubr.f32.mxu0 %v4430_v21  ;;  %v4646_v21 = vld [vmem:[%s9156_s3 + $0x698] sm:$0xff]  ;;  %v4629_v16 = vld [vmem:[%s9156_s3 + $0x610] sm:$0xff] }
0x12c5   :  { %4954 = vmatprep.subr.mxu1 %v4606_v43  ;;  %v4691_v43 = vld [vmem:[%s9157_s4] sm:$0xf] }
0x12c6   :  { %4955 = vmatpush1.msra.mxu1 %v4605_v2  ;;  %v4779_v2 = vpop.f32.mrf.mxu0 }
0x12c7   :  { %4956 = vmatprep.subr.mxu1 %v4602_v41  ;;  %4938 = vmatmul.mubr.f32.gmra.mxu0 %v4428_v42  ;;  %v4645_v42 = vld [vmem:[%s9156_s3 + $0x690] sm:$0xff]  ;;  %v4696_v41 = vrot.slane %v4691_v43, %v7959_v31 }
0x12c8   :  { %4957 = vmatpush1.msra.mxu1 %v4601_v13  ;;  %v4700_v13 = vrot.slane %v4691_v43, %v7023_v7 }
0x12c9   :  { %4958 = vmatprep.subr.mxu1 %v4598_v25  ;;  %v4781_v25 = vpop.f32.mrf.mxu0 }
0x12ca   :  { %4959 = vmatpush1.msra.mxu1 %v4597_v29  ;;  %v4780_v29 = vadd.f32 %v4779_v2, %v4696_v41 }
0x12cb   :  { %4960 = vmatprep.subr.mxu1 %v4594_v49 }
0x12cc   :  { %4961 = vmatpush1.msra.mxu1 %v4593_v30  ;;  %v4782_v30 = vadd.f32 %v4781_v25, %v4700_v13 }
0x12cd   :  { %4962 = vmatprep.subr.mxu1 %v4590_v12 }
0x12ce   :  { %4963 = vmatpush1.msra.mxu1 %v4589_v19 }
0x12cf   :  { %4964 = vmatprep.subr.mxu1 %v4586_v39 }
0x12d0   :  { %4965 = vmatpush1.msra.mxu1 %v4585_v6 }
0x12d1   :  { %4966 = vmatprep.subr.mxu1 %v4582_v63 }
0x12d2   :  { %4967 = vmatpush1.msra.mxu1 %v4581_v61 }
0x12d3   :  { %4968 = vmatprep.subr.mxu1 %v4578_v57 }
0x12d4   :  { %4969 = vmatpush1.msra.mxu1 %v4577_v45 }
0x12d5   :  { %4970 = vmatprep.subr.mxu1 %v4574_v52 }
0x12d6   :  { %4971 = vmatpush1.msra.mxu1 %v4573_v59 }
0x12d7   :  { %4972 = vmatprep.subr.mxu1 %v4570_v14  ;;  %v4704_v14 = vrot.slane %v4691_v43, %v7432_v60 }
0x12d8   :  { %4973 = vmatpush1.msra.mxu1 %v4569_v53  ;;  %v4708_v53 = vrot.slane %v4691_v43, %v7447_v35 }
0x12d9   :  { %4974 = vmatprep.subr.mxu1 %v4566_v50 }
0x12da   :  { %4975 = vmatpush1.msra.mxu1 %v4565_v20 }
0x12db   :  { %4976 = vmatprep.subr.mxu1 %v4690_v1 }
0x12dc   :  { %4977 = vmatpush2.msra.mxu1 %v4689_v51 }
0x12dd   :  { %4978 = vmatprep.subr.mxu1 %v4686_v10 }
0x12de   :  { %4979 = vmatpush2.msra.mxu1 %v4685_v17 }
0x12df   :  { %4980 = vmatprep.subr.mxu1 %v4682_v55 }
0x12e0   :  { %4981 = vmatpush2.msra.mxu1 %v4681_v54 }
0x12e1   :  { %4982 = vmatprep.subr.mxu1 %v4678_v22 }
0x12e2   :  { %4983 = vmatpush2.msra.mxu1 %v4677_v33 }
0x12e3   :  { %4984 = vmatprep.subr.mxu1 %v4674_v3 }
0x12e4   :  { %4985 = vmatpush2.msra.mxu1 %v4673_v46 }
0x12e5   :  { %4986 = vmatprep.subr.mxu1 %v4670_v23 }
0x12e6   :  { %4987 = vmatpush2.msra.mxu1 %v4669_v28 }
0x12e7   :  { %4988 = vmatprep.subr.mxu1 %v4666_v4 }
0x12e8   :  { %4989 = vmatpush2.msra.mxu1 %v4665_v56 }
0x12e9   :  { %4990 = vmatprep.subr.mxu1 %v4662_v27 }
0x12ea   :  { %4991 = vmatpush2.msra.mxu1 %v4661_v62 }
0x12eb   :  { %4992 = vmatprep.subr.mxu1 %v4658_v24  ;;  %v5340_v0 = vpop.permute.xlu1 %5339 }
0x12ec   :  { %v5342_v44 = vunpack.i.h.bf16 %v5340_v0  ;;  %v5341_v15 = vunpack.i.l.bf16 %v5340_v0  ;;  %4993 = vmatpush2.msra.mxu1 %v4657_v38 }
0x12ed   :  { %4994 = vmatprep.subr.mxu1 %v4654_v8 }
0x12ee   :  { %4995 = vmatpush2.msra.mxu1 %v4653_v9  ;;  %v4434_v32 = vsel %vm1785_vm0, %v8314_v34, %v5341_v15  ;;  %v4432_v36 = vsel %vm1785_vm0, %v8244_v11, %v5342_v44  ;;  %v4641_v11 = vld [vmem:[%s9156_s3 + $0x670] sm:$0xff]  ;;  %v4638_v34 = vld [vmem:[%s9156_s3 + $0x658] sm:$0xff] }
0x12ef   :  { %4996 = vmatprep.subr.mxu1 %v4650_v40  ;;  %4860 = vmatprep.mubr.f32.mxu1 %v4434_v32 }
0x12f0   :  { %4997 = vmatpush2.msra.mxu1 %v4649_v18 }
0x12f1   :  { %4861 = vmatmul.mubr.f32.gmra.mxu1 %v4432_v36  ;;  %4998 = vmatprep.subr.mxu1 %v4646_v21 }
0x12f2   :  { %4999 = vmatpush2.msra.mxu1 %v4645_v42  ;;  %5008 = vmatprep.mubr.f32.mxu1 %v8934_v37  ;;  %v4630_v37 = vld [vmem:[%s9156_s3 + $0x618] sm:$0xff]  ;;  %s5445_s3 = smov [#allocation2]  }
0x12f3   :  { %5000 = vmatprep.subr.mxu1 %v4642_v5  ;;  %s5034_s4 = sshll.u32 %s5445_s3, 4  ;;  %s5035_s4 = int_to_ptr.vmem [resolvable:$true] %s5034_s4 }
0x12f4   :  { %5001 = vmatpush2.msra.mxu1 %v4641_v11  ;;  %s5420_s12 = scalar_lea.vmem %s5035_s4, 1024  ;;  %p5425_p1 = scmp.lt.s32.totalorder %s5035_s4, %s5035_s4 }
0x12f5   :  { %5002 = vmatprep.subr.mxu1 %v4638_v34  ;;  %p5421_p0 = scmp.ne.s32.totalorder %s5035_s4, %s5420_s12  ;;  %p5426_p2 = scmp.lt.s32.totalorder %s5420_s12, %s5420_s12 }
0x12f6   :  { %5003 = vmatpush2.msra.mxu1 %v4637_v48 }
0x12f7   :  { %5004 = vmatprep.subr.mxu1 %v4634_v47  ;;  %p5427_p3 = por %p5426_p2, %p5425_p1 }
0x12f8   :  { %5005 = vmatpush2.msra.mxu1 %v4633_v26 }
0x12f9   :  { %5006 = vmatprep.subr.mxu1 %v4630_v37  ;;  %p5428_p4 = pnand %p5427_p3, %p5421_p0 }
0x12fa   :  { %5007 = vmatpush2.msra.mxu1 %v4629_v16 }
0x12fb   :  { %5009 = vmatmul.mubr.f32.vlgmr.msra.gmra.mxu1 %v8938_v58 }
0x12fc   :  { %5014 = vmatprep.mubr.f32.mxu1 %v4434_v32 }
0x12ff   :  { %5015 = vmatmul.mubr.f32.gmra.mxu1 %v4432_v36 }
0x137b   :  { %v4856_v49 = vpop.f32.mrf.mxu1 }
0x137c   :  { %v4857_v12 = vadd.f32 %v4856_v49, %v4780_v29 }
0x137d   :  { %v4858_v19 = vpop.f32.mrf.mxu1 }
0x137e   :  { %5021 = vst [vmem:[#allocation2] sm:$0xff] %v4857_v12  ;;  %v4859_v39 = vadd.f32 %v4858_v19, %v4782_v30 }
0x137f   :  { %v4785_v58 = vpop.f32.mrf.mxu0 }
0x1380   :  { %5022 = vst [vmem:[#allocation2 + $0x8] sm:$0xff] %v4859_v39  ;;  %v4786_v63 = vadd.f32 %v4785_v58, %v4696_v41 }
0x1381   :  { %v4787_v6 = vpop.f32.mrf.mxu0 }
0x1382   :  { %v4788_v45 = vadd.f32 %v4787_v6, %v4700_v13 }
0x1383   :  { %v4933_v61 = vpop.f32.mrf.mxu0 }
0x1384   :  { %v4934_v20 = vadd.f32 %v4933_v61, %v4704_v14 }
0x1385   :  { %v4935_v7 = vpop.f32.mrf.mxu0 }
0x1386   :  { %v4936_v51 = vadd.f32 %v4935_v7, %v4708_v53 }
0x1387   :  { %v4939_v50 = vpop.f32.mrf.mxu0 }
0x1388   :  { %v4940_v54 = vadd.f32 %v4939_v50, %v4704_v14 }
0x1389   :  { %v4941_v17 = vpop.f32.mrf.mxu0 }
0x138a   :  { %v4942_v3 = vadd.f32 %v4941_v17, %v4708_v53 }
0x13b1   :  { %v4862_v57 = vpop.f32.mrf.mxu1 }
0x13b2   :  { %v4863_v52 = vadd.f32 %v4862_v57, %v4786_v63 }
0x13b3   :  { %v4864_v59 = vpop.f32.mrf.mxu1 }
0x13b4   :  { %5025 = vst [vmem:[#allocation2 + $0x20] sm:$0xff] %v4863_v52  ;;  %v4865_v31 = vadd.f32 %v4864_v59, %v4788_v45 }
0x13b6   :  { %5026 = vst [vmem:[#allocation2 + $0x28] sm:$0xff] %v4865_v31 }
0x13bb   :  { %v5010_v1 = vpop.f32.mrf.mxu1 }
0x13bc   :  { %v5011_v10 = vadd.f32 %v5010_v1, %v4934_v20 }
0x13bd   :  { %v5012_v55 = vpop.f32.mrf.mxu1 }
0x13be   :  { %5023 = vst [vmem:[#allocation2 + $0x10] sm:$0xff] %v5011_v10  ;;  %v5013_v22 = vadd.f32 %v5012_v55, %v4936_v51 }
0x13bf   :  { %v5016_v33 = vpop.f32.mrf.mxu1 }
0x13c0   :  { %5024 = vst [vmem:[#allocation2 + $0x18] sm:$0xff] %v5013_v22  ;;  %v5017_v46 = vadd.f32 %v5016_v33, %v4940_v54 }
0x13c1   :  { %v5018_v60 = vpop.f32.mrf.mxu1 }
0x13c2   :  { %5027 = vst [vmem:[#allocation2 + $0x30] sm:$0xff] %v5017_v46  ;;  %v5019_v23 = vadd.f32 %v5018_v60, %v4942_v3 }
0x13c4   :  { %5028 = vst [vmem:[#allocation2 + $0x38] sm:$0xff] %v5019_v23 }
0x13c5   :  { %5431 = shalt.err (!%p5428_p4)
}
0x13c6   :  { %s5446_s13 = smov 512   ;;  %s5447_s1 = smov 32  }
0x13c7   :  { %5040 = dma.vmem_to_hbm [thread:$0]  %s5035_s4, 1024, %s9158_s5, [#allocation3], %s5446_s13, %s5446_s13, %s5447_s1  }
0x13c8   :  { %5440 = dma.done.wait [#allocation3], 1024  }
0x13c9   :  { %5441 = vsyncadd [#allocation3], 4294966272 }
0x13ca   :  { %5044 = vsyncpa [#allocation3], 1 }

</bundles_post_ra>
